<compile_context>
chip_gen: v6e
topology: v6e:2x2x1
jax: 0.10.0
libtpu: 0.0.40
codegen_flags: <defaults>
</compile_context>

<pallas_src>
import functools

import jax
import jax.numpy as jnp
from jax import lax
from jax.experimental import pallas as pl
from jax.experimental.pallas import tpu as pltpu

SLOPE = 0.001     # leaky_relu activation_param used by conv2d_ABN in Bottleneck
BN_EPS = 1e-5
_VMEM_LIMIT = 48 * 1024 * 1024   # safe on all generations (< v7x 64 MiB physical)


def _leaky_relu(x):
    return jnp.where(x > 0, x, SLOPE * x)


# ----------------------------- fused kernel ----------------------------------
def _bottleneck_kernel(x_ref,                    # (1, HW, Cin)   f32
                       w1_ref, s1_ref, b1_ref,   # (Cin, P) bf16, (1,P), (1,P)
                       w2_ref, s2_ref, b2_ref,   # (3, 3P, P) bf16, (1,P), (1,P)
                       wfc1_ref, bfc1_ref,       # (P, R) f32, (1, R) f32
                       wfc2_ref, bfc2_ref,       # (R, P) f32, (1, P) f32
                       w3_ref, s3_ref, b3_ref,   # (P, Cout) bf16, (1,Cout), (1,Cout)
                       out_ref,                  # (1, HW, Cout)  f32
                       *, H, W):
    HW = H * W
    P = w1_ref.shape[1]

    x2d_f32 = x_ref[0]                              # (HW, Cin) f32 (residual)
    x2d = x2d_f32.astype(jnp.bfloat16)

    # ---- conv1 (1x1) on the MXU -> BN -> leaky ----
    y1 = jnp.dot(x2d, w1_ref[...], preferred_element_type=jnp.float32)
    y1 = _leaky_relu(y1 * s1_ref[...] + b1_ref[...])          # f32 (HW, P)

    # ---- conv2 (3x3 SAME) as 3 accumulating K=3P matmuls over dy groups ----
    # Taps are shifted views of the flat (HW, P) activation built with XLU
    # rolls; zero padding at image edges is applied with cheap (HW,1) masks.
    idx = lax.broadcasted_iota(jnp.int32, (HW, 1), 0)          # flat index h*W+w
    wpos = idx % W
    not_left = wpos != 0
    not_right = wpos != (W - 1)
    not_top = idx >= W
    not_bot = idx < (HW - W)

    def shift_w(a, dx):        # a[., w+dx] with zero padding
        if dx == 0:
            return a
        if dx == 1:
            return jnp.where(not_right, pltpu.roll(a, shift=HW - 1, axis=0), 0.0)
        return jnp.where(not_left, pltpu.roll(a, shift=1, axis=0), 0.0)

    def shift_h(a, dy):        # a[h+dy, .] with zero padding
        if dy == 0:
            return a
        if dy == 1:
            return jnp.where(not_bot, pltpu.roll(a, shift=HW - W, axis=0), 0.0)
        return jnp.where(not_top, pltpu.roll(a, shift=W, axis=0), 0.0)

    acc = jnp.zeros((HW, P), jnp.float32)
    for ky in range(3):                        # dy = ky - 1  (row group)
        ydy = shift_h(y1, ky - 1)
        tap3 = jnp.concatenate(                # (HW, 3P): kx = 0,1,2 <-> dx = -1,0,+1
            [shift_w(ydy, -1), ydy, shift_w(ydy, 1)], axis=-1)
        acc += jnp.dot(tap3.astype(jnp.bfloat16), w2_ref[ky],
                       preferred_element_type=jnp.float32)
    y2 = _leaky_relu(acc * s2_ref[...] + b2_ref[...])          # f32 (HW, P)

    # ---- SE: GAP -> fc1 -> relu -> fc2 -> sigmoid -> scale (all tiny, f32) ----
    pooled = jnp.mean(y2, axis=0, keepdims=True)               # (1, P)
    se = jnp.dot(pooled, wfc1_ref[...], preferred_element_type=jnp.float32)
    se = jnp.maximum(se + bfc1_ref[...], 0.0)
    se = jnp.dot(se, wfc2_ref[...], preferred_element_type=jnp.float32)
    se = 1.0 / (1.0 + jnp.exp(-(se + bfc2_ref[...])))          # (1, P)
    y2s = (y2 * se).astype(jnp.bfloat16)

    # ---- conv3 (1x1) -> BN(identity) -> residual -> ReLU ----
    y3 = jnp.dot(y2s, w3_ref[...], preferred_element_type=jnp.float32)
    y3 = y3 * s3_ref[...] + b3_ref[...]
    out = jnp.maximum(y3 + x2d_f32, 0.0)
    out_ref[0] = out.astype(out_ref.dtype)


# --------------------------------- wrapper -----------------------------------
def bottleneck_forward_nhwc(x, params):
    """x: (N, H, W, Cin) NHWC, f32.  Requires Cin == 4*planes (stride=1 path)."""
    N, H, W, Cin = x.shape
    P = params["w1"].shape[1]
    Cout = params["w3"].shape[1]
    R = params["wfc1"].shape[1]
    assert Cin == Cout, (
        "stride=1 / downsample=None Bottleneck requires inplanes == 4*planes")

    x2 = x.reshape(N, H * W, Cin)      # free contiguous reshape outside the kernel
    kernel = functools.partial(_bottleneck_kernel, H=H, W=W)

    out = pl.pallas_call(
        kernel,
        grid=(N,),
        in_specs=[
            pl.BlockSpec((1, H * W, Cin), lambda n: (n, 0, 0)),
            pl.BlockSpec((Cin, P), lambda n: (0, 0)),
            pl.BlockSpec((1, P), lambda n: (0, 0)),
            pl.BlockSpec((1, P), lambda n: (0, 0)),
            pl.BlockSpec((3, 3 * P, P), lambda n: (0, 0, 0)),
            pl.BlockSpec((1, P), lambda n: (0, 0)),
            pl.BlockSpec((1, P), lambda n: (0, 0)),
            pl.BlockSpec((P, R), lambda n: (0, 0)),
            pl.BlockSpec((1, R), lambda n: (0, 0)),
            pl.BlockSpec((R, P), lambda n: (0, 0)),
            pl.BlockSpec((1, P), lambda n: (0, 0)),
            pl.BlockSpec((P, Cout), lambda n: (0, 0)),
            pl.BlockSpec((1, Cout), lambda n: (0, 0)),
            pl.BlockSpec((1, Cout), lambda n: (0, 0)),
        ],
        out_specs=pl.BlockSpec((1, H * W, Cout), lambda n: (n, 0, 0)),
        out_shape=jax.ShapeDtypeStruct((N, H * W, Cout), x.dtype),
        compiler_params=pltpu.CompilerParams(
            dimension_semantics=("parallel",),
            vmem_limit_bytes=_VMEM_LIMIT),
    )(x2,
      params["w1_bf16"], params["s1"], params["b1"],
      params["w2_bf16"], params["s2"], params["b2"],
      params["wfc1"], params["bfc1"], params["wfc2"], params["bfc2"],
      params["w3_bf16"], params["s3"], params["b3"])
    return out.reshape(N, H, W, Cout)


def bottleneck_forward_nchw(x_nchw, params):
    # PyTorch-layout parity wrapper only; a real integration should stay NHWC
    # end-to-end (each transpose is a full HBM round-trip).
    x = jnp.transpose(x_nchw, (0, 2, 3, 1))
    out = bottleneck_forward_nhwc(x, params)
    return jnp.transpose(out, (0, 3, 1, 2))


# ----------------------- parameter construction (glue) -----------------------
def _fold_bn(kg, kb, km, kv, c):
    gamma = 1.0 + 0.1 * jax.random.normal(kg, (c,), jnp.float32)
    beta = 0.1 * jax.random.normal(kb, (c,), jnp.float32)
    mean = 0.1 * jax.random.normal(km, (c,), jnp.float32)
    var = 1.0 + 0.1 * jax.random.uniform(kv, (c,), jnp.float32)
    scale = gamma / jnp.sqrt(var + BN_EPS)
    bias = beta - mean * scale
    return scale.reshape(1, c), bias.reshape(1, c)


def make_params(key, inplanes, planes):
    expansion = 4
    outplanes = planes * expansion
    reduce_planes = max(outplanes // 8, 64)
    ks = jax.random.split(key, 24)

    def w(k, shape, fan_in):
        return jax.random.normal(k, shape, jnp.float32) / jnp.sqrt(float(fan_in))

    p = {}
    # conv1: 1x1, inplanes -> planes (stored (Cin, P))
    p["w1"] = w(ks[0], (inplanes, planes), inplanes)
    p["s1"], p["b1"] = _fold_bn(ks[1], ks[2], ks[3], ks[4], planes)
    # conv2: 3x3, planes -> planes (HWIO; kernel uses dy-grouped (3, 3P, P))
    p["w2_hwio"] = w(ks[5], (3, 3, planes, planes), 9 * planes)
    p["s2"], p["b2"] = _fold_bn(ks[6], ks[7], ks[8], ks[9], planes)
    # SE: fc1 (planes -> reduce), fc2 (reduce -> planes), both with bias (f32)
    p["wfc1"] = w(ks[10], (planes, reduce_planes), planes)
    p["bfc1"] = (0.1 * jax.random.normal(ks[11], (reduce_planes,), jnp.float32)
                 ).reshape(1, reduce_planes)
    p["wfc2"] = w(ks[12], (reduce_planes, planes), reduce_planes)
    p["bfc2"] = (0.1 * jax.random.normal(ks[13], (planes,), jnp.float32)
                 ).reshape(1, planes)
    # conv3: 1x1, planes -> 4*planes
    p["w3"] = w(ks[14], (planes, outplanes), planes)
    p["s3"], p["b3"] = _fold_bn(ks[15], ks[16], ks[17], ks[18], outplanes)

    # Pre-cast MXU weights to bf16 (halves weight DMA, no per-step casts).
    p["w1_bf16"] = p["w1"].astype(jnp.bfloat16)
    p["w2_bf16"] = p["w2_hwio"].reshape(3, 3 * planes, planes).astype(jnp.bfloat16)
    p["w3_bf16"] = p["w3"].astype(jnp.bfloat16)
    return p


# ----------------------- pure-JAX reference (for checking) -------------------
# Mirrors the kernel's bf16 quantization points (matmul operands only) so that
# only f32 accumulation-order differences remain.
def ref_forward_nhwc(x, p):
    dn = ("NHWC", "HWIO", "NHWC")
    bf16, f32 = jnp.bfloat16, jnp.float32
    Cin = x.shape[-1]
    P = p["w1"].shape[1]
    Cout = p["w3"].shape[1]

    y = lax.conv_general_dilated(
        x.astype(bf16), p["w1"].reshape(1, 1, Cin, P).astype(bf16),
        (1, 1), "SAME", dimension_numbers=dn, preferred_element_type=f32)
    y = _leaky_relu(y * p["s1"] + p["b1"])
    y = lax.conv_general_dilated(
        y.astype(bf16), p["w2_hwio"].astype(bf16), (1, 1), "SAME",
        dimension_numbers=dn, preferred_element_type=f32)
    y = _leaky_relu(y * p["s2"] + p["b2"])
    pooled = jnp.mean(y, axis=(1, 2))
    se = jnp.maximum(pooled @ p["wfc1"] + p["bfc1"], 0.0)
    se = 1.0 / (1.0 + jnp.exp(-(se @ p["wfc2"] + p["bfc2"])))
    y = (y * se[:, None, None, :]).astype(bf16)
    y = lax.conv_general_dilated(
        y, p["w3"].reshape(1, 1, P, Cout).astype(bf16), (1, 1), "SAME",
        dimension_numbers=dn, preferred_element_type=f32)
    y = y * p["s3"] + p["b3"]
    return jnp.maximum(y + x, 0.0)


if __name__ == "__main__":
    key = jax.random.PRNGKey(0)
    # downsample is None and stride == 1  =>  inplanes must equal planes * 4.
    # planes=128 makes every matmul / store lane-dense (multiples of 128), and
    # N=4 gives each v7x TensorCore more than one grid step to pipeline.
    planes = 128
    inplanes = planes * 4
    N, H, W = 4, 16, 16

    kp, kx = jax.random.split(key)
    params = make_params(kp, inplanes, planes)
    x = jax.random.normal(kx, (N, H, W, inplanes), jnp.float32)   # NHWC input

    fwd = jax.jit(bottleneck_forward_nhwc)
    out = jax.block_until_ready(fwd(x, params))
    ref = ref_forward_nhwc(x, params)

    assert out.shape == (N, H, W, inplanes)
    if not jnp.allclose(out, ref, atol=5e-3, rtol=5e-3):
        max_err = float(jnp.max(jnp.abs(out - ref)))
        raise AssertionError(
            f"Pallas kernel does not match JAX reference (max abs err {max_err})")
    print("KERNEL_OK")
</pallas_src>

<mosaic_0001>
module attributes {stable_mosaic.version = 11 : i64} {
  func.func @_bottleneck_kernel(%arg0: i32, %arg1: memref<1x256x512xf32, #tpu.memory_space<vmem>>, %arg2: memref<512x128xbf16, #tpu.memory_space<vmem>>, %arg3: memref<1x128xf32, #tpu.memory_space<vmem>>, %arg4: memref<1x128xf32, #tpu.memory_space<vmem>>, %arg5: memref<3x384x128xbf16, #tpu.memory_space<vmem>>, %arg6: memref<1x128xf32, #tpu.memory_space<vmem>>, %arg7: memref<1x128xf32, #tpu.memory_space<vmem>>, %arg8: memref<128x64xf32, #tpu.memory_space<vmem>>, %arg9: memref<1x64xf32, #tpu.memory_space<vmem>>, %arg10: memref<64x128xf32, #tpu.memory_space<vmem>>, %arg11: memref<1x128xf32, #tpu.memory_space<vmem>>, %arg12: memref<128x512xbf16, #tpu.memory_space<vmem>>, %arg13: memref<1x512xf32, #tpu.memory_space<vmem>>, %arg14: memref<1x512xf32, #tpu.memory_space<vmem>>, %arg15: memref<1x256x512xf32, #tpu.memory_space<vmem>>) attributes {dimension_semantics = [#tpu.dimension_semantics<parallel>], iteration_bounds = array<i64: 4>, scalar_prefetch = 0 : i64, scratch_operands = 0 : i64, tpu.core_type = #tpu.core_type<tc>, window_params = [{transform_indices = @transform_0, window_bounds = array<i64: 1, 256, 512>}, {pipeline_mode = #tpu.pipeline_mode<synchronous>, transform_indices = @transform_1, window_bounds = array<i64: 512, 128>}, {pipeline_mode = #tpu.pipeline_mode<synchronous>, transform_indices = @transform_2, window_bounds = array<i64: 1, 128>}, {pipeline_mode = #tpu.pipeline_mode<synchronous>, transform_indices = @transform_3, window_bounds = array<i64: 1, 128>}, {pipeline_mode = #tpu.pipeline_mode<synchronous>, transform_indices = @transform_4, window_bounds = array<i64: 3, 384, 128>}, {pipeline_mode = #tpu.pipeline_mode<synchronous>, transform_indices = @transform_5, window_bounds = array<i64: 1, 128>}, {pipeline_mode = #tpu.pipeline_mode<synchronous>, transform_indices = @transform_6, window_bounds = array<i64: 1, 128>}, {pipeline_mode = #tpu.pipeline_mode<synchronous>, transform_indices = @transform_7, window_bounds = array<i64: 128, 64>}, {pipeline_mode = #tpu.pipeline_mode<synchronous>, transform_indices = @transform_8, window_bounds = array<i64: 1, 64>}, {pipeline_mode = #tpu.pipeline_mode<synchronous>, transform_indices = @transform_9, window_bounds = array<i64: 64, 128>}, {pipeline_mode = #tpu.pipeline_mode<synchronous>, transform_indices = @transform_10, window_bounds = array<i64: 1, 128>}, {pipeline_mode = #tpu.pipeline_mode<synchronous>, transform_indices = @transform_11, window_bounds = array<i64: 128, 512>}, {pipeline_mode = #tpu.pipeline_mode<synchronous>, transform_indices = @transform_12, window_bounds = array<i64: 1, 512>}, {pipeline_mode = #tpu.pipeline_mode<synchronous>, transform_indices = @transform_13, window_bounds = array<i64: 1, 512>}, {transform_indices = @transform_14, window_bounds = array<i64: 1, 256, 512>}]} {
    %c0 = arith.constant 0 : index
    %c0_0 = arith.constant 0 : index
    %c0_1 = arith.constant 0 : index
    %0 = vector.load %arg1[%c0, %c0_0, %c0_1] : memref<1x256x512xf32, #tpu.memory_space<vmem>>, vector<1x256x512xf32>
    %1 = vector.shape_cast %0 : vector<1x256x512xf32> to vector<256x512xf32>
    %2 = arith.truncf %1 : vector<256x512xf32> to vector<256x512xbf16>
    %c0_2 = arith.constant 0 : index
    %c0_3 = arith.constant 0 : index
    %3 = vector.load %arg2[%c0_2, %c0_3] : memref<512x128xbf16, #tpu.memory_space<vmem>>, vector<512x128xbf16>
    %cst = arith.constant dense<0.000000e+00> : vector<256x128xf32>
    %4 = tpu.matmul %2, %3, %cst {dimension_numbers = #tpu.dot_dimension_numbers<[1], [0], [0], [1], [0, 0, 1, 1], [], []>} : vector<256x512xbf16>, vector<512x128xbf16>, vector<256x128xf32> -> vector<256x128xf32>
    %c0_4 = arith.constant 0 : index
    %c0_5 = arith.constant 0 : index
    %5 = vector.load %arg3[%c0_4, %c0_5] : memref<1x128xf32, #tpu.memory_space<vmem>>, vector<1x128xf32>
    %6 = vector.broadcast %5 : vector<1x128xf32> to vector<256x128xf32>
    %7 = arith.mulf %4, %6 : vector<256x128xf32>
    %c0_6 = arith.constant 0 : index
    %c0_7 = arith.constant 0 : index
    %8 = vector.load %arg4[%c0_6, %c0_7] : memref<1x128xf32, #tpu.memory_space<vmem>>, vector<1x128xf32>
    %9 = vector.broadcast %8 : vector<1x128xf32> to vector<256x128xf32>
    %10 = arith.addf %7, %9 : vector<256x128xf32>
    %cst_8 = arith.constant 0.000000e+00 : f32
    %11 = vector.broadcast %cst_8 : f32 to vector<256x128xf32>
    %12 = arith.cmpf ogt, %10, %11 : vector<256x128xf32>
    %cst_9 = arith.constant 1.000000e-03 : f32
    %13 = vector.broadcast %cst_9 : f32 to vector<256x128xf32>
    %14 = arith.mulf %13, %10 : vector<256x128xf32>
    %15 = arith.select %12, %10, %14 : vector<256x128xi1>, vector<256x128xf32>
    %16 = tpu.iota {dimensions = array<i32: 0>} : vector<256x1xi32>
    %c16_i32 = arith.constant 16 : i32
    %c0_i32 = arith.constant 0 : i32
    %17 = arith.cmpi eq, %c16_i32, %c0_i32 : i32
    %c1_i32 = arith.constant 1 : i32
    %18 = arith.select %17, %c1_i32, %c16_i32 : i32
    %19 = vector.broadcast %18 : i32 to vector<256x1xi32>
    %20 = arith.remsi %16, %19 : vector<256x1xi32>
    %c0_i32_10 = arith.constant 0 : i32
    %21 = vector.broadcast %c0_i32_10 : i32 to vector<256x1xi32>
    %22 = arith.cmpi ne, %20, %21 : vector<256x1xi32>
    %c0_i32_11 = arith.constant 0 : i32
    %23 = vector.broadcast %c0_i32_11 : i32 to vector<256x1xi32>
    %24 = arith.cmpi slt, %20, %23 : vector<256x1xi32>
    %c0_i32_12 = arith.constant 0 : i32
    %25 = arith.cmpi slt, %18, %c0_i32_12 : i32
    %26 = vector.broadcast %25 : i1 to vector<256x1xi1>
    %27 = vector.broadcast %26 : vector<256x1xi1> to vector<256x1xi1>
    %28 = arith.xori %24, %27 : vector<256x1xi1>
    %29 = arith.andi %28, %22 : vector<256x1xi1>
    %30 = vector.broadcast %18 : i32 to vector<256x1xi32>
    %31 = arith.addi %20, %30 : vector<256x1xi32>
    %32 = arith.select %29, %31, %20 : vector<256x1xi1>, vector<256x1xi32>
    %c0_i32_13 = arith.constant 0 : i32
    %33 = vector.broadcast %c0_i32_13 : i32 to vector<256x1xi32>
    %34 = arith.cmpi ne, %32, %33 : vector<256x1xi32>
    %c15_i32 = arith.constant 15 : i32
    %35 = vector.broadcast %c15_i32 : i32 to vector<256x1xi32>
    %36 = arith.cmpi ne, %32, %35 : vector<256x1xi32>
    %c16_i32_14 = arith.constant 16 : i32
    %37 = vector.broadcast %c16_i32_14 : i32 to vector<256x1xi32>
    %38 = arith.cmpi sge, %16, %37 : vector<256x1xi32>
    %c240_i32 = arith.constant 240 : i32
    %39 = vector.broadcast %c240_i32 : i32 to vector<256x1xi32>
    %40 = arith.cmpi slt, %16, %39 : vector<256x1xi32>
    %cst_15 = arith.constant 0.000000e+00 : f32
    %41 = vector.broadcast %cst_15 : f32 to vector<256x128xf32>
    %c16_i32_16 = arith.constant 16 : i32
    %42 = tpu.dynamic_rotate %15 by %c16_i32_16 dim 0 : vector<256x128xf32>, i32 -> vector<256x128xf32>
    %cst_17 = arith.constant 0.000000e+00 : f32
    %43 = vector.shape_cast %38 : vector<256x1xi1> to vector<256x1xi1>
    %44 = vector.broadcast %43 : vector<256x1xi1> to vector<256x128xi1>
    %45 = vector.broadcast %cst_17 : f32 to vector<256x128xf32>
    %46 = arith.select %44, %42, %45 : vector<256x128xi1>, vector<256x128xf32>
    %c1_i32_18 = arith.constant 1 : i32
    %47 = tpu.dynamic_rotate %46 by %c1_i32_18 dim 0 : vector<256x128xf32>, i32 -> vector<256x128xf32>
    %cst_19 = arith.constant 0.000000e+00 : f32
    %48 = vector.shape_cast %34 : vector<256x1xi1> to vector<256x1xi1>
    %49 = vector.broadcast %48 : vector<256x1xi1> to vector<256x128xi1>
    %50 = vector.broadcast %cst_19 : f32 to vector<256x128xf32>
    %51 = arith.select %49, %47, %50 : vector<256x128xi1>, vector<256x128xf32>
    %c255_i32 = arith.constant 255 : i32
    %52 = tpu.dynamic_rotate %46 by %c255_i32 dim 0 : vector<256x128xf32>, i32 -> vector<256x128xf32>
    %cst_20 = arith.constant 0.000000e+00 : f32
    %53 = vector.shape_cast %36 : vector<256x1xi1> to vector<256x1xi1>
    %54 = vector.broadcast %53 : vector<256x1xi1> to vector<256x128xi1>
    %55 = vector.broadcast %cst_20 : f32 to vector<256x128xf32>
    %56 = arith.select %54, %52, %55 : vector<256x128xi1>, vector<256x128xf32>
    %57 = tpu.concatenate %51, %46, %56 in 1 : vector<256x128xf32>, vector<256x128xf32>, vector<256x128xf32> -> vector<256x384xf32>
    %58 = arith.truncf %57 : vector<256x384xf32> to vector<256x384xbf16>
    %c0_21 = arith.constant 0 : index
    %c0_22 = arith.constant 0 : index
    %c0_23 = arith.constant 0 : index
    %59 = vector.load %arg5[%c0_21, %c0_22, %c0_23] : memref<3x384x128xbf16, #tpu.memory_space<vmem>>, vector<1x384x128xbf16>
    %60 = vector.shape_cast %59 : vector<1x384x128xbf16> to vector<384x128xbf16>
    %cst_24 = arith.constant dense<0.000000e+00> : vector<256x128xf32>
    %61 = tpu.matmul %58, %60, %cst_24 {dimension_numbers = #tpu.dot_dimension_numbers<[1], [0], [0], [1], [0, 0, 1, 1], [], []>} : vector<256x384xbf16>, vector<384x128xbf16>, vector<256x128xf32> -> vector<256x128xf32>
    %62 = arith.addf %41, %61 : vector<256x128xf32>
    %c1_i32_25 = arith.constant 1 : i32
    %63 = tpu.dynamic_rotate %15 by %c1_i32_25 dim 0 : vector<256x128xf32>, i32 -> vector<256x128xf32>
    %cst_26 = arith.constant 0.000000e+00 : f32
    %64 = vector.shape_cast %34 : vector<256x1xi1> to vector<256x1xi1>
    %65 = vector.broadcast %64 : vector<256x1xi1> to vector<256x128xi1>
    %66 = vector.broadcast %cst_26 : f32 to vector<256x128xf32>
    %67 = arith.select %65, %63, %66 : vector<256x128xi1>, vector<256x128xf32>
    %c255_i32_27 = arith.constant 255 : i32
    %68 = tpu.dynamic_rotate %15 by %c255_i32_27 dim 0 : vector<256x128xf32>, i32 -> vector<256x128xf32>
    %cst_28 = arith.constant 0.000000e+00 : f32
    %69 = vector.shape_cast %36 : vector<256x1xi1> to vector<256x1xi1>
    %70 = vector.broadcast %69 : vector<256x1xi1> to vector<256x128xi1>
    %71 = vector.broadcast %cst_28 : f32 to vector<256x128xf32>
    %72 = arith.select %70, %68, %71 : vector<256x128xi1>, vector<256x128xf32>
    %73 = tpu.concatenate %67, %15, %72 in 1 : vector<256x128xf32>, vector<256x128xf32>, vector<256x128xf32> -> vector<256x384xf32>
    %74 = arith.truncf %73 : vector<256x384xf32> to vector<256x384xbf16>
    %c1 = arith.constant 1 : index
    %c0_29 = arith.constant 0 : index
    %c0_30 = arith.constant 0 : index
    %75 = vector.load %arg5[%c1, %c0_29, %c0_30] : memref<3x384x128xbf16, #tpu.memory_space<vmem>>, vector<1x384x128xbf16>
    %76 = vector.shape_cast %75 : vector<1x384x128xbf16> to vector<384x128xbf16>
    %cst_31 = arith.constant dense<0.000000e+00> : vector<256x128xf32>
    %77 = tpu.matmul %74, %76, %cst_31 {dimension_numbers = #tpu.dot_dimension_numbers<[1], [0], [0], [1], [0, 0, 1, 1], [], []>} : vector<256x384xbf16>, vector<384x128xbf16>, vector<256x128xf32> -> vector<256x128xf32>
    %78 = arith.addf %62, %77 : vector<256x128xf32>
    %c240_i32_32 = arith.constant 240 : i32
    %79 = tpu.dynamic_rotate %15 by %c240_i32_32 dim 0 : vector<256x128xf32>, i32 -> vector<256x128xf32>
    %cst_33 = arith.constant 0.000000e+00 : f32
    %80 = vector.shape_cast %40 : vector<256x1xi1> to vector<256x1xi1>
    %81 = vector.broadcast %80 : vector<256x1xi1> to vector<256x128xi1>
    %82 = vector.broadcast %cst_33 : f32 to vector<256x128xf32>
    %83 = arith.select %81, %79, %82 : vector<256x128xi1>, vector<256x128xf32>
    %c1_i32_34 = arith.constant 1 : i32
    %84 = tpu.dynamic_rotate %83 by %c1_i32_34 dim 0 : vector<256x128xf32>, i32 -> vector<256x128xf32>
    %cst_35 = arith.constant 0.000000e+00 : f32
    %85 = vector.shape_cast %34 : vector<256x1xi1> to vector<256x1xi1>
    %86 = vector.broadcast %85 : vector<256x1xi1> to vector<256x128xi1>
    %87 = vector.broadcast %cst_35 : f32 to vector<256x128xf32>
    %88 = arith.select %86, %84, %87 : vector<256x128xi1>, vector<256x128xf32>
    %c255_i32_36 = arith.constant 255 : i32
    %89 = tpu.dynamic_rotate %83 by %c255_i32_36 dim 0 : vector<256x128xf32>, i32 -> vector<256x128xf32>
    %cst_37 = arith.constant 0.000000e+00 : f32
    %90 = vector.shape_cast %36 : vector<256x1xi1> to vector<256x1xi1>
    %91 = vector.broadcast %90 : vector<256x1xi1> to vector<256x128xi1>
    %92 = vector.broadcast %cst_37 : f32 to vector<256x128xf32>
    %93 = arith.select %91, %89, %92 : vector<256x128xi1>, vector<256x128xf32>
    %94 = tpu.concatenate %88, %83, %93 in 1 : vector<256x128xf32>, vector<256x128xf32>, vector<256x128xf32> -> vector<256x384xf32>
    %95 = arith.truncf %94 : vector<256x384xf32> to vector<256x384xbf16>
    %c2 = arith.constant 2 : index
    %c0_38 = arith.constant 0 : index
    %c0_39 = arith.constant 0 : index
    %96 = vector.load %arg5[%c2, %c0_38, %c0_39] : memref<3x384x128xbf16, #tpu.memory_space<vmem>>, vector<1x384x128xbf16>
    %97 = vector.shape_cast %96 : vector<1x384x128xbf16> to vector<384x128xbf16>
    %cst_40 = arith.constant dense<0.000000e+00> : vector<256x128xf32>
    %98 = tpu.matmul %95, %97, %cst_40 {dimension_numbers = #tpu.dot_dimension_numbers<[1], [0], [0], [1], [0, 0, 1, 1], [], []>} : vector<256x384xbf16>, vector<384x128xbf16>, vector<256x128xf32> -> vector<256x128xf32>
    %99 = arith.addf %78, %98 : vector<256x128xf32>
    %c0_41 = arith.constant 0 : index
    %c0_42 = arith.constant 0 : index
    %100 = vector.load %arg6[%c0_41, %c0_42] : memref<1x128xf32, #tpu.memory_space<vmem>>, vector<1x128xf32>
    %101 = vector.broadcast %100 : vector<1x128xf32> to vector<256x128xf32>
    %102 = arith.mulf %99, %101 : vector<256x128xf32>
    %c0_43 = arith.constant 0 : index
    %c0_44 = arith.constant 0 : index
    %103 = vector.load %arg7[%c0_43, %c0_44] : memref<1x128xf32, #tpu.memory_space<vmem>>, vector<1x128xf32>
    %104 = vector.broadcast %103 : vector<1x128xf32> to vector<256x128xf32>
    %105 = arith.addf %102, %104 : vector<256x128xf32>
    %cst_45 = arith.constant 0.000000e+00 : f32
    %106 = vector.broadcast %cst_45 : f32 to vector<256x128xf32>
    %107 = arith.cmpf ogt, %105, %106 : vector<256x128xf32>
    %cst_46 = arith.constant 1.000000e-03 : f32
    %108 = vector.broadcast %cst_46 : f32 to vector<256x128xf32>
    %109 = arith.mulf %108, %105 : vector<256x128xf32>
    %110 = arith.select %107, %105, %109 : vector<256x128xi1>, vector<256x128xf32>
    %cst_47 = arith.constant dense<0.000000e+00> : vector<128xf32>
    %111 = vector.multi_reduction <add>, %110, %cst_47 [0] : vector<256x128xf32> to vector<128xf32>
    %112 = vector.shape_cast %111 : vector<128xf32> to vector<1x128xf32>
    %cst_48 = arith.constant 2.560000e+02 : f32
    %113 = vector.broadcast %cst_48 : f32 to vector<1x128xf32>
    %114 = arith.divf %112, %113 : vector<1x128xf32>
    %c0_49 = arith.constant 0 : index
    %c0_50 = arith.constant 0 : index
    %115 = vector.load %arg8[%c0_49, %c0_50] : memref<128x64xf32, #tpu.memory_space<vmem>>, vector<128x64xf32>
    %cst_51 = arith.constant dense<0.000000e+00> : vector<1x64xf32>
    %116 = tpu.matmul %114, %115, %cst_51 {dimension_numbers = #tpu.dot_dimension_numbers<[1], [0], [0], [1], [0, 0, 1, 1], [], []>} : vector<1x128xf32>, vector<128x64xf32>, vector<1x64xf32> -> vector<1x64xf32>
    %c0_52 = arith.constant 0 : index
    %c0_53 = arith.constant 0 : index
    %117 = vector.load %arg9[%c0_52, %c0_53] : memref<1x64xf32, #tpu.memory_space<vmem>>, vector<1x64xf32>
    %118 = arith.addf %116, %117 : vector<1x64xf32>
    %cst_54 = arith.constant 0.000000e+00 : f32
    %119 = vector.broadcast %cst_54 : f32 to vector<1x64xf32>
    %120 = arith.maximumf %118, %119 : vector<1x64xf32>
    %c0_55 = arith.constant 0 : index
    %c0_56 = arith.constant 0 : index
    %121 = vector.load %arg10[%c0_55, %c0_56] : memref<64x128xf32, #tpu.memory_space<vmem>>, vector<64x128xf32>
    %cst_57 = arith.constant dense<0.000000e+00> : vector<1x128xf32>
    %122 = tpu.matmul %120, %121, %cst_57 {dimension_numbers = #tpu.dot_dimension_numbers<[1], [0], [0], [1], [0, 0, 1, 1], [], []>} : vector<1x64xf32>, vector<64x128xf32>, vector<1x128xf32> -> vector<1x128xf32>
    %c0_58 = arith.constant 0 : index
    %c0_59 = arith.constant 0 : index
    %123 = vector.load %arg11[%c0_58, %c0_59] : memref<1x128xf32, #tpu.memory_space<vmem>>, vector<1x128xf32>
    %124 = arith.addf %122, %123 : vector<1x128xf32>
    %cst_60 = arith.constant 0.000000e+00 : f32
    %125 = vector.broadcast %cst_60 : f32 to vector<1x128xf32>
    %126 = arith.subf %125, %124 : vector<1x128xf32>
    %127 = math.exp %126 : vector<1x128xf32>
    %cst_61 = arith.constant 1.000000e+00 : f32
    %128 = vector.broadcast %cst_61 : f32 to vector<1x128xf32>
    %129 = arith.addf %128, %127 : vector<1x128xf32>
    %cst_62 = arith.constant 1.000000e+00 : f32
    %130 = vector.broadcast %cst_62 : f32 to vector<1x128xf32>
    %131 = arith.divf %130, %129 : vector<1x128xf32>
    %132 = vector.broadcast %131 : vector<1x128xf32> to vector<256x128xf32>
    %133 = arith.mulf %110, %132 : vector<256x128xf32>
    %134 = arith.truncf %133 : vector<256x128xf32> to vector<256x128xbf16>
    %c0_63 = arith.constant 0 : index
    %c0_64 = arith.constant 0 : index
    %135 = vector.load %arg12[%c0_63, %c0_64] : memref<128x512xbf16, #tpu.memory_space<vmem>>, vector<128x512xbf16>
    %cst_65 = arith.constant dense<0.000000e+00> : vector<256x512xf32>
    %136 = tpu.matmul %134, %135, %cst_65 {dimension_numbers = #tpu.dot_dimension_numbers<[1], [0], [0], [1], [0, 0, 1, 1], [], []>} : vector<256x128xbf16>, vector<128x512xbf16>, vector<256x512xf32> -> vector<256x512xf32>
    %c0_66 = arith.constant 0 : index
    %c0_67 = arith.constant 0 : index
    %137 = vector.load %arg13[%c0_66, %c0_67] : memref<1x512xf32, #tpu.memory_space<vmem>>, vector<1x512xf32>
    %138 = vector.broadcast %137 : vector<1x512xf32> to vector<256x512xf32>
    %139 = arith.mulf %136, %138 : vector<256x512xf32>
    %c0_68 = arith.constant 0 : index
    %c0_69 = arith.constant 0 : index
    %140 = vector.load %arg14[%c0_68, %c0_69] : memref<1x512xf32, #tpu.memory_space<vmem>>, vector<1x512xf32>
    %141 = vector.broadcast %140 : vector<1x512xf32> to vector<256x512xf32>
    %142 = arith.addf %139, %141 : vector<256x512xf32>
    %143 = arith.addf %142, %1 : vector<256x512xf32>
    %cst_70 = arith.constant 0.000000e+00 : f32
    %144 = vector.broadcast %cst_70 : f32 to vector<256x512xf32>
    %145 = arith.maximumf %143, %144 : vector<256x512xf32>
    %c0_71 = arith.constant 0 : index
    %c0_72 = arith.constant 0 : index
    %c0_73 = arith.constant 0 : index
    %146 = vector.load %arg15[%c0_71, %c0_72, %c0_73] : memref<1x256x512xf32, #tpu.memory_space<vmem>>, vector<1x256x512xf32>
    %147 = vector.shape_cast %146 : vector<1x256x512xf32> to vector<256x512xf32>
    %148 = vector.shape_cast %145 : vector<256x512xf32> to vector<1x256x512xf32>
    tpu.vector_store %arg15[%c0_71, %c0_72, %c0_73], %148 {strides = array<i32>} : memref<1x256x512xf32, #tpu.memory_space<vmem>>, vector<1x256x512xf32>,
    return
  }
  func.func @transform_0(%arg0: i32) -> (i32, i32, i32) {
    %c0_i32 = arith.constant 0 : i32
    %c0_i32_0 = arith.constant 0 : i32
    %c0_i32_1 = arith.constant 0 : i32
    return %arg0, %c0_i32, %c0_i32_0 : i32, i32, i32
  }
  func.func @transform_1(%arg0: i32) -> (i32, i32) {
    %c0_i32 = arith.constant 0 : i32
    %c0_i32_0 = arith.constant 0 : i32
    %c0_i32_1 = arith.constant 0 : i32
    return %c0_i32, %c0_i32_0 : i32, i32
  }
  func.func @transform_2(%arg0: i32) -> (i32, i32) {
    %c0_i32 = arith.constant 0 : i32
    %c0_i32_0 = arith.constant 0 : i32
    %c0_i32_1 = arith.constant 0 : i32
    return %c0_i32, %c0_i32_0 : i32, i32
  }
  func.func @transform_3(%arg0: i32) -> (i32, i32) {
    %c0_i32 = arith.constant 0 : i32
    %c0_i32_0 = arith.constant 0 : i32
    %c0_i32_1 = arith.constant 0 : i32
    return %c0_i32, %c0_i32_0 : i32, i32
  }
  func.func @transform_4(%arg0: i32) -> (i32, i32, i32) {
    %c0_i32 = arith.constant 0 : i32
    %c0_i32_0 = arith.constant 0 : i32
    %c0_i32_1 = arith.constant 0 : i32
    %c0_i32_2 = arith.constant 0 : i32
    return %c0_i32, %c0_i32_0, %c0_i32_1 : i32, i32, i32
  }
  func.func @transform_5(%arg0: i32) -> (i32, i32) {
    %c0_i32 = arith.constant 0 : i32
    %c0_i32_0 = arith.constant 0 : i32
    %c0_i32_1 = arith.constant 0 : i32
    return %c0_i32, %c0_i32_0 : i32, i32
  }
  func.func @transform_6(%arg0: i32) -> (i32, i32) {
    %c0_i32 = arith.constant 0 : i32
    %c0_i32_0 = arith.constant 0 : i32
    %c0_i32_1 = arith.constant 0 : i32
    return %c0_i32, %c0_i32_0 : i32, i32
  }
  func.func @transform_7(%arg0: i32) -> (i32, i32) {
    %c0_i32 = arith.constant 0 : i32
    %c0_i32_0 = arith.constant 0 : i32
    %c0_i32_1 = arith.constant 0 : i32
    return %c0_i32, %c0_i32_0 : i32, i32
  }
  func.func @transform_8(%arg0: i32) -> (i32, i32) {
    %c0_i32 = arith.constant 0 : i32
    %c0_i32_0 = arith.constant 0 : i32
    %c0_i32_1 = arith.constant 0 : i32
    return %c0_i32, %c0_i32_0 : i32, i32
  }
  func.func @transform_9(%arg0: i32) -> (i32, i32) {
    %c0_i32 = arith.constant 0 : i32
    %c0_i32_0 = arith.constant 0 : i32
    %c0_i32_1 = arith.constant 0 : i32
    return %c0_i32, %c0_i32_0 : i32, i32
  }
  func.func @transform_10(%arg0: i32) -> (i32, i32) {
    %c0_i32 = arith.constant 0 : i32
    %c0_i32_0 = arith.constant 0 : i32
    %c0_i32_1 = arith.constant 0 : i32
    return %c0_i32, %c0_i32_0 : i32, i32
  }
  func.func @transform_11(%arg0: i32) -> (i32, i32) {
    %c0_i32 = arith.constant 0 : i32
    %c0_i32_0 = arith.constant 0 : i32
    %c0_i32_1 = arith.constant 0 : i32
    return %c0_i32, %c0_i32_0 : i32, i32
  }
  func.func @transform_12(%arg0: i32) -> (i32, i32) {
    %c0_i32 = arith.constant 0 : i32
    %c0_i32_0 = arith.constant 0 : i32
    %c0_i32_1 = arith.constant 0 : i32
    return %c0_i32, %c0_i32_0 : i32, i32
  }
  func.func @transform_13(%arg0: i32) -> (i32, i32) {
    %c0_i32 = arith.constant 0 : i32
    %c0_i32_0 = arith.constant 0 : i32
    %c0_i32_1 = arith.constant 0 : i32
    return %c0_i32, %c0_i32_0 : i32, i32
  }
  func.func @transform_14(%arg0: i32) -> (i32, i32, i32) {
    %c0_i32 = arith.constant 0 : i32
    %c0_i32_0 = arith.constant 0 : i32
    %c0_i32_1 = arith.constant 0 : i32
    return %arg0, %c0_i32, %c0_i32_0 : i32, i32, i32
  }
}

</mosaic_0001>

<bundles_post_ra>
// kernel: bottleneck_forward_nhwc.1
= control target key start
LH: loop header
LB: loop body
LE: loop exit
PB: predicated region body
PF: predicated region fallthrough
CT: control target
= control target key end

     0   :  { %s11804_s0 = inlined_call_operand.hbm [shape: f32[4,256,512], index: 0, kind: input, shape index: {}]   ;;  %s11805_s1 = inlined_call_operand.hbm [shape: bf16[512,128], index: 1, kind: input, shape index: {}]   ;;  %s11806_s2 = inlined_call_operand.hbm [shape: f32[1,128], index: 2, kind: input, shape index: {}]   ;;  %s11807_s3 = inlined_call_operand.hbm [shape: f32[1,128], index: 3, kind: input, shape index: {}]   ;;  %s11808_s4 = inlined_call_operand.hbm [shape: bf16[3,384,128], index: 4, kind: input, shape index: {}]   ;;  %s11809_s5 = inlined_call_operand.hbm [shape: f32[1,128], index: 5, kind: input, shape index: {}]   ;;  %s11810_s6 = inlined_call_operand.hbm [shape: f32[1,128], index: 6, kind: input, shape index: {}]   ;;  %s11811_s7 = inlined_call_operand.vmem [shape: f32[128,64], index: 7, kind: input, shape index: {}]   ;;  %s11812_s8 = inlined_call_operand.hbm [shape: f32[1,64], index: 8, kind: input, shape index: {}]   ;;  %s11813_s9 = inlined_call_operand.hbm [shape: f32[64,128], index: 9, kind: input, shape index: {}]   ;;  %s11814_s10 = inlined_call_operand.hbm [shape: f32[1,128], index: 10, kind: input, shape index: {}]   ;;  %s11815_s11 = inlined_call_operand.hbm [shape: bf16[128,512], index: 11, kind: input, shape index: {}]   ;;  %s11816_s12 = inlined_call_operand.hbm [shape: f32[1,512], index: 12, kind: input, shape index: {}]   ;;  %s11817_s13 = inlined_call_operand.hbm [shape: f32[1,512], index: 13, kind: input, shape index: {}]   ;;  %s11818_s14 = inlined_call_operand.hbm [shape: f32[4,256,512], index: 14, kind: output, shape index: {}]  }
   0x1   :  { %11939 = sst [smem:[#allocation84_spill]] %s11805_s1 }
   0x2   :  { %11940 = sst [smem:[#allocation85_spill]] %s11806_s2 }
   0x3   :  { %11941 = sst [smem:[#allocation86_spill]] %s11807_s3 }
   0x4   :  { %11942 = sst [smem:[#allocation87_spill]] %s11808_s4 }
   0x5   :  { %11943 = sst [smem:[#allocation88_spill]] %s11809_s5 }
   0x6   :  { %11944 = sst [smem:[#allocation89_spill]] %s11811_s7 }
   0x7   :  { %11945 = sst [smem:[#allocation90_spill]] %s11818_s14 }
   0x8   :  { %19 = vsyncpa [#allocation3], 0 }
   0x9   :  { %21 = vsyncpa [#allocation3 + $0x1], 0 }
   0xa   :  { %22 = vsyncpa [#allocation6], 0 }
   0xb   :  { %23 = vsyncpa [#allocation9], 0 }
   0xc   :  { %24 = vsyncpa [#allocation12], 0 }
   0xd   :  { %25 = vsyncpa [#allocation15], 0 }
   0xe   :  { %26 = vsyncpa [#allocation18], 0 }
   0xf   :  { %27 = vsyncpa [#allocation21], 0 }
  0x10   :  { %28 = vsyncpa [#allocation4], 0 }
  0x11   :  { %30 = vsyncpa [#allocation4 + $0x1], 0  ;;  %s9001_s29 = smov 0   ;;  %s9003_s30 = smov 0  }
  0x12   :  { %s9005_s15 = smov 0   ;;  %s9007_s16 = smov 0  }
  0x13 LB: > { %s8897_s17 = smov [#allocation5]   ;;  %s9022_s19 = sadd.s32 4294967295, %s8895_s16   ;;  %s8895_s16 = sphi %s9007_s16, %s12283_s16   ;;  %s8891_s15 = sphi %s9005_s15, %s12282_s15   ;;  %s8887_s30 = sphi %s9003_s30, %s12281_s30   ;;  %s8883_s29 = sphi %s9001_s29, %s12280_s29  }
  0x14   : > { %s378_s18 = sshll.u32 %s8897_s17, 4  ;;  %p6658_p0 = scmp.ge.s32.totalorder %s8895_s16, 1  ;;  %s379_s18 = int_to_ptr.vmem [resolvable:$true] %s378_s18 }
  0x15   : > { %p11823_p1 = scmp.eq.s32.totalorder %s9022_s19, 0  ;;  %p366_p2 = scmp.lt.s32.totalorder %s8895_s16, 5 }
  0x16   : > { %s8898_s21 = smov [#allocation8]   ;;  %s8899_s24 = smov [#allocation11]  }
  0x17   : > { %p9027_p3 = pnand %p6658_p0, %p366_p2  ;;  %s403_s22 = sshll.u32 %s8898_s21, 4  ;;  %s404_s22 = int_to_ptr.vmem [resolvable:$true] %s403_s22 }
  0x18   : > { %s427_s25 = sshll.u32 %s8899_s24, 4  ;;  %s8478_s27 = scalar_lea.vmem %s379_s18, 4096  ;;  %s9039_s25 = int_to_ptr.vmem [resolvable:$true] %s427_s25 }
  0x19   : > { %s11946_s20 = scalar_select %p9027_p3, 1, 0 }
  0x1a   : > { %p8050_p4 = pneg %p9027_p3  ;;  %p8479_p7 = scmp.ne.s32.totalorder %s379_s18, %s8478_s27 }
  0x1b   : > { %11947 = sst [smem:[#allocation32_spill]] %s11946_s20  ;;  %p8486_p10 = scmp.lt.s32.totalorder %s379_s18, %s379_s18 }
  0x1c   : > { %p9035_p5 = pnand %p8050_p4, %p11823_p1  ;;  %p8487_p11 = scmp.lt.s32.totalorder %s8478_s27, %s8478_s27 }
  0x1e   : > { %p9043_p6 = pneg %p9035_p5  ;;  %p8488_p12 = por %p8487_p11, %p8486_p10 }
  0x20   : > { %p8481_p8 = pnand %p8479_p7, %p9043_p6 }
  0x22   : > { %p8482_p9 = pneg %p8481_p8 }
  0x24   : > { %p8489_p13 = pnand %p8488_p12, %p8482_p9 }
  0x26   : > { %8492 = shalt.err (!%p8489_p13)
}
  0x27   : > { %s11822_s28 = smov 64   ;;  %s8901_s17 = smov 4  }
  0x28   : > { %s11950_s1 = sld [smem:[#allocation84_spill]]  ;;  %s8504_s14 = scalar_lea.vmem %s404_s22, 16 }
  0x29   : > { %p8505_p0 = scmp.ne.s32.totalorder %s404_s22, %s8504_s14  ;;  %s8511_s27 = scalar_lea.vmem %s404_s22, 32 }
  0x2a   : > { %p8512_p7 = scmp.lt.s32.totalorder %s404_s22, %s404_s22  ;;  %p8513_p8 = scmp.lt.s32.totalorder %s8511_s27, %s8504_s14 }
  0x2b   : > { %p8507_p2 = pnand %p8505_p0, %p9043_p6 }
  0x2c   : > { %p8514_p9 = por %p8513_p8, %p8512_p7 }
  0x2d   : > { %p8508_p4 = pneg %p8507_p2 }
  0x2e   : > { %8053 = dma.hbm_to_vmem [thread:$0]  (!%p9035_p5), %s11950_s1, 4096, %s379_s18, [#allocation6], %s11822_s28, %s11822_s28, %s8901_s17  }
  0x2f   : > { %p8515_p10 = pnand %p8514_p9, %p8508_p4 }
  0x31   : > { %8518 = shalt.err (!%p8515_p10)
}
  0x32   : > { %s11951_s3 = sld [smem:[#allocation86_spill]]  ;;  %s8530_s18 = scalar_lea.vmem %s9039_s25, 16 }
  0x33   : > { %p8531_p11 = scmp.ne.s32.totalorder %s9039_s25, %s8530_s18  ;;  %s8537_s14 = scalar_lea.vmem %s9039_s25, 32 }
  0x34   : > { %p8538_p0 = scmp.lt.s32.totalorder %s9039_s25, %s9039_s25  ;;  %p8539_p2 = scmp.lt.s32.totalorder %s8537_s14, %s8530_s18 }
  0x35   : > { %p8533_p12 = pnand %p8531_p11, %p9043_p6 }
  0x36   : > { %p8540_p4 = por %p8539_p2, %p8538_p0 }
  0x37   : > { %p8534_p13 = pneg %p8533_p12 }
  0x38   : > { %8059 = dma.hbm_to_vmem [thread:$0]  (!%p9035_p5), %s11951_s3, 16, %s404_s22, [#allocation9]  }
  0x39   : > { %p8541_p7 = pnand %p8540_p4, %p8534_p13 }
  0x3b   : > { %8544 = shalt.err (!%p8541_p7)
}
  0x3c   : > { %s11952_s5 = sld [smem:[#allocation88_spill]]  ;;  %s8902_s22 = smov [#allocation14]  }
  0x3d   : > { %s452_s21 = sshll.u32 %s8902_s22, 4  ;;  %s8903_s24 = smov [#allocation17]   ;;  %s453_s21 = int_to_ptr.vmem [resolvable:$true] %s452_s21 }
  0x3e   : > { %s476_s27 = sshll.u32 %s8903_s24, 4  ;;  %s8556_s28 = scalar_lea.vmem %s453_s21, 16  ;;  %s477_s27 = int_to_ptr.vmem [resolvable:$true] %s476_s27 }
  0x3f   : > { %p8557_p8 = scmp.ne.s32.totalorder %s453_s21, %s8556_s28  ;;  %s8563_s18 = scalar_lea.vmem %s453_s21, 32 }
  0x40   : > { %p8564_p11 = scmp.lt.s32.totalorder %s453_s21, %s453_s21  ;;  %p8565_p12 = scmp.lt.s32.totalorder %s8563_s18, %s8556_s28 }
  0x41   : > { %p8559_p9 = pnand %p8557_p8, %p9043_p6 }
  0x42   : > { %8065 = dma.hbm_to_vmem [thread:$0]  (!%p9035_p5), %s11952_s5, 16, %s9039_s25, [#allocation12]  }
  0x43   : > { %p8560_p10 = pneg %p8559_p9  ;;  %p8566_p13 = por %p8565_p12, %p8564_p11 }
  0x45   : > { %p8567_p0 = pnand %p8566_p13, %p8560_p10 }
  0x47   : > { %8570 = shalt.err (!%p8567_p0)
}
  0x48   : > { %8071 = dma.hbm_to_vmem [thread:$0]  (!%p9035_p5), %s11812_s8, 16, %s453_s21, [#allocation15]  }
  0x49   : > { %s8582_s7 = scalar_lea.vmem %s477_s27, 16  ;;  %s8589_s20 = scalar_lea.vmem %s477_s27, 32 }
  0x4a   : > { %p8583_p2 = scmp.ne.s32.totalorder %s477_s27, %s8582_s7  ;;  %p8590_p8 = scmp.lt.s32.totalorder %s477_s27, %s477_s27 }
  0x4b   : > { %p8591_p9 = scmp.lt.s32.totalorder %s8589_s20, %s8582_s7 }
  0x4c   : > { %p8585_p4 = pnand %p8583_p2, %p9043_p6 }
  0x4d   : > { %p8592_p1 = por %p8591_p9, %p8590_p8 }
  0x4e   : > { %p8586_p7 = pneg %p8585_p4 }
  0x50   : > { %p8593_p11 = pnand %p8592_p1, %p8586_p7 }
  0x52   : > { %8596 = shalt.err (!%p8593_p11)
}
  0x53   : > { %8077 = dma.hbm_to_vmem [thread:$0]  (!%p9035_p5), %s11814_s10, 16, %s477_s27, [#allocation18]  }
  0x54   : > { %s8904_s21 = smov [#allocation20]   ;;  %s8905_s18 = smov [#allocation7]  }
  0x55   : > { %s500_s24 = sshll.u32 %s8904_s21, 4  ;;  %s392_s14 = sshll.u32 %s8905_s18, 4  ;;  %s501_s24 = int_to_ptr.vmem [resolvable:$true] %s500_s24  ;;  %s393_s14 = int_to_ptr.vmem [resolvable:$true] %s392_s14 }
  0x56   : > { %s8608_s25 = scalar_lea.vmem %s501_s24, 64  ;;  %p8616_p0 = scmp.lt.s32.totalorder %s501_s24, %s501_s24 }
  0x57   : > { %p8609_p10 = scmp.ne.s32.totalorder %s501_s24, %s8608_s25  ;;  %p8617_p1 = scmp.lt.s32.totalorder %s8608_s25, %s8608_s25 }
  0x59   : > { %p8611_p12 = pnand %p8609_p10, %p9043_p6  ;;  %p8618_p2 = por %p8617_p1, %p8616_p0 }
  0x5b   : > { %p8612_p13 = pneg %p8611_p12 }
  0x5d   : > { %p8619_p4 = pnand %p8618_p2, %p8612_p13 }
  0x5f   : > { %8622 = shalt.err (!%p8619_p4)
}
  0x60   : > { %8083 = dma.hbm_to_vmem [thread:$0]  (!%p9035_p5), %s11816_s12, 64, %s501_s24, [#allocation21]  }
  0x61   : > { %s8634_s27 = scalar_lea.vmem %s393_s14, 16  ;;  %s8641_s28 = scalar_lea.vmem %s393_s14, 32 }
  0x62   : > { %p8635_p7 = scmp.ne.s32.totalorder %s393_s14, %s8634_s27  ;;  %p8642_p11 = scmp.lt.s32.totalorder %s393_s14, %s393_s14 }
  0x63   : > { %p8643_p10 = scmp.lt.s32.totalorder %s8641_s28, %s8634_s27 }
  0x64   : > { %p8637_p8 = pnand %p8635_p7, %p9043_p6 }
  0x65   : > { %p8644_p12 = por %p8643_p10, %p8642_p11 }
  0x66   : > { %p8638_p9 = pneg %p8637_p8 }
  0x68   : > { %p8645_p0 = pnand %p8644_p12, %p8638_p9 }
  0x6a   : > { %8648 = shalt.err (!%p8645_p0)
}
  0x6b   : > { %s11953_s2 = sld [smem:[#allocation85_spill]]  ;;  %s8906_s24 = smov [#allocation10]  }
  0x6c   : > { %s413_s18 = sshll.u32 %s8906_s24, 4  ;;  %s8907_s25 = smov [#allocation13]   ;;  %s414_s18 = int_to_ptr.vmem [resolvable:$true] %s413_s18 }
  0x6d   : > { %s438_s7 = sshll.u32 %s8907_s25, 4  ;;  %s8660_s20 = scalar_lea.vmem %s414_s18, 9216  ;;  %s439_s7 = int_to_ptr.vmem [resolvable:$true] %s438_s7 }
  0x6e   : > { %p8661_p13 = scmp.ne.s32.totalorder %s414_s18, %s8660_s20  ;;  %p8668_p4 = scmp.lt.s32.totalorder %s414_s18, %s414_s18 }
  0x6f   : > { %p8669_p7 = scmp.lt.s32.totalorder %s8660_s20, %s8660_s20 }
  0x70   : > { %p8663_p1 = pnand %p8661_p13, %p9043_p6 }
  0x71   : > { %8056 = dma.hbm_to_vmem [thread:$0]  (!%p9035_p5), %s11953_s2, 16, %s393_s14, [#allocation6]  }
  0x72   : > { %p8664_p2 = pneg %p8663_p1  ;;  %p8670_p8 = por %p8669_p7, %p8668_p4 }
  0x74   : > { %p8671_p9 = pnand %p8670_p8, %p8664_p2 }
  0x76   : > { %8674 = shalt.err (!%p8671_p9)
}
  0x77   : > { %s11954_s27 = smov 64   ;;  %s11955_s4 = sld [smem:[#allocation87_spill]] }
  0x78   : > { %s8686_s22 = scalar_lea.vmem %s439_s7, 16  ;;  %s8693_s21 = scalar_lea.vmem %s439_s7, 32 }
  0x79   : > { %p8687_p11 = scmp.ne.s32.totalorder %s439_s7, %s8686_s22  ;;  %p8694_p0 = scmp.lt.s32.totalorder %s439_s7, %s439_s7 }
  0x7a   : > { %p8695_p13 = scmp.lt.s32.totalorder %s8693_s21, %s8686_s22 }
  0x7b   : > { %p8689_p10 = pnand %p8687_p11, %p9043_p6 }
  0x7c   : > { %p8696_p1 = por %p8695_p13, %p8694_p0 }
  0x7d   : > { %8062 = dma.hbm_to_vmem [thread:$0]  (!%p9035_p5), %s11955_s4, 9216, %s414_s18, [#allocation9], %s11954_s27, %s11954_s27, %s8901_s17  }
  0x7e   : > { %p8690_p12 = pneg %p8689_p10 }
  0x80   : > { %p8697_p2 = pnand %p8696_p1, %p8690_p12 }
  0x82   : > { %8700 = shalt.err (!%p8697_p2)
}
  0x83   : > { %8068 = dma.hbm_to_vmem [thread:$0]  (!%p9035_p5), %s11810_s6, 16, %s439_s7, [#allocation12]  }
  0x84   : > { %s8908_s17 = smov [#allocation16]  }
  0x85   : > { %s462_s18 = sshll.u32 %s8908_s17, 4  ;;  %s463_s18 = int_to_ptr.vmem [resolvable:$true] %s462_s18 }
  0x86   : > { %s8712_s20 = scalar_lea.vmem %s463_s18, 1024  ;;  %p8720_p9 = scmp.lt.s32.totalorder %s463_s18, %s463_s18 }
  0x87   : > { %p8713_p4 = scmp.ne.s32.totalorder %s463_s18, %s8712_s20  ;;  %p8721_p11 = scmp.lt.s32.totalorder %s8712_s20, %s8712_s20 }
  0x89   : > { %p8715_p7 = pnand %p8713_p4, %p9043_p6  ;;  %p8722_p10 = por %p8721_p11, %p8720_p9 }
  0x8b   : > { %p8716_p8 = pneg %p8715_p7 }
  0x8d   : > { %p8723_p12 = pnand %p8722_p10, %p8716_p8 }
  0x8f   : > { %8726 = shalt.err (!%p8723_p12)
}
  0x90   : > { %s8909_s27 = smov 128   ;;  %s8910_s14 = smov 8  }
  0x91   : > { %8074 = dma.hbm_to_vmem [thread:$0]  (!%p9035_p5), %s11813_s9, 1024, %s463_s18, [#allocation15], %s8909_s27, %s8909_s27, %s8910_s14  }
  0x92   : > { %s8911_s22 = smov [#allocation19]  }
  0x93   : > { %s486_s21 = sshll.u32 %s8911_s22, 4  ;;  %s487_s21 = int_to_ptr.vmem [resolvable:$true] %s486_s21 }
  0x94   : > { %s8738_s24 = scalar_lea.vmem %s487_s21, 4096  ;;  %p8746_p2 = scmp.lt.s32.totalorder %s487_s21, %s487_s21 }
  0x95   : > { %p8739_p0 = scmp.ne.s32.totalorder %s487_s21, %s8738_s24  ;;  %p8747_p4 = scmp.lt.s32.totalorder %s8738_s24, %s8738_s24 }
  0x97   : > { %p8741_p13 = pnand %p8739_p0, %p9043_p6  ;;  %p8748_p7 = por %p8747_p4, %p8746_p2 }
  0x99   : > { %p8742_p1 = pneg %p8741_p13 }
  0x9b   : > { %p8749_p8 = pnand %p8748_p7, %p8742_p1 }
  0x9d   : > { %8752 = shalt.err (!%p8749_p8)
}
  0x9e   : > { %s8912_s25 = smov 256   ;;  %s8913_s17 = smov 16  }
  0x9f   : > { %8080 = dma.hbm_to_vmem [thread:$0]  (!%p9035_p5), %s11815_s11, 4096, %s487_s21, [#allocation18], %s8912_s25, %s8912_s25, %s8913_s17  }
  0xa0   : > { %s8914_s27 = smov [#allocation22]  }
  0xa1   : > { %s511_s14 = sshll.u32 %s8914_s27, 4  ;;  %s512_s14 = int_to_ptr.vmem [resolvable:$true] %s511_s14 }
  0xa2   : > { %s8764_s28 = scalar_lea.vmem %s512_s14, 64  ;;  %p8772_p12 = scmp.lt.s32.totalorder %s512_s14, %s512_s14 }
  0xa3   : > { %p8765_p9 = scmp.ne.s32.totalorder %s512_s14, %s8764_s28  ;;  %p8773_p0 = scmp.lt.s32.totalorder %s8764_s28, %s8764_s28 }
  0xa5   : > { %p8767_p11 = pnand %p8765_p9, %p9043_p6  ;;  %p8774_p13 = por %p8773_p0, %p8772_p12 }
  0xa7   : > { %p8768_p10 = pneg %p8767_p11 }
  0xa9   : > { %p8775_p1 = pnand %p8774_p13, %p8768_p10 }
  0xab   : > { %8778 = shalt.err (!%p8775_p1)
}
  0xac   : > { %8086 = dma.hbm_to_vmem [thread:$0]  (!%p9035_p5), %s11817_s13, 64, %s512_s14, [#allocation21]  }
  0xad   : > { %s6657_s26 = sadd.s32 4294967294, %s8895_s16   ;;  %s9145_s23 = sadd.s32 1, %s8895_s16  }
  0xae   : > { %s40_s21 = ssub.s32 %s8895_s16, %s9145_s23  ;;  %s43_s24 = sadd.s32 1, %s8891_s15 }
  0xaf   : > { %p41_p6 = scmp.eq.s32.totalorder %s40_s21, 0  ;;  %p50_p2 = scmp.ne.s32.totalorder %s8891_s15, %s8887_s30 }
  0xb0   : > { %p51_p4 = scmp.eq.s32.totalorder %s8895_s16, 0  ;;  %p56_p7 = scmp.ne.s32.totalorder %s8887_s30, %s8883_s29 }
  0xb1   : > { %s9156_s25 = scalar_select %p41_p6, %s8891_s15, %s43_s24  }
  0xb2   : > { %p9158_p8 = por %p51_p4, %p50_p2  ;;  %p11957_p9 = scmp.eq.s32.totalorder %s9022_s19, 0 }
  0xb3   : > { %p353_p11 = scmp.eq.s32.totalorder %s9022_s19, 3  ;;  %p359_p10 = scmp.eq.s32.totalorder %s6657_s26, 3 }
  0xb4   : > { %p9164_p5 = por %p11957_p9, %p56_p7  ;;  %p8107_p12 = scmp.lt.s32.totalorder %s8895_s16, 4 }
  0xb5   : > { %s522_s18 = sand.u32 1, %s8891_s15   ;;  %p9171_p0 = por %p353_p11, %p50_p2 }
  0xb6   : > { %s11958_s20 = scalar_select %p9164_p5, 1, 0 }
  0xb7   : > { %s11959_s27 = scalar_select %p9171_p0, 1, 0 }
  0xb8   : > { %p9175_p13 = por %p359_p10, %p56_p7  ;;  %s6672_s28 = sshll.u32 %s522_s18, 10 }
  0xb9   : > { %s7124_s7 = sshll.u32 %s8895_s16, 14  ;;  %s526_s26 = scalar_lea.vmem [#allocation2], %s6672_s28 }
  0xba   : > { %s11960_s14 = scalar_select %p9175_p13, 1, 0 }
  0xbb   : > { %s9183_s24 = scalar_lea.hbm %s11804_s0, %s7124_s7  ;;  %s533_s1 = sshll.u32 %s526_s26, 4  ;;  %s9185_s1 = int_to_ptr.vmem [resolvable:$true] %s533_s1 }
  0xbc   : > { %p9189_p1 = pnand %p8107_p12, %p9158_p8  ;;  %s9193_s3 = scalar_lea.sflag [#allocation3], %s522_s18 }
  0xbd   : > { %s8779_s4 = scalar_lea.hbm %s9183_s24, 16384  ;;  %s8784_s28 = scalar_lea.hbm %s11804_s0, 65536 }
  0xbe   : > { %p8780_p6 = scmp.ne.s32.totalorder %s9183_s24, %s8779_s4  ;;  %p8781_p2 = pneg %p9189_p1 }
  0xbf   : > { %p8785_p8 = scmp.lt.s32.totalorder %s9183_s24, %s11804_s0  ;;  %p8786_p9 = scmp.lt.s32.totalorder %s8784_s28, %s8779_s4 }
  0xc0   : > { %p8782_p4 = pnand %p8781_p2, %p8780_p6 }
  0xc1   : > { %p8787_p11 = por %p8786_p9, %p8785_p8 }
  0xc2   : > { %p8783_p7 = pneg %p8782_p4 }
  0xc4   : > { %p8788_p10 = pnand %p8787_p11, %p8783_p7 }
  0xc6   : > { %8791 = shalt.err (!%p8788_p10)
}
  0xc7   : > { %s8792_s17 = scalar_lea.vmem %s9185_s1, 16384  ;;  %s8915_s18 = smov [#allocation2]  }
  0xc8   : > { %p8793_p12 = scmp.ne.s32.totalorder %s9185_s1, %s8792_s17  ;;  %s8797_s5 = sshll.u32 %s8915_s18, 4  ;;  %s8798_s5 = int_to_ptr.vmem [resolvable:$false] %s8797_s5 }
  0xc9   : > { %s8799_s7 = scalar_lea.vmem %s8798_s5, 32768  ;;  %p8800_p4 = scmp.lt.s32.totalorder %s9185_s1, %s8798_s5 }
  0xca   : > { %p8795_p13 = pnand %p8793_p12, %p8781_p2  ;;  %p8801_p0 = scmp.lt.s32.totalorder %s8799_s7, %s8792_s17 }
  0xcc   : > { %p8796_p6 = pneg %p8795_p13  ;;  %p8802_p5 = por %p8801_p0, %p8800_p4 }
  0xce   : > { %p8803_p3 = pnand %p8802_p5, %p8796_p6 }
  0xd0   : > { %8806 = shalt.err (!%p8803_p3)
}
  0xd1   : > { %s8916_s4 = smov 512   ;;  %s8917_s22 = smov 32  }
  0xd2   : > { %8090 = dma.hbm_to_vmem [thread:$0]  (!%p9189_p1), %s9183_s24, 16384, %s9185_s1, %s9193_s3, %s8916_s4, %s8916_s4, %s8917_s22  }
  0xd3   : > { %s11962_s28 = sld [smem:[#allocation32_spill]] }
  0xd9   : > { %p11963_p2 = scmp.ne.s32.totalorder %s11962_s28, 0 }
  0xdb   : > { %545 = sbr.rel (%p11963_p2) target bundleno = 1940 (0x794), region = 76 }
  0xe0   : > { %s9217_s21 = sand.u32 1, %s8887_s30   ;;  %p11964_p3 = scmp.ne.s32.totalorder %s11958_s20, 0 }
  0xe1   : > { %s6676_s5 = sshll.u32 %s9217_s21, 10  ;;  %s548_s26 = scalar_lea.sflag [#allocation3], %s9217_s21 }
  0xe2   : > { %s9223_s17 = scalar_lea.vmem [#allocation2], %s6676_s5 }
  0xe3   : > { %8850 = dma.done.wait (%p11964_p3), %s548_s26, 16384  }
  0xe4   : > { %8852 = vsyncadd (%p11964_p3), %s548_s26, 4294950912  ;;  %p11965_p5 = scmp.eq.s32.totalorder %s9022_s19, 0 }
  0xe6   : > { %8854 = dma.done.wait (%p11965_p5), [#allocation6], 4112   ;;  %p11966_p0 = pmov %p11965_p5 }
  0xe8   : > { %8856 = vsyncadd (%p11966_p0), [#allocation6], 4294963184  ;;  %p11967_p13 = pmov %p11966_p0 }
  0xe9   : > { %p11968_p1 = pmov %p11966_p0 }
  0xea   : > { %8858 = dma.done.wait (%p11967_p13), [#allocation9], 9232  }
  0xeb   : > { %8860 = vsyncadd (%p11968_p1), [#allocation9], 4294958064  ;;  %p11969_p7 = pmov %p11966_p0 }
  0xec   : > { %p11970_p8 = pmov %p11966_p0 }
  0xed   : > { %8862 = dma.done.wait (%p11969_p7), [#allocation12], 32  }
  0xee   : > { %8864 = vsyncadd (%p11970_p8), [#allocation12], 4294967264  ;;  %p11971_p9 = pmov %p11966_p0 }
  0xef   : > { %p11972_p11 = pmov %p11966_p0 }
  0xf0   : > { %8866 = dma.done.wait (%p11971_p9), [#allocation15], 1040  }
  0xf1   : > { %8868 = vsyncadd (%p11972_p11), [#allocation15], 4294966256  ;;  %p11973_p10 = pmov %p11966_p0 }
  0xf2   : > { %p11974_p12 = pmov %p11966_p0 }
  0xf3   : > { %8870 = dma.done.wait (%p11973_p10), [#allocation18], 4112  }
  0xf4   : > { %8872 = vsyncadd (%p11974_p12), [#allocation18], 4294963184  ;;  %p11975_p6 = pmov %p11966_p0 }
  0xf5   : > { %p11976_p4 = pmov %p11966_p0 }
  0xf6   : > { %8874 = dma.done.wait (%p11975_p6), [#allocation21], 128  }
  0xf7   : > { %8876 = vsyncadd (%p11976_p4), [#allocation21], 4294967168  ;;  %v8180_v0 = vld [vmem:[#allocation5 + $0x78] sm:$0xff]   ;;  %v8184_v4 = vld [vmem:[#allocation5 + $0x70] sm:$0xff]   ;;  %vm11860_vm7 = vmmov 1   ;;  %s12240_s3 = sld [smem:[#allocation89_spill]] }
  0xf8   : > { %v8181_v1 = vld [vmem:[#allocation5 + $0xf8] sm:$0xff]   ;;  %7126 = vmatprep.subr.bf16.mxu0 %v8180_v0  ;;  %v8185_v5 = vld [vmem:[#allocation5 + $0xf0] sm:$0xff]   ;;  %v8188_v8 = vld [vmem:[#allocation5 + $0x68] sm:$0xff]   ;;  %s11259_s20 = scalar_lea.vmem [#allocation23], %s6676_s5  ;;  %s7125_s5 = sshll.u32 %s9022_s19, 14 }
  0xf9   : > { %v8182_v2 = vld [vmem:[#allocation5 + $0x38] sm:$0xff]   ;;  %7238 = vmatprep.subr.bf16.mxu1 %v8181_v1  ;;  %v8186_v6 = vld [vmem:[#allocation5 + $0x30] sm:$0xff]   ;;  %v8189_v9 = vld [vmem:[#allocation5 + $0xe8] sm:$0xff]   ;;  %s6470_s24 = sshll.u32 %s11259_s20, 4  ;;  %s12277_s4 = sld [smem:[#allocation90_spill]]  ;;  %s11760_s24 = int_to_ptr.vmem [resolvable:$true] %s6470_s24 }
  0xfa   : > { %v8183_v3 = vld [vmem:[#allocation5 + $0xb8] sm:$0xff]   ;;  %7127 = vmatpush3.bf16.msra.mxu0 %v8182_v2  ;;  %v8187_v7 = vld [vmem:[#allocation5 + $0xb0] sm:$0xff]   ;;  %v8190_v10 = vld [vmem:[#allocation5 + $0x28] sm:$0xff]   ;;  %s6457_s28 = scalar_lea.sflag [#allocation4], %s9217_s21  ;;  %s8807_s19 = scalar_lea.vmem %s11760_s24, 16384 }
  0xfb   : > { %7239 = vmatpush3.bf16.msra.mxu1 %v8183_v3  ;;  %7128 = vmatprep.subr.bf16.mxu0 %v8184_v4  ;;  %v8191_v11 = vld [vmem:[#allocation5 + $0xa8] sm:$0xff]   ;;  %v8192_v12 = vld [vmem:[#allocation5 + $0x60] sm:$0xff]   ;;  %v8196_v16 = vld [vmem:[#allocation5 + $0x58] sm:$0xff]   ;;  %p8808_p2 = scmp.ne.s32.totalorder %s11760_s24, %s8807_s19  ;;  %p12278_p3 = scmp.ne.s32.totalorder %s11959_s27, 0 }
  0xfc   : > { %7240 = vmatprep.subr.bf16.mxu1 %v8185_v5  ;;  %v8193_v13 = vld [vmem:[#allocation5 + $0xe0] sm:$0xff]   ;;  %v8197_v17 = vld [vmem:[#allocation5 + $0xd8] sm:$0xff]   ;;  %v8200_v20 = vld [vmem:[#allocation5 + $0x50] sm:$0xff]  }
  0xfd   : > { %v8194_v14 = vld [vmem:[#allocation5 + $0x20] sm:$0xff]   ;;  %v8198_v18 = vld [vmem:[#allocation5 + $0x18] sm:$0xff]   ;;  %v8201_v21 = vld [vmem:[#allocation5 + $0xd0] sm:$0xff]   ;;  %p8809_p5 = pnand %p8808_p2, %p12278_p3 }
  0xfe   : > { %7129 = vmatpush3.bf16.msra.mxu0 %v8186_v6  ;;  %v8195_v15 = vld [vmem:[#allocation5 + $0xa0] sm:$0xff]   ;;  %v8199_v19 = vld [vmem:[#allocation5 + $0x98] sm:$0xff]   ;;  %v8202_v22 = vld [vmem:[#allocation5 + $0x10] sm:$0xff]  }
  0xff   : > { %7241 = vmatpush3.bf16.msra.mxu1 %v8187_v7  ;;  %7130 = vmatprep.subr.bf16.mxu0 %v8188_v8  ;;  %v8203_v23 = vld [vmem:[#allocation5 + $0x90] sm:$0xff]   ;;  %v8204_v24 = vld [vmem:[#allocation5 + $0x48] sm:$0xff]   ;;  %v8208_v28 = vld [vmem:[#allocation5 + $0x40] sm:$0xff]   ;;  %s11758_s22 = scalar_lea.hbm %s12277_s4, %s7125_s5  ;;  %p8810_p0 = pneg %p8809_p5 }
 0x100   : > { %7242 = vmatprep.subr.bf16.mxu1 %v8189_v9  ;;  %v8205_v25 = vld [vmem:[#allocation5 + $0xc8] sm:$0xff]   ;;  %v8209_v29 = vld [vmem:[#allocation5 + $0xc0] sm:$0xff]   ;;  %v648_v34 = vld [vmem:[%s9223_s17 + $0x18] sm:$0xff] }
 0x101   : > { %v8206_v26 = vld [vmem:[#allocation5 + $0x8] sm:$0xff]   ;;  %v8210_v30 = vld [vmem:[#allocation5] sm:$0xff]   ;;  %v652_v36 = vld [vmem:[%s9223_s17 + $0x38] sm:$0xff] }
 0x102   : > { %7131 = vmatpush3.bf16.msra.mxu0 %v8190_v10  ;;  %v8207_v27 = vld [vmem:[#allocation5 + $0x88] sm:$0xff]   ;;  %v8211_v31 = vld [vmem:[#allocation5 + $0x80] sm:$0xff]   ;;  %v776_v39 = vpack.c.bf16 %v652_v36, %v648_v34  ;;  %v647_v41 = vld [vmem:[%s9223_s17 + $0x10] sm:$0xff] }
 0x103   : > { %7243 = vmatpush3.bf16.msra.mxu1 %v8191_v11  ;;  %7132 = vmatprep.subr.bf16.mxu0 %v8192_v12  ;;  %v646_v32 = vld [vmem:[%s9223_s17 + $0x8] sm:$0xff]  ;;  %v645_v37 = vld [vmem:[%s9223_s17] sm:$0xff]  ;;  %v651_v42 = vld [vmem:[%s9223_s17 + $0x30] sm:$0xff] }
 0x104   : > { %7244 = vmatprep.subr.bf16.mxu1 %v8193_v13  ;;  %v650_v33 = vld [vmem:[%s9223_s17 + $0x28] sm:$0xff]  ;;  %v649_v38 = vld [vmem:[%s9223_s17 + $0x20] sm:$0xff]  ;;  %v775_v44 = vpack.c.bf16 %v651_v42, %v647_v41  ;;  %v656_v46 = vld [vmem:[%s9223_s17 + $0x58] sm:$0xff]  ;;  %1286 = vmatprep.mubr.bf16.mxu1 %v776_v39 }
 0x105   : > { %v774_v35 = vpack.c.bf16 %v650_v33, %v646_v32  ;;  %v773_v40 = vpack.c.bf16 %v649_v38, %v645_v37  ;;  %v654_v43 = vld [vmem:[%s9223_s17 + $0x48] sm:$0xff]  ;;  %v660_v47 = vld [vmem:[%s9223_s17 + $0x78] sm:$0xff]  ;;  %v653_v50 = vld [vmem:[%s9223_s17 + $0x40] sm:$0xff] }
 0x106   : > { %7133 = vmatpush3.bf16.msra.mxu0 %v8194_v14  ;;  %v658_v45 = vld [vmem:[%s9223_s17 + $0x68] sm:$0xff]  ;;  %v780_v49 = vpack.c.bf16 %v660_v47, %v656_v46  ;;  %v657_v51 = vld [vmem:[%s9223_s17 + $0x60] sm:$0xff]  ;;  %v655_v52 = vld [vmem:[%s9223_s17 + $0x50] sm:$0xff] }
 0x107   : > { %7245 = vmatpush3.bf16.msra.mxu1 %v8195_v15  ;;  %7134 = vmatprep.subr.bf16.mxu0 %v8196_v16  ;;  %v778_v48 = vpack.c.bf16 %v658_v45, %v654_v43  ;;  %v659_v53 = vld [vmem:[%s9223_s17 + $0x70] sm:$0xff]  ;;  %v662_v54 = vld [vmem:[%s9223_s17 + $0x88] sm:$0xff]  ;;  %v664_v56 = vld [vmem:[%s9223_s17 + $0x98] sm:$0xff]  ;;  %v777_v58 = vpack.c.bf16 %v657_v51, %v653_v50 }
 0x108   : > { %7246 = vmatprep.subr.bf16.mxu1 %v8197_v17  ;;  %1125 = vmatprep.mubr.bf16.mxu0 %v774_v35  ;;  %v666_v55 = vld [vmem:[%s9223_s17 + $0xa8] sm:$0xff]  ;;  %v668_v57 = vld [vmem:[%s9223_s17 + $0xb8] sm:$0xff]  ;;  %v779_v59 = vpack.c.bf16 %v659_v53, %v655_v52  ;;  %v661_v62 = vld [vmem:[%s9223_s17 + $0x80] sm:$0xff] }
 0x109   : > { %v782_v60 = vpack.c.bf16 %v666_v55, %v662_v54  ;;  %v784_v61 = vpack.c.bf16 %v668_v57, %v664_v56  ;;  %v665_v63 = vld [vmem:[%s9223_s17 + $0xa0] sm:$0xff]  ;;  %v663_v0 = vld [vmem:[%s9223_s17 + $0x90] sm:$0xff]  ;;  %v670_v2 = vld [vmem:[%s9223_s17 + $0xc8] sm:$0xff] }
 0x10a   : > { %7135 = vmatpush3.bf16.msra.mxu0 %v8198_v18  ;;  %v667_v1 = vld [vmem:[%s9223_s17 + $0xb0] sm:$0xff]  ;;  %v674_v3 = vld [vmem:[%s9223_s17 + $0xe8] sm:$0xff]  ;;  %v672_v4 = vld [vmem:[%s9223_s17 + $0xd8] sm:$0xff]  ;;  %v781_v6 = vpack.c.bf16 %v665_v63, %v661_v62 }
 0x10b   : > { %7247 = vmatpush3.bf16.msra.mxu1 %v8199_v19  ;;  %7136 = vmatprep.subr.bf16.mxu0 %v8200_v20  ;;  %v676_v5 = vld [vmem:[%s9223_s17 + $0xf8] sm:$0xff]  ;;  %v783_v7 = vpack.c.bf16 %v667_v1, %v663_v0  ;;  %v786_v8 = vpack.c.bf16 %v674_v3, %v670_v2  ;;  %v669_v10 = vld [vmem:[%s9223_s17 + $0xc0] sm:$0xff]  ;;  %v671_v12 = vld [vmem:[%s9223_s17 + $0xd0] sm:$0xff] }
 0x10c   : > { %7248 = vmatprep.subr.bf16.mxu1 %v8201_v21  ;;  %v788_v9 = vpack.c.bf16 %v676_v5, %v672_v4  ;;  %v673_v11 = vld [vmem:[%s9223_s17 + $0xe0] sm:$0xff]  ;;  %v675_v13 = vld [vmem:[%s9223_s17 + $0xf0] sm:$0xff]  ;;  %v678_v14 = vld [vmem:[%s9223_s17 + $0x108] sm:$0xff] }
 0x10d   : > { %v682_v15 = vld [vmem:[%s9223_s17 + $0x128] sm:$0xff]  ;;  %v680_v16 = vld [vmem:[%s9223_s17 + $0x118] sm:$0xff]  ;;  %v785_v18 = vpack.c.bf16 %v673_v11, %v669_v10  ;;  %v787_v19 = vpack.c.bf16 %v675_v13, %v671_v12  ;;  %v685_v34 = vld [vmem:[%s9223_s17 + $0x140] sm:$0xff] }
 0x10e   : > { %7137 = vmatpush3.bf16.msra.mxu0 %v8202_v22  ;;  %v684_v17 = vld [vmem:[%s9223_s17 + $0x138] sm:$0xff]  ;;  %v790_v20 = vpack.c.bf16 %v682_v15, %v678_v14  ;;  %v677_v22 = vld [vmem:[%s9223_s17 + $0x100] sm:$0xff]  ;;  %v687_v36 = vld [vmem:[%s9223_s17 + $0x150] sm:$0xff] }
 0x10f   : > { %7249 = vmatpush3.bf16.msra.mxu1 %v8203_v23  ;;  %7138 = vmatprep.subr.bf16.mxu0 %v8204_v24  ;;  %v792_v21 = vpack.c.bf16 %v684_v17, %v680_v16  ;;  %v681_v23 = vld [vmem:[%s9223_s17 + $0x120] sm:$0xff]  ;;  %v679_v24 = vld [vmem:[%s9223_s17 + $0x110] sm:$0xff]  ;;  %v694_v38 = vld [vmem:[%s9223_s17 + $0x188] sm:$0xff] }
 0x110   : > { %7250 = vmatprep.subr.bf16.mxu1 %v8205_v25  ;;  %v683_v25 = vld [vmem:[%s9223_s17 + $0x130] sm:$0xff]  ;;  %v689_v35 = vld [vmem:[%s9223_s17 + $0x160] sm:$0xff]  ;;  %v698_v39 = vld [vmem:[%s9223_s17 + $0x1a8] sm:$0xff] }
 0x111   : > { %v691_v37 = vld [vmem:[%s9223_s17 + $0x170] sm:$0xff]  ;;  %v700_v41 = vld [vmem:[%s9223_s17 + $0x1b8] sm:$0xff]  ;;  %v793_v42 = vpack.c.bf16 %v689_v35, %v685_v34  ;;  %v693_v46 = vld [vmem:[%s9223_s17 + $0x180] sm:$0xff] }
 0x112   : > { %7139 = vmatpush3.bf16.msra.mxu0 %v8206_v26  ;;  %v686_v26 = vld [vmem:[%s9223_s17 + $0x148] sm:$0xff]  ;;  %v795_v43 = vpack.c.bf16 %v691_v37, %v687_v36  ;;  %v697_v47 = vld [vmem:[%s9223_s17 + $0x1a0] sm:$0xff]  ;;  %v704_v52 = vld [vmem:[%s9223_s17 + $0x1d8] sm:$0xff] }
 0x113   : > { %7251 = vmatpush3.bf16.msra.mxu1 %v8207_v27  ;;  %7140 = vmatprep.subr.bf16.mxu0 %v8208_v28  ;;  %v690_v27 = vld [vmem:[%s9223_s17 + $0x168] sm:$0xff]  ;;  %v688_v28 = vld [vmem:[%s9223_s17 + $0x158] sm:$0xff]  ;;  %v797_v54 = vpack.c.bf16 %v697_v47, %v693_v46  ;;  %v727_v34 = vld [vmem:[%s9223_s17 + $0x290] sm:$0xff] }
 0x114   : > { %7252 = vmatprep.subr.bf16.mxu1 %v8209_v29  ;;  %v692_v29 = vld [vmem:[%s9223_s17 + $0x178] sm:$0xff]  ;;  %v794_v32 = vpack.c.bf16 %v690_v27, %v686_v26  ;;  %v702_v50 = vld [vmem:[%s9223_s17 + $0x1c8] sm:$0xff]  ;;  %v731_v35 = vld [vmem:[%s9223_s17 + $0x2b0] sm:$0xff] }
 0x115   : > { %v796_v33 = vpack.c.bf16 %v692_v29, %v688_v28  ;;  %v706_v51 = vld [vmem:[%s9223_s17 + $0x1e8] sm:$0xff]  ;;  %v708_v53 = vld [vmem:[%s9223_s17 + $0x1f8] sm:$0xff]  ;;  %v733_v46 = vld [vmem:[%s9223_s17 + $0x2c0] sm:$0xff] }
 0x116   : > { %7141 = vmatpush3.bf16.msra.mxu0 %v8210_v30  ;;  %v789_v30 = vpack.c.bf16 %v681_v23, %v677_v22  ;;  %v802_v56 = vpack.c.bf16 %v706_v51, %v702_v50  ;;  %v804_v57 = vpack.c.bf16 %v708_v53, %v704_v52  ;;  %v710_v62 = vld [vmem:[%s9223_s17 + $0x208] sm:$0xff]  ;;  %v712_v0 = vld [vmem:[%s9223_s17 + $0x218] sm:$0xff]  ;;  %v737_v47 = vld [vmem:[%s9223_s17 + $0x2e0] sm:$0xff] }
 0x117   : > { %7253 = vmatpush3.bf16.msra.mxu1 %v8211_v31  ;;  %v791_v31 = vpack.c.bf16 %v683_v25, %v679_v24  ;;  %v714_v63 = vld [vmem:[%s9223_s17 + $0x228] sm:$0xff]  ;;  %v716_v1 = vld [vmem:[%s9223_s17 + $0x238] sm:$0xff] }
 0x118   : > { %v806_v4 = vpack.c.bf16 %v714_v63, %v710_v62  ;;  %v808_v5 = vpack.c.bf16 %v716_v1, %v712_v0  ;;  %v718_v10 = vld [vmem:[%s9223_s17 + $0x248] sm:$0xff]  ;;  %v720_v12 = vld [vmem:[%s9223_s17 + $0x258] sm:$0xff]  ;;  %v743_v62 = vld [vmem:[%s9223_s17 + $0x310] sm:$0xff] }
 0x119   : > { %1126 = vmatmul.mubr.bf16.vlgmr.msra.gmra.mxu0 %v773_v40  ;;  %v696_v40 = vld [vmem:[%s9223_s17 + $0x198] sm:$0xff]  ;;  %v722_v11 = vld [vmem:[%s9223_s17 + $0x268] sm:$0xff]  ;;  %v747_v63 = vld [vmem:[%s9223_s17 + $0x330] sm:$0xff] }
 0x11a   : > { %1287 = vmatmul.mubr.bf16.vlgmr.msra.gmra.mxu1 %v775_v44  ;;  %1133 = vmatprep.mubr.bf16.mxu0 %v778_v48  ;;  %v798_v44 = vpack.c.bf16 %v698_v39, %v694_v38  ;;  %v800_v45 = vpack.c.bf16 %v700_v41, %v696_v40  ;;  %v695_v48 = vld [vmem:[%s9223_s17 + $0x190] sm:$0xff]  ;;  %v724_v13 = vld [vmem:[%s9223_s17 + $0x278] sm:$0xff]  ;;  %v810_v16 = vpack.c.bf16 %v722_v11, %v718_v10  ;;  %v726_v22 = vld [vmem:[%s9223_s17 + $0x288] sm:$0xff] }
 0x11b   : > { %1294 = vmatprep.mubr.bf16.mxu1 %v780_v49  ;;  %v699_v49 = vld [vmem:[%s9223_s17 + $0x1b0] sm:$0xff]  ;;  %v812_v17 = vpack.c.bf16 %v724_v13, %v720_v12  ;;  %v730_v23 = vld [vmem:[%s9223_s17 + $0x2a8] sm:$0xff]  ;;  %v728_v24 = vld [vmem:[%s9223_s17 + $0x298] sm:$0xff] }
 0x11c   : > { %v799_v55 = vpack.c.bf16 %v699_v49, %v695_v48  ;;  %v732_v25 = vld [vmem:[%s9223_s17 + $0x2b8] sm:$0xff]  ;;  %v814_v29 = vpack.c.bf16 %v730_v23, %v726_v22  ;;  %v734_v36 = vld [vmem:[%s9223_s17 + $0x2c8] sm:$0xff]  ;;  %v735_v48 = vld [vmem:[%s9223_s17 + $0x2d0] sm:$0xff] }
 0x11d   : > { %v8212_v26 = vld [vmem:[#allocation10 + $0x178] sm:$0xff]   ;;  %v738_v37 = vld [vmem:[%s9223_s17 + $0x2e8] sm:$0xff]  ;;  %v739_v49 = vld [vmem:[%s9223_s17 + $0x2f0] sm:$0xff] }
 0x11e   : > { %7784 = vmatprep.subr.bf16.mxu1 %v8212_v26  ;;  %v736_v38 = vld [vmem:[%s9223_s17 + $0x2d8] sm:$0xff]  ;;  %v8214_v40 = vld [vmem:[#allocation10 + $0x168] sm:$0xff]   ;;  %v8223_v11 = vld [vmem:[#allocation10 + $0x140] sm:$0xff]  }
 0x11f   : > { %7785 = vmatpush3.bf16.msra.mxu1 %v8212_v26  ;;  %v740_v39 = vld [vmem:[%s9223_s17 + $0x2f8] sm:$0xff]  ;;  %v742_v50 = vld [vmem:[%s9223_s17 + $0x308] sm:$0xff]  ;;  %v749_v12 = vld [vmem:[%s9223_s17 + $0x340] sm:$0xff] }
 0x120   : > { %v746_v51 = vld [vmem:[%s9223_s17 + $0x328] sm:$0xff]  ;;  %v744_v52 = vld [vmem:[%s9223_s17 + $0x318] sm:$0xff]  ;;  %v753_v13 = vld [vmem:[%s9223_s17 + $0x360] sm:$0xff] }
 0x121   : > { %1134 = vmatmul.mubr.bf16.gmra.mxu0 %v777_v58  ;;  %v701_v58 = vld [vmem:[%s9223_s17 + $0x1c0] sm:$0xff]  ;;  %v748_v53 = vld [vmem:[%s9223_s17 + $0x338] sm:$0xff]  ;;  %v750_v0 = vld [vmem:[%s9223_s17 + $0x348] sm:$0xff] }
 0x122   : > { %1295 = vmatmul.mubr.bf16.gmra.mxu1 %v779_v59  ;;  %1141 = vmatprep.mubr.bf16.mxu0 %v782_v60  ;;  %v705_v59 = vld [vmem:[%s9223_s17 + $0x1e0] sm:$0xff]  ;;  %v703_v60 = vld [vmem:[%s9223_s17 + $0x1d0] sm:$0xff]  ;;  %v754_v1 = vld [vmem:[%s9223_s17 + $0x368] sm:$0xff] }
 0x123   : > { %1302 = vmatprep.mubr.bf16.mxu1 %v784_v61  ;;  %v707_v61 = vld [vmem:[%s9223_s17 + $0x1f0] sm:$0xff]  ;;  %v801_v2 = vpack.c.bf16 %v705_v59, %v701_v58  ;;  %v824_v58 = vpack.c.bf16 %v748_v53, %v744_v52  ;;  %v8234_v52 = vld [vmem:[#allocation10 + $0x78] sm:$0xff]  }
 0x124   : > { %v803_v3 = vpack.c.bf16 %v707_v61, %v703_v60  ;;  %v8219_v59 = vld [vmem:[#allocation10 + $0x150] sm:$0xff]   ;;  %v741_v60 = vld [vmem:[%s9223_s17 + $0x300] sm:$0xff]  ;;  %v8232_v53 = vld [vmem:[#allocation10 + $0x108] sm:$0xff]  }
 0x125   : > { %v745_v61 = vld [vmem:[%s9223_s17 + $0x320] sm:$0xff]  ;;  %v759_v26 = vld [vmem:[%s9223_s17 + $0x390] sm:$0xff] }
 0x129   : > { %1142 = vmatmul.mubr.bf16.gmra.mxu0 %v781_v6  ;;  %v709_v6 = vld [vmem:[%s9223_s17 + $0x200] sm:$0xff] }
 0x12a   : > { %1303 = vmatmul.mubr.bf16.gmra.mxu1 %v783_v7  ;;  %1149 = vmatprep.mubr.bf16.mxu0 %v786_v8  ;;  %v713_v7 = vld [vmem:[%s9223_s17 + $0x220] sm:$0xff]  ;;  %v711_v8 = vld [vmem:[%s9223_s17 + $0x210] sm:$0xff] }
 0x12b   : > { %1310 = vmatprep.mubr.bf16.mxu1 %v788_v9  ;;  %v715_v9 = vld [vmem:[%s9223_s17 + $0x230] sm:$0xff]  ;;  %v805_v14 = vpack.c.bf16 %v713_v7, %v709_v6  ;;  %v8216_v6 = vld [vmem:[#allocation10 + $0xf8] sm:$0xff]   ;;  %v821_v7 = vpack.c.bf16 %v745_v61, %v741_v60 }
 0x12c   : > { %v807_v15 = vpack.c.bf16 %v715_v9, %v711_v8  ;;  %v823_v8 = vpack.c.bf16 %v747_v63, %v743_v62  ;;  %v826_v9 = vpack.c.bf16 %v754_v1, %v750_v0  ;;  %v1589_v62 = vlaneseq  ;;  %v9381_v63 = vld [vmem:[#allocation7] ss:$0 sm:$0xff] }
 0x131   : > { %1150 = vmatmul.mubr.bf16.gmra.mxu0 %v785_v18  ;;  %v717_v18 = vld [vmem:[%s9223_s17 + $0x240] sm:$0xff] }
 0x132   : > { %1311 = vmatmul.mubr.bf16.gmra.mxu1 %v787_v19  ;;  %1157 = vmatprep.mubr.bf16.mxu0 %v790_v20  ;;  %v721_v19 = vld [vmem:[%s9223_s17 + $0x260] sm:$0xff]  ;;  %v719_v20 = vld [vmem:[%s9223_s17 + $0x250] sm:$0xff] }
 0x133   : > { %1318 = vmatprep.mubr.bf16.mxu1 %v792_v21  ;;  %v723_v21 = vld [vmem:[%s9223_s17 + $0x270] sm:$0xff]  ;;  %v809_v27 = vpack.c.bf16 %v721_v19, %v717_v18  ;;  %v760_v18 = vld [vmem:[%s9223_s17 + $0x398] sm:$0xff] }
 0x134   : > { %v811_v28 = vpack.c.bf16 %v723_v21, %v719_v20  ;;  %v764_v19 = vld [vmem:[%s9223_s17 + $0x3b8] sm:$0xff]  ;;  %v825_v20 = vpack.c.bf16 %v753_v13, %v749_v12 }
 0x135   : > { %v832_v23 = vpack.c.bf16 %v764_v19, %v760_v18  ;;  %v8239_v18 = vld [vmem:[#allocation10 + $0xc0] sm:$0xff]  }
 0x139   : > { %1158 = vmatmul.mubr.bf16.gmra.mxu0 %v789_v30  ;;  %v816_v30 = vpack.c.bf16 %v732_v25, %v728_v24  ;;  %v757_v24 = vld [vmem:[%s9223_s17 + $0x380] sm:$0xff] }
 0x13a   : > { %1319 = vmatmul.mubr.bf16.gmra.mxu1 %v791_v31  ;;  %1165 = vmatprep.mubr.bf16.mxu0 %v794_v32  ;;  %v8213_v31 = vld [vmem:[#allocation10 + $0x170] sm:$0xff]   ;;  %v725_v32 = vld [vmem:[%s9223_s17 + $0x280] sm:$0xff] }
 0x13b   : > { %1326 = vmatprep.mubr.bf16.mxu1 %v796_v33  ;;  %v729_v33 = vld [vmem:[%s9223_s17 + $0x2a0] sm:$0xff]  ;;  %7786 = vmatprep.subr.bf16.mxu1 %v8213_v31 }
 0x13c   : > { %7787 = vmatpush3.bf16.msra.mxu1 %v8213_v31  ;;  %v813_v41 = vpack.c.bf16 %v729_v33, %v725_v32  ;;  %v761_v25 = vld [vmem:[%s9223_s17 + $0x3a0] sm:$0xff]  ;;  %v8222_v31 = vld [vmem:[#allocation10 + $0xf0] sm:$0xff]  }
 0x13d   : > { %7788 = vmatprep.subr.bf16.mxu1 %v8214_v40  ;;  %v768_v32 = vld [vmem:[%s9223_s17 + $0x3d8] sm:$0xff] }
 0x13e   : > { %v772_v33 = vld [vmem:[%s9223_s17 + $0x3f8] sm:$0xff] }
 0x140   : > { %7789 = vmatpush3.bf16.msra.mxu1 %v8214_v40  ;;  %v767_v40 = vld [vmem:[%s9223_s17 + $0x3d0] sm:$0xff] }
 0x141   : > { %1166 = vmatmul.mubr.bf16.gmra.mxu0 %v793_v42  ;;  %v815_v42 = vpack.c.bf16 %v731_v35, %v727_v34  ;;  %v829_v34 = vpack.c.bf16 %v761_v25, %v757_v24 }
 0x142   : > { %1327 = vmatmul.mubr.bf16.gmra.mxu1 %v795_v43  ;;  %1173 = vmatprep.mubr.bf16.mxu0 %v798_v44  ;;  %v818_v43 = vpack.c.bf16 %v738_v37, %v734_v36  ;;  %v820_v44 = vpack.c.bf16 %v740_v39, %v736_v38  ;;  %v836_v37 = vpack.c.bf16 %v772_v33, %v768_v32  ;;  %v765_v38 = vld [vmem:[%s9223_s17 + $0x3c0] sm:$0xff] }
 0x143   : > { %1334 = vmatprep.mubr.bf16.mxu1 %v800_v45  ;;  %v8217_v45 = vld [vmem:[#allocation10 + $0x160] sm:$0xff]  }
 0x144   : > { %7790 = vmatprep.subr.bf16.mxu1 %v8217_v45  ;;  %v769_v39 = vld [vmem:[%s9223_s17 + $0x3e0] sm:$0xff] }
 0x145   : > { %7791 = vmatpush3.bf16.msra.mxu1 %v8217_v45  ;;  %v8225_v45 = vld [vmem:[#allocation10 + $0xe8] sm:$0xff]  }
 0x149   : > { %1174 = vmatmul.mubr.bf16.gmra.mxu0 %v797_v54  ;;  %v8218_v54 = vld [vmem:[#allocation10 + $0x158] sm:$0xff]  }
 0x14a   : > { %1335 = vmatmul.mubr.bf16.gmra.mxu1 %v799_v55  ;;  %1181 = vmatprep.mubr.bf16.mxu0 %v802_v56  ;;  %v817_v55 = vpack.c.bf16 %v737_v47, %v733_v46  ;;  %v819_v56 = vpack.c.bf16 %v739_v49, %v735_v48  ;;  %v8226_v46 = vld [vmem:[#allocation10 + $0x120] sm:$0xff]   ;;  %v8228_v48 = vld [vmem:[#allocation10 + $0x118] sm:$0xff]  }
 0x14b   : > { %1342 = vmatprep.mubr.bf16.mxu1 %v804_v57  ;;  %7792 = vmatprep.subr.bf16.mxu1 %v8218_v54  ;;  %v822_v57 = vpack.c.bf16 %v746_v51, %v742_v50  ;;  %v8227_v47 = vld [vmem:[#allocation10 + $0xe0] sm:$0xff]   ;;  %v8229_v49 = vld [vmem:[#allocation10 + $0xd8] sm:$0xff]   ;;  %v8230_v50 = vld [vmem:[#allocation10 + $0x110] sm:$0xff]  }
 0x14c   : > { %7793 = vmatpush3.bf16.msra.mxu1 %v8218_v54  ;;  %v8231_v51 = vld [vmem:[#allocation10 + $0xd0] sm:$0xff]   ;;  %v8233_v54 = vld [vmem:[#allocation10 + $0xc8] sm:$0xff]  }
 0x14d   : > { %7794 = vmatprep.subr.bf16.mxu1 %v8219_v59 }
 0x150   : > { %7795 = vmatpush3.bf16.msra.mxu1 %v8219_v59 }
 0x151   : > { %1182 = vmatmul.mubr.bf16.gmra.mxu0 %v801_v2  ;;  %v752_v2 = vld [vmem:[%s9223_s17 + $0x358] sm:$0xff] }
 0x152   : > { %1343 = vmatmul.mubr.bf16.gmra.mxu1 %v803_v3  ;;  %1189 = vmatprep.mubr.bf16.mxu0 %v806_v4  ;;  %v8220_v3 = vld [vmem:[#allocation10 + $0x148] sm:$0xff]   ;;  %v756_v4 = vld [vmem:[%s9223_s17 + $0x378] sm:$0xff] }
 0x153   : > { %1350 = vmatprep.mubr.bf16.mxu1 %v808_v5  ;;  %v8215_v5 = vld [vmem:[#allocation10 + $0x138] sm:$0xff]   ;;  %7796 = vmatprep.subr.bf16.mxu1 %v8220_v3  ;;  %v828_v10 = vpack.c.bf16 %v756_v4, %v752_v2 }
 0x154   : > { %7350 = vmatprep.subr.bf16.mxu0 %v8215_v5  ;;  %7797 = vmatpush3.bf16.msra.mxu1 %v8220_v3  ;;  %v9383_v3 = vld [vmem:[#allocation8] ss:$0 sm:$0xff] }
 0x155   : > { %7351 = vmatpush3.bf16.msra.mxu0 %v8216_v6  ;;  %7798 = vmatprep.subr.bf16.mxu1 %v8223_v11 }
 0x158   : > { %7799 = vmatpush3.bf16.msra.mxu1 %v8223_v11 }
 0x159   : > { %1190 = vmatmul.mubr.bf16.gmra.mxu0 %v805_v14  ;;  %v751_v14 = vld [vmem:[%s9223_s17 + $0x350] sm:$0xff]  ;;  %7486 = vmatprep.subr.bf16.mxu1 %v8234_v52 }
 0x15a   : > { %1351 = vmatmul.mubr.bf16.gmra.mxu1 %v807_v15  ;;  %1197 = vmatprep.mubr.bf16.mxu0 %v810_v16  ;;  %v755_v15 = vld [vmem:[%s9223_s17 + $0x370] sm:$0xff]  ;;  %v758_v16 = vld [vmem:[%s9223_s17 + $0x388] sm:$0xff] }
 0x15b   : > { %1358 = vmatprep.mubr.bf16.mxu1 %v812_v17  ;;  %v762_v17 = vld [vmem:[%s9223_s17 + $0x3a8] sm:$0xff]  ;;  %v827_v21 = vpack.c.bf16 %v755_v15, %v751_v14 }
 0x15c   : > { %v830_v22 = vpack.c.bf16 %v762_v17, %v758_v16  ;;  %v8238_v15 = vld [vmem:[#allocation10 + $0x100] sm:$0xff]  }
 0x161   : > { %1198 = vmatmul.mubr.bf16.gmra.mxu0 %v809_v27  ;;  %v763_v27 = vld [vmem:[%s9223_s17 + $0x3b0] sm:$0xff] }
 0x162   : > { %1359 = vmatmul.mubr.bf16.gmra.mxu1 %v811_v28  ;;  %1205 = vmatprep.mubr.bf16.mxu0 %v814_v29  ;;  %v766_v28 = vld [vmem:[%s9223_s17 + $0x3c8] sm:$0xff]  ;;  %v831_v35 = vpack.c.bf16 %v763_v27, %v759_v26 }
 0x163   : > { %1366 = vmatprep.mubr.bf16.mxu1 %v816_v30  ;;  %v770_v29 = vld [vmem:[%s9223_s17 + $0x3e8] sm:$0xff]  ;;  %v8221_v30 = vld [vmem:[#allocation10 + $0x130] sm:$0xff]  }
 0x164   : > { %7352 = vmatprep.subr.bf16.mxu0 %v8221_v30  ;;  %v834_v36 = vpack.c.bf16 %v770_v29, %v766_v28 }
 0x165   : > { %7353 = vmatpush3.bf16.msra.mxu0 %v8222_v31 }
 0x169   : > { %1206 = vmatmul.mubr.bf16.gmra.mxu0 %v813_v41  ;;  %v771_v41 = vld [vmem:[%s9223_s17 + $0x3f0] sm:$0xff] }
 0x16a   : > { %1367 = vmatmul.mubr.bf16.gmra.mxu1 %v815_v42  ;;  %1213 = vmatprep.mubr.bf16.mxu0 %v818_v43  ;;  %v833_v42 = vpack.c.bf16 %v769_v39, %v765_v38  ;;  %v835_v43 = vpack.c.bf16 %v771_v41, %v767_v40  ;;  %v11827_v38 = vmov 0.0  }
 0x16b   : > { %1374 = vmatprep.mubr.bf16.mxu1 %v820_v44  ;;  %v8224_v44 = vld [vmem:[#allocation10 + $0x128] sm:$0xff]   ;;  %v9398_v39 = vrot.slane %v11827_v38, 7 }
 0x16c   : > { %7354 = vmatprep.subr.bf16.mxu0 %v8224_v44 }
 0x16d   : > { %7355 = vmatpush3.bf16.msra.mxu0 %v8225_v45  ;;  %11978 = vst [vmem:[#allocation34_spill] sm:$0xff] %v9398_v39 }
 0x16e   : > { %7356 = vmatprep.subr.bf16.mxu0 %v8226_v46 }
 0x171   : > { %1214 = vmatmul.mubr.bf16.gmra.mxu0 %v817_v55 }
 0x172   : > { %1375 = vmatmul.mubr.bf16.gmra.mxu1 %v819_v56  ;;  %1221 = vmatprep.mubr.bf16.mxu0 %v822_v57 }
 0x173   : > { %1382 = vmatprep.mubr.bf16.mxu1 %v824_v58  ;;  %7357 = vmatpush3.bf16.msra.mxu0 %v8227_v47 }
 0x174   : > { %7358 = vmatprep.subr.bf16.mxu0 %v8228_v48 }
 0x177   : > { %7359 = vmatpush3.bf16.msra.mxu0 %v8229_v49 }
 0x178   : > { %7360 = vmatprep.subr.bf16.mxu0 %v8230_v50 }
 0x179   : > { %1222 = vmatmul.mubr.bf16.gmra.mxu0 %v821_v7 }
 0x17a   : > { %1383 = vmatmul.mubr.bf16.gmra.mxu1 %v823_v8  ;;  %1229 = vmatprep.mubr.bf16.mxu0 %v826_v9  ;;  %v9386_v9 = vshrl.u32 %v1589_v62, 7 }
 0x17b   : > { %1390 = vmatprep.mubr.bf16.mxu1 %v828_v10  ;;  %7361 = vmatpush3.bf16.msra.mxu0 %v8231_v51 }
 0x17c   : > { %7362 = vmatprep.subr.bf16.mxu0 %v8232_v53  ;;  %11977 = vst [vmem:[#allocation33_spill] sm:$0xff] %v9386_v9  ;;  %v1591_v14 = vadd.s32 8, %v9386_v9  ;;  %vm11870_vm2 = vcmp.lt.s32.totalorder %v9386_v9, 7  ;;  %vm11879_vm3 = vcmp.lt.s32.totalorder %v9386_v9, 1 }
 0x17e   : > { %v1633_v29 = vand.u32 15, %v1591_v14 }
 0x17f   : > { %7363 = vmatpush3.bf16.msra.mxu0 %v8233_v54 }
 0x180   : > { %7364 = vmatprep.subr.bf16.mxu0 %v8238_v15  ;;  %vm9401_vm4 = vcmp.ne.s32.totalorder %v1633_v29, 15 }
 0x181   : > { %1230 = vmatmul.mubr.bf16.gmra.mxu0 %v825_v20  ;;  %vm9438_vm8 = vmpackc.low %vm9401_vm4, %vm11860_vm7 }
 0x182   : > { %1391 = vmatmul.mubr.bf16.gmra.mxu1 %v827_v21  ;;  %1237 = vmatprep.mubr.bf16.mxu0 %v830_v22 }
 0x183   : > { %1398 = vmatprep.mubr.bf16.mxu1 %v832_v23  ;;  %v8248_v23 = vld [vmem:[#allocation10 + $0xb8] sm:$0xff]   ;;  %7365 = vmatpush3.bf16.msra.mxu0 %v8239_v18 }
 0x184   : > { %7832 = vmatprep.subr.bf16.mxu0 %v8248_v23 }
 0x189   : > { %1238 = vmatmul.mubr.bf16.gmra.mxu0 %v829_v34 }
 0x18a   : > { %1399 = vmatmul.mubr.bf16.gmra.mxu1 %v831_v35  ;;  %1245 = vmatprep.mubr.bf16.mxu0 %v834_v36 }
 0x18b   : > { %1406 = vmatprep.mubr.bf16.mxu1 %v836_v37 }
 0x191   : > { %1246 = vmatmul.mubr.bf16.gmra.mxu0 %v833_v42 }
 0x192   : > { %1407 = vmatmul.mubr.bf16.gmra.mxu1 %v835_v43 }
 0x1d9   : > { %v7142_v55 = vpop.f32.mrf.mxu0 }
 0x1da   : > { %v7254_v56 = vpop.f32.mrf.mxu1 }
 0x1db   : > { %v7143_v57 = vpop.f32.mrf.mxu0 }
 0x1dc   : > { %v7144_v58 = vadd.f32 %v7143_v57, %v7142_v55  ;;  %v7255_v59 = vpop.f32.mrf.mxu1 }
 0x1dd   : > { %v7256_v60 = vadd.f32 %v7255_v59, %v7254_v56  ;;  %v7145_v61 = vpop.f32.mrf.mxu0  ;;  %v1593_v56 = vadd.s32 24, %v9386_v9 }
 0x1de   : > { %v7257_v0 = vpop.f32.mrf.mxu1 }
 0x1df   : > { %v1289_v1 = vadd.f32 %v7256_v60, %v7144_v58  ;;  %v7146_v2 = vpop.f32.mrf.mxu0  ;;  %v1647_v15 = vand.u32 15, %v1593_v56 }
 0x1e0   : > { %v7147_v4 = vadd.f32 %v7146_v2, %v7145_v61  ;;  %v7258_v5 = vpop.f32.mrf.mxu1 }
 0x1e1   : > { %v1422_v6 = vmul.f32 %v9381_v63, %v1289_v1  ;;  %v7259_v7 = vadd.f32 %v7258_v5, %v7257_v0  ;;  %v7148_v8 = vpop.f32.mrf.mxu0  ;;  %vm9459_vm10 = vcmp.ne.s32.totalorder %v1647_v15, 15 }
 0x1e2   : > { %v7260_v10 = vpop.f32.mrf.mxu1  ;;  %vm9490_vm12 = vmpackc.low %vm9459_vm10, %vm11860_vm7 }
 0x1e3   : > { %v1461_v11 = vadd.f32 %v9383_v3, %v1422_v6  ;;  %v1292_v12 = vadd.f32 %v7259_v7, %v7147_v4  ;;  %v7149_v13 = vpop.f32.mrf.mxu0 }
 0x1e4   : > { %v7150_v16 = vadd.f32 %v7149_v13, %v7148_v8  ;;  %v7261_v17 = vpop.f32.mrf.mxu1 }
 0x1e5   : > { %v1423_v19 = vmul.f32 %v9381_v63, %v1292_v12  ;;  %v7262_v20 = vadd.f32 %v7261_v17, %v7260_v10  ;;  %v7151_v21 = vpop.f32.mrf.mxu0  ;;  %vm1493_vm0 = vcmp.gt.f32.partialorder %v1461_v11, 0.0  ;;  %v1525_v22 = vmul.f32 0.001, %v1461_v11 }
 0x1e6   : > { %v7263_v24 = vpop.f32.mrf.mxu1 }
 0x1e7   : > { %v1462_v25 = vadd.f32 %v9383_v3, %v1423_v19  ;;  %v1297_v26 = vadd.f32 %v7262_v20, %v7150_v16  ;;  %v7152_v27 = vpop.f32.mrf.mxu0  ;;  %v1557_v28 = vsel %vm1493_vm0, %v1461_v11, %v1525_v22 }
 0x1e8   : > { %v7153_v30 = vadd.f32 %v7152_v27, %v7151_v21  ;;  %v7264_v31 = vpop.f32.mrf.mxu1  ;;  %v9394_v37 = vrot.slane %v1557_v28, 7  ;;  %v9424_v0 = vrot.slane %v1557_v28, 1 }
 0x1e9   : > { %v1424_v32 = vmul.f32 %v9381_v63, %v1297_v26  ;;  %v7265_v33 = vadd.f32 %v7264_v31, %v7263_v24  ;;  %v7154_v34 = vpop.f32.mrf.mxu0  ;;  %vm1494_vm1 = vcmp.gt.f32.partialorder %v1462_v25, 0.0  ;;  %v1526_v35 = vmul.f32 0.001, %v1462_v25 }
 0x1ea   : > { %v7266_v36 = vpop.f32.mrf.mxu1  ;;  %v9419_v57 = vsel %vm11879_vm3, %v9398_v39, %v9394_v37  ;;  %v1595_v24 = vadd.s32 40, %v9386_v9 }
 0x1eb   : > { %v1463_v40 = vadd.f32 %v9383_v3, %v1424_v32  ;;  %v1300_v41 = vadd.f32 %v7265_v33, %v7153_v30  ;;  %v7155_v42 = vpop.f32.mrf.mxu0  ;;  %v1558_v43 = vsel %vm1494_vm1, %v1462_v25, %v1526_v35  ;;  %v8240_v33 = vld [vmem:[#allocation10 + $0x68] sm:$0xff]  }
 0x1ec   : > { %v7156_v45 = vadd.f32 %v7155_v42, %v7154_v34  ;;  %v7267_v46 = vpop.f32.mrf.mxu1  ;;  %v2233_v47 = vrot.slane %v1558_v43, 7  ;;  %v9405_v48 = vpack.c.bf16 %v1558_v43, %v1557_v28  ;;  %v2394_v55 = vrot.slane %v1558_v43, 1 }
 0x1ed   : > { %vm1495_vm5 = vcmp.gt.f32.partialorder %v1463_v40, 0.0  ;;  %v1527_v49 = vmul.f32 0.001, %v1463_v40  ;;  %v1425_v50 = vmul.f32 %v9381_v63, %v1300_v41  ;;  %v7268_v51 = vadd.f32 %v7267_v46, %v7266_v36  ;;  %v7157_v52 = vpop.f32.mrf.mxu0 }
 0x1ee   : > { %v7269_v53 = vpop.f32.mrf.mxu1  ;;  %v9411_v54 = vsel %vm11879_vm3, %v9394_v37, %v2233_v47  ;;  %3113 = vmatprep.mubr.bf16.mxu0 %v9405_v48  ;;  %v2452_v13 = vsel %vm11870_vm2, %v9424_v0, %v2394_v55 }
 0x1ef   : > { %v1559_v58 = vsel %vm1495_vm5, %v1463_v40, %v1527_v49  ;;  %v1464_v59 = vadd.f32 %v9383_v3, %v1425_v50  ;;  %v1305_v60 = vadd.f32 %v7268_v51, %v7156_v45  ;;  %v7158_v61 = vpop.f32.mrf.mxu0 }
 0x1f0   : > { %v7159_v1 = vadd.f32 %v7158_v61, %v7157_v52  ;;  %v7270_v2 = vpop.f32.mrf.mxu1  ;;  %v9426_v4 = vrot.slane %v1559_v58, 1  ;;  %v2234_v5 = vrot.slane %v1559_v58, 7 }
 0x1f1   : > { %vm1496_vm6 = vcmp.gt.f32.partialorder %v1464_v59, 0.0  ;;  %v1528_v6 = vmul.f32 0.001, %v1464_v59  ;;  %v1426_v7 = vmul.f32 %v9381_v63, %v1305_v60  ;;  %v7271_v8 = vadd.f32 %v7270_v2, %v7269_v53  ;;  %v7160_v10 = vpop.f32.mrf.mxu0  ;;  %v8235_v60 = vld [vmem:[#allocation10 + $0x38] sm:$0xff]  }
 0x1f2   : > { %11981 = vst [vmem:[#allocation35_spill] sm:$0xff] %v9426_v4  ;;  %v7272_v11 = vpop.f32.mrf.mxu1  ;;  %v2451_v12 = vsel %vm11870_vm2, %v2394_v55, %v9426_v4  ;;  %v2290_v16 = vsel %vm11879_vm3, %v2233_v47, %v2234_v5  ;;  %v9470_v35 = vsel %vm11879_vm3, %v9398_v39, %v2234_v5  ;;  %v1661_v47 = vand.u32 15, %v1595_v24  ;;  %v8237_v24 = vld [vmem:[#allocation10 + $0x30] sm:$0xff]  }
 0x1f3   : > { %v9444_v17 = vsel %vm1496_vm6, %v1464_v59, %v1528_v6  ;;  %v1465_v18 = vadd.f32 %v9383_v3, %v1426_v7  ;;  %v1308_v19 = vadd.f32 %v7271_v8, %v7159_v1  ;;  %v7161_v20 = vpop.f32.mrf.mxu0  ;;  %v9447_v21 = vpack.c.bf16 %v2451_v12, %v2452_v13  ;;  %11988 = vst [vmem:[#allocation38_spill] sm:$0xff] %v9470_v35  ;;  %v8236_v8 = vld [vmem:[#allocation10 + $0x70] sm:$0xff]  }
 0x1f4   : > { %v7162_v22 = vadd.f32 %v7161_v20, %v7160_v10  ;;  %v7273_v23 = vpop.f32.mrf.mxu1  ;;  %v9451_v25 = vpack.c.bf16 %v9444_v17, %v1559_v58  ;;  %v2235_v26 = vrot.slane %v9444_v17, 7  ;;  %v2396_v31 = vrot.slane %v9444_v17, 1 }
 0x1f5   : > { %11984 = vst [vmem:[#allocation36_spill] sm:$0xff] %v9447_v21  ;;  %vm1497_vm9 = vcmp.gt.f32.partialorder %v1465_v18, 0.0  ;;  %v1529_v27 = vmul.f32 0.001, %v1465_v18  ;;  %v1427_v28 = vmul.f32 %v9381_v63, %v1308_v19  ;;  %v7274_v29 = vadd.f32 %v7273_v23, %v7272_v11  ;;  %7800 = vmatprep.mubr.msk.bf16.mxu1 %vm9438_vm8, %v9447_v21  ;;  %v7163_v30 = vpop.f32.mrf.mxu0 }
 0x1f6   : > { %v7275_v32 = vpop.f32.mrf.mxu1  ;;  %v9465_v34 = vsel %vm11879_vm3, %v2234_v5, %v2235_v26  ;;  %v2450_v56 = vsel %vm11870_vm2, %v9426_v4, %v2396_v31  ;;  %v11989_v59 = vmov 0  ;;  %vm9498_vm13 = vcmp.ne.s32.totalorder %v1661_v47, 15 }
 0x1f7   : > { %11987 = vst [vmem:[#allocation37_spill] sm:$0xff] %v9465_v34  ;;  %v9472_v36 = vsel %vm1497_vm9, %v1465_v18, %v1529_v27  ;;  %v1466_v40 = vadd.f32 %v9383_v3, %v1427_v28  ;;  %v1313_v41 = vadd.f32 %v7274_v29, %v7162_v22  ;;  %v7164_v42 = vpop.f32.mrf.mxu0  ;;  %v9476_v43 = vpack.c.bf16 %v9465_v34, %v2290_v16  ;;  %vm9529_vm0 = vmpackc.low %vm9498_vm13, %vm11860_vm7 }
 0x1f8   : > { %v2397_v44 = vrot.slane %v9472_v36, 1  ;;  %v7165_v45 = vadd.f32 %v7164_v42, %v7163_v30  ;;  %v7276_v46 = vpop.f32.mrf.mxu1  ;;  %v11990_v59 = vsel %vm9490_vm12, 4294967295, %v11989_v59  ;;  %v2236_v61 = vrot.slane %v9472_v36, 7 }
 0x1f9   : > { %vm1498_vm11 = vcmp.gt.f32.partialorder %v1466_v40, 0.0  ;;  %v1530_v50 = vmul.f32 0.001, %v1466_v40  ;;  %v1428_v51 = vmul.f32 %v9381_v63, %v1313_v41  ;;  %v7277_v52 = vadd.f32 %v7276_v46, %v7275_v32  ;;  %v7166_v53 = vpop.f32.mrf.mxu0  ;;  %11991 = vst [vmem:[#allocation39_spill] sm:$0xff] %v11990_v59 }
 0x1fa   : > { %v2449_v55 = vsel %vm11870_vm2, %v2396_v31, %v2397_v44  ;;  %v7278_v58 = vpop.f32.mrf.mxu1  ;;  %v1597_v23 = vadd.s32 56, %v9386_v9  ;;  %v2288_v28 = vsel %vm11879_vm3, %v2235_v26, %v2236_v61 }
 0x1fb   : > { %v1562_v1 = vsel %vm1498_vm11, %v1466_v40, %v1530_v50  ;;  %v1467_v2 = vadd.f32 %v9383_v3, %v1428_v51  ;;  %v1316_v5 = vadd.f32 %v7277_v52, %v7165_v45  ;;  %v7167_v6 = vpop.f32.mrf.mxu0  ;;  %v9496_v7 = vpack.c.bf16 %v2449_v55, %v2450_v56 }
 0x1fc   : > { %v7168_v10 = vadd.f32 %v7167_v6, %v7166_v53  ;;  %v7279_v11 = vpop.f32.mrf.mxu1  ;;  %v9503_v13 = vpack.c.bf16 %v1562_v1, %v9472_v36  ;;  %v2237_v15 = vrot.slane %v1562_v1, 7  ;;  %v2398_v22 = vrot.slane %v1562_v1, 1 }
 0x1fd   : > { %11992 = vst [vmem:[#allocation40_spill] sm:$0xff] %v9496_v7  ;;  %vm1499_vm14 = vcmp.gt.f32.partialorder %v1467_v2, 0.0  ;;  %v1531_v16 = vmul.f32 0.001, %v1467_v2  ;;  %v1429_v17 = vmul.f32 %v9381_v63, %v1316_v5  ;;  %v7280_v18 = vadd.f32 %v7279_v11, %v7278_v58  ;;  %7801 = vmatmul.mubr.msk.bf16.vlgmr.msra.gmra.mxu1 %vm9490_vm12, %v9496_v7  ;;  %v7169_v19 = vpop.f32.mrf.mxu0  ;;  %v8241_v58 = vld [vmem:[#allocation10 + $0x28] sm:$0xff]   ;;  %v9867_v7 = vld [vmem:[#allocation10 + $0x238] sm:$0xff]  }
 0x1fe   : > { %v7281_v20 = vpop.f32.mrf.mxu1  ;;  %7487 = vmatpush3.bf16.msra.mxu1 %v8235_v60  ;;  %v2287_v27 = vsel %vm11879_vm3, %v2236_v61, %v2237_v15  ;;  %v2448_v53 = vsel %vm11870_vm2, %v2397_v44, %v2398_v22  ;;  %v11995_v55 = vmov 0  ;;  %v1675_v56 = vand.u32 15, %v1597_v23  ;;  %v8242_v44 = vld [vmem:[#allocation10 + $0x60] sm:$0xff]  }
 0x1ff   : > { %v9514_v29 = vsel %vm1499_vm14, %v1467_v2, %v1531_v16  ;;  %v1468_v30 = vadd.f32 %v9383_v3, %v1429_v17  ;;  %v1321_v31 = vadd.f32 %v7280_v18, %v7168_v10  ;;  %v7170_v32 = vpop.f32.mrf.mxu0  ;;  %7488 = vmatprep.subr.bf16.mxu1 %v8236_v8  ;;  %v9517_v36 = vpack.c.bf16 %v2287_v27, %v2288_v28 }
 0x200   : > { %v7171_v40 = vadd.f32 %v7170_v32, %v7169_v19  ;;  %v7282_v41 = vpop.f32.mrf.mxu1  ;;  %v2399_v42 = vrot.slane %v9514_v29, 1  ;;  %v2238_v45 = vrot.slane %v9514_v29, 7  ;;  %v11996_v55 = vsel %vm9529_vm0, 4294967295, %v11995_v55  ;;  %v8244_v32 = vld [vmem:[#allocation10 + $0x58] sm:$0xff]  }
 0x201   : > { %vm1500_vm15 = vcmp.gt.f32.partialorder %v1468_v30, 0.0  ;;  %v1532_v46 = vmul.f32 0.001, %v1468_v30  ;;  %v1430_v26 = vmul.f32 %v9381_v63, %v1321_v31  ;;  %v7283_v47 = vadd.f32 %v7282_v41, %v7281_v20  ;;  %v7172_v50 = vpop.f32.mrf.mxu0  ;;  %11997 = vst [vmem:[#allocation41_spill] sm:$0xff] %v11996_v55 }
 0x202   : > { %v7284_v51 = vpop.f32.mrf.mxu1  ;;  %v2447_v52 = vsel %vm11870_vm2, %v2398_v22, %v2399_v42  ;;  %7489 = vmatpush3.bf16.msra.mxu1 %v8237_v24  ;;  %v2286_v60 = vsel %vm11879_vm3, %v2237_v15, %v2238_v45  ;;  %vm9545_vm4 = vcmp.ne.s32.totalorder %v1675_v56, 15  ;;  %v1599_v23 = vadd.s32 72, %v9386_v9  ;;  %v8243_v24 = vld [vmem:[#allocation10 + $0x20] sm:$0xff]  }
 0x203   : > { %v1564_v61 = vsel %vm1500_vm15, %v1468_v30, %v1532_v46  ;;  %v1469_v1 = vadd.f32 %v9383_v3, %v1430_v26  ;;  %v1324_v2 = vadd.f32 %v7283_v47, %v7171_v40  ;;  %v7173_v5 = vpop.f32.mrf.mxu0  ;;  %v9536_v6 = vpack.c.bf16 %v2447_v52, %v2448_v53  ;;  %7490 = vmatprep.subr.bf16.mxu1 %v8240_v33  ;;  %vm9567_vm6 = vmpackc.low %vm9545_vm4, %vm11860_vm7 }
 0x204   : > { %v7174_v8 = vadd.f32 %v7173_v5, %v7172_v50  ;;  %v7285_v10 = vpop.f32.mrf.mxu1  ;;  %v9539_v11 = vpack.c.bf16 %v1564_v61, %v9514_v29  ;;  %v2239_v12 = vrot.slane %v1564_v61, 7  ;;  %v2400_v22 = vrot.slane %v1564_v61, 1  ;;  %v8245_v61 = vld [vmem:[#allocation10 + $0x18] sm:$0xff]  }
 0x205   : > { %11998 = vst [vmem:[#allocation42_spill] sm:$0xff] %v9536_v6  ;;  %vm1501_vm1 = vcmp.gt.f32.partialorder %v1469_v1, 0.0  ;;  %v1533_v16 = vmul.f32 0.001, %v1469_v1  ;;  %v1431_v17 = vmul.f32 %v9381_v63, %v1324_v2  ;;  %v7286_v15 = vadd.f32 %v7285_v10, %v7284_v51  ;;  %7804 = vmatprep.mubr.msk.bf16.mxu1 %vm9529_vm0, %v9536_v6  ;;  %v7175_v18 = vpop.f32.mrf.mxu0 }
 0x206   : > { %v7287_v19 = vpop.f32.mrf.mxu1  ;;  %7491 = vmatpush3.bf16.msra.mxu1 %v8241_v58  ;;  %v2285_v27 = vsel %vm11879_vm3, %v2238_v45, %v2239_v12  ;;  %v2446_v56 = vsel %vm11870_vm2, %v2399_v42, %v2400_v22  ;;  %v12001_v58 = vmov 0  ;;  %v8246_v42 = vld [vmem:[#allocation10 + $0x50] sm:$0xff]  }
 0x207   : > { %v9552_v28 = vsel %vm1501_vm1, %v1469_v1, %v1533_v16  ;;  %v1470_v29 = vadd.f32 %v9383_v3, %v1431_v17  ;;  %v1329_v30 = vadd.f32 %v7286_v15, %v7174_v8  ;;  %v7176_v31 = vpop.f32.mrf.mxu0  ;;  %7492 = vmatprep.subr.bf16.mxu1 %v8242_v44  ;;  %v9555_v33 = vpack.c.bf16 %v2285_v27, %v2286_v60 }
 0x208   : > { %v7177_v40 = vadd.f32 %v7176_v31, %v7175_v18  ;;  %v7288_v41 = vpop.f32.mrf.mxu1  ;;  %v2401_v46 = vrot.slane %v9552_v28, 1  ;;  %v2240_v26 = vrot.slane %v9552_v28, 7  ;;  %v12002_v58 = vsel %vm9567_vm6, 4294967295, %v12001_v58 }
 0x209   : > { %vm1502_vm5 = vcmp.gt.f32.partialorder %v1470_v29, 0.0  ;;  %v1534_v47 = vmul.f32 0.001, %v1470_v29  ;;  %v1432_v45 = vmul.f32 %v9381_v63, %v1329_v30  ;;  %v7289_v50 = vadd.f32 %v7288_v41, %v7287_v19  ;;  %v7178_v51 = vpop.f32.mrf.mxu0  ;;  %12003 = vst [vmem:[#allocation43_spill] sm:$0xff] %v12002_v58 }
 0x20a   : > { %v7290_v52 = vpop.f32.mrf.mxu1  ;;  %v2445_v53 = vsel %vm11870_vm2, %v2400_v22, %v2401_v46  ;;  %v1689_v60 = vand.u32 15, %v1599_v23  ;;  %7493 = vmatpush3.bf16.msra.mxu1 %v8243_v24  ;;  %v2284_v1 = vsel %vm11879_vm3, %v2239_v12, %v2240_v26 }
 0x20b   : > { %v1566_v2 = vsel %vm1502_vm5, %v1470_v29, %v1534_v47  ;;  %v1471_v5 = vadd.f32 %v9383_v3, %v1432_v45  ;;  %v1332_v44 = vadd.f32 %v7289_v50, %v7177_v40  ;;  %v7179_v8 = vpop.f32.mrf.mxu0  ;;  %v9574_v10 = vpack.c.bf16 %v2445_v53, %v2446_v56  ;;  %7494 = vmatprep.subr.bf16.mxu1 %v8244_v32  ;;  %v8247_v29 = vld [vmem:[#allocation10 + $0x10] sm:$0xff]   ;;  %v8249_v47 = vld [vmem:[#allocation10 + $0x48] sm:$0xff]  }
 0x20c   : > { %v7180_v16 = vadd.f32 %v7179_v8, %v7178_v51  ;;  %v7291_v17 = vpop.f32.mrf.mxu1  ;;  %v9577_v15 = vpack.c.bf16 %v1566_v2, %v9552_v28  ;;  %v2241_v18 = vrot.slane %v1566_v2, 7  ;;  %vm9583_vm10 = vcmp.ne.s32.totalorder %v1689_v60, 15 }
 0x20d   : > { %12004 = vst [vmem:[#allocation44_spill] sm:$0xff] %v9574_v10  ;;  %vm1503_vm9 = vcmp.gt.f32.partialorder %v1471_v5, 0.0  ;;  %v1535_v19 = vmul.f32 0.001, %v1471_v5  ;;  %v1433_v20 = vmul.f32 %v9381_v63, %v1332_v44  ;;  %v7292_v12 = vadd.f32 %v7291_v17, %v7290_v52  ;;  %7805 = vmatmul.mubr.msk.bf16.gmra.mxu1 %vm9567_vm6, %v9574_v10  ;;  %v7181_v22 = vpop.f32.mrf.mxu0  ;;  %vm9605_vm13 = vmpackc.low %vm9583_vm10, %vm11860_vm7 }
 0x20e   : > { %v7293_v23 = vpop.f32.mrf.mxu1  ;;  %v2402_v27 = vrot.slane %v1566_v2, 1  ;;  %v1601_v28 = vadd.s32 88, %v9386_v9  ;;  %7495 = vmatpush3.bf16.msra.mxu1 %v8245_v61  ;;  %v2283_v30 = vsel %vm11879_vm3, %v2240_v26, %v2241_v18  ;;  %v12007_v44 = vmov 0 }
 0x20f   : > { %v9590_v31 = vsel %vm1503_vm9, %v1471_v5, %v1535_v19  ;;  %v1472_v32 = vadd.f32 %v9383_v3, %v1433_v20  ;;  %v1337_v40 = vadd.f32 %v7292_v12, %v7180_v16  ;;  %v7182_v41 = vpop.f32.mrf.mxu0  ;;  %7496 = vmatprep.subr.bf16.mxu1 %v8246_v42  ;;  %v9593_v45 = vpack.c.bf16 %v2283_v30, %v2284_v1  ;;  %v8250_v42 = vld [vmem:[#allocation10 + $0x8] sm:$0xff]  }
 0x210   : > { %v7183_v50 = vadd.f32 %v7182_v41, %v7181_v22  ;;  %v7294_v51 = vpop.f32.mrf.mxu1  ;;  %v2403_v52 = vrot.slane %v9590_v31, 1  ;;  %v2242_v53 = vrot.slane %v9590_v31, 7  ;;  %v2444_v1 = vsel %vm11870_vm2, %v2401_v46, %v2402_v27  ;;  %v8251_v46 = vld [vmem:[#allocation10 + $0x40] sm:$0xff]  }
 0x211   : > { %vm1504_vm11 = vcmp.gt.f32.partialorder %v1472_v32, 0.0  ;;  %v1536_v56 = vmul.f32 0.001, %v1472_v32  ;;  %v1434_v26 = vmul.f32 %v9381_v63, %v1337_v40  ;;  %v7295_v60 = vadd.f32 %v7294_v51, %v7293_v23  ;;  %v7184_v61 = vpop.f32.mrf.mxu0 }
 0x212   : > { %v7296_v2 = vpop.f32.mrf.mxu1  ;;  %v2443_v5 = vsel %vm11870_vm2, %v2402_v27, %v2403_v52  ;;  %v12008_v44 = vsel %vm9605_vm13, 4294967295, %v12007_v44  ;;  %v1703_v8 = vand.u32 15, %v1601_v28  ;;  %7497 = vmatpush3.bf16.msra.mxu1 %v8247_v29  ;;  %v2282_v16 = vsel %vm11879_vm3, %v2241_v18, %v2242_v53 }
 0x213   : > { %12009 = vst [vmem:[#allocation45_spill] sm:$0xff] %v12008_v44  ;;  %v1568_v17 = vsel %vm1504_vm11, %v1472_v32, %v1536_v56  ;;  %v1473_v19 = vadd.f32 %v9383_v3, %v1434_v26  ;;  %v1340_v20 = vadd.f32 %v7295_v60, %v7183_v50  ;;  %v7185_v12 = vpop.f32.mrf.mxu0  ;;  %v9612_v22 = vpack.c.bf16 %v2443_v5, %v2444_v1  ;;  %v8252_v50 = vld [vmem:[#allocation10] sm:$0xff]  }
 0x214   : > { %7498 = vmatprep.subr.bf16.mxu1 %v8249_v47  ;;  %v7186_v23 = vadd.f32 %v7185_v12, %v7184_v61  ;;  %v7297_v24 = vpop.f32.mrf.mxu1  ;;  %v9615_v27 = vpack.c.bf16 %v1568_v17, %v9590_v31  ;;  %v2243_v28 = vrot.slane %v1568_v17, 7  ;;  %vm9621_vm15 = vcmp.ne.s32.totalorder %v1703_v8, 15  ;;  %v12146_v14 = vld [vmem:[#allocation44_spill] sm:$0xff] }
 0x215   : > { %12010 = vst [vmem:[#allocation46_spill] sm:$0xff] %v9612_v22  ;;  %vm1505_vm14 = vcmp.gt.f32.partialorder %v1473_v19, 0.0  ;;  %v1537_v29 = vmul.f32 0.001, %v1473_v19  ;;  %v1435_v30 = vmul.f32 %v9381_v63, %v1340_v20  ;;  %v7298_v18 = vadd.f32 %v7297_v24, %v7296_v2  ;;  %7808 = vmatprep.mubr.msk.bf16.mxu1 %vm9605_vm13, %v9612_v22  ;;  %v7187_v32 = vpop.f32.mrf.mxu0  ;;  %vm9639_vm4 = vmpackc.low %vm9621_vm15, %vm11860_vm7 }
 0x216   : > { %v7299_v40 = vpop.f32.mrf.mxu1  ;;  %v2404_v47 = vrot.slane %v1568_v17, 1  ;;  %v1603_v31 = vadd.s32 104, %v9386_v9  ;;  %7499 = vmatpush3.bf16.msra.mxu1 %v8250_v42  ;;  %v2281_v51 = vsel %vm11879_vm3, %v2242_v53, %v2243_v28 }
 0x217   : > { %v1569_v56 = vsel %vm1505_vm14, %v1473_v19, %v1537_v29  ;;  %v1474_v26 = vadd.f32 %v9383_v3, %v1435_v30  ;;  %v1345_v60 = vadd.f32 %v7298_v18, %v7186_v23  ;;  %v7188_v61 = vpop.f32.mrf.mxu0  ;;  %7500 = vmatprep.subr.bf16.mxu1 %v8251_v46  ;;  %v9629_v2 = vpack.c.bf16 %v2281_v51, %v2282_v16 }
 0x218   : > { %v7189_v5 = vadd.f32 %v7188_v61, %v7187_v32  ;;  %v7300_v1 = vpop.f32.mrf.mxu1  ;;  %v2405_v8 = vrot.slane %v1569_v56, 1  ;;  %v2244_v20 = vrot.slane %v1569_v56, 7  ;;  %v2442_v19 = vsel %vm11870_vm2, %v2403_v52, %v2404_v47 }
 0x219   : > { %vm1506_vm1 = vcmp.gt.f32.partialorder %v1474_v26, 0.0  ;;  %v1538_v17 = vmul.f32 0.001, %v1474_v26  ;;  %v1436_v42 = vmul.f32 %v9381_v63, %v1345_v60  ;;  %v7301_v12 = vadd.f32 %v7300_v1, %v7299_v40  ;;  %v7190_v24 = vpop.f32.mrf.mxu0 }
 0x21a   : > { %v7302_v49 = vpop.f32.mrf.mxu1  ;;  %v2441_v53 = vsel %vm11870_vm2, %v2404_v47, %v2405_v8  ;;  %v12013_v16 = vmov 0  ;;  %v1717_v46 = vand.u32 15, %v1603_v31  ;;  %7501 = vmatpush3.bf16.msra.mxu1 %v8252_v50  ;;  %v2280_v23 = vsel %vm11879_vm3, %v2243_v28, %v2244_v20 }
 0x21b   : > { %v12014_v16 = vsel %vm9639_vm4, 4294967295, %v12013_v16  ;;  %v1570_v29 = vsel %vm1506_vm1, %v1474_v26, %v1538_v17  ;;  %v1475_v30 = vadd.f32 %v9383_v3, %v1436_v42  ;;  %v1348_v18 = vadd.f32 %v7301_v12, %v7189_v5  ;;  %v7191_v32 = vpop.f32.mrf.mxu0  ;;  %7880 = vmatprep.subr.bf16.mxu1 %v9867_v7 }
 0x21c   : > { %12015 = vst [vmem:[#allocation47_spill] sm:$0xff] %v12014_v16  ;;  %v9646_v40 = vpack.c.bf16 %v2441_v53, %v2442_v19  ;;  %v7192_v52 = vadd.f32 %v7191_v32, %v7190_v24  ;;  %v7303_v47 = vpop.f32.mrf.mxu1  ;;  %v9648_v51 = vpack.c.bf16 %v1570_v29, %v1569_v56  ;;  %v2245_v41 = vrot.slane %v1570_v29, 7 }
 0x21d   : > { %vm1507_vm5 = vcmp.gt.f32.partialorder %v1475_v30, 0.0  ;;  %v1539_v60 = vmul.f32 0.001, %v1475_v30  ;;  %v1437_v31 = vmul.f32 %v9381_v63, %v1348_v18  ;;  %v7304_v50 = vadd.f32 %v7303_v47, %v7302_v49  ;;  %v7193_v28 = vpop.f32.mrf.mxu0 }
 0x21e   : > { %12016 = vst [vmem:[#allocation48_spill] sm:$0xff] %v9646_v40  ;;  %7809 = vmatmul.mubr.msk.bf16.gmra.mxu1 %vm9639_vm4, %v9646_v40  ;;  %v7305_v26 = vpop.f32.mrf.mxu1  ;;  %vm9654_vm9 = vcmp.ne.s32.totalorder %v1717_v46, 15  ;;  %v2406_v5 = vrot.slane %v1570_v29, 1  ;;  %v1605_v56 = vadd.s32 120, %v9386_v9  ;;  %v2279_v1 = vsel %vm11879_vm3, %v2244_v20, %v2245_v41 }
 0x21f   : > { %v1571_v17 = vsel %vm1507_vm5, %v1475_v30, %v1539_v60  ;;  %v1476_v42 = vadd.f32 %v9383_v3, %v1437_v31  ;;  %v1353_v49 = vadd.f32 %v7304_v50, %v7192_v52  ;;  %v7194_v12 = vpop.f32.mrf.mxu0  ;;  %v9662_v24 = vpack.c.bf16 %v2279_v1, %v2280_v23  ;;  %vm9672_vm11 = vmpackc.low %vm9654_vm9, %vm11860_vm7 }
 0x220   : > { %v7195_v53 = vadd.f32 %v7194_v12, %v7193_v28  ;;  %v7306_v19 = vpop.f32.mrf.mxu1  ;;  %v2407_v18 = vrot.slane %v1571_v17, 1  ;;  %v2246_v46 = vrot.slane %v1571_v17, 7  ;;  %v2440_v30 = vsel %vm11870_vm2, %v2405_v8, %v2406_v5 }
 0x221   : > { %vm1508_vm10 = vcmp.gt.f32.partialorder %v1476_v42, 0.0  ;;  %v1540_v32 = vmul.f32 0.001, %v1476_v42  ;;  %v1438_v29 = vmul.f32 %v9381_v63, %v1353_v49  ;;  %v7307_v47 = vadd.f32 %v7306_v19, %v7305_v26  ;;  %v7196_v62 = vpop.f32.mrf.mxu0 }
 0x222   : > { %v7308_v38 = vpop.f32.mrf.mxu1  ;;  %v2439_v20 = vsel %vm11870_vm2, %v2406_v5, %v2407_v18  ;;  %v12019_v23 = vmov 0  ;;  %v1731_v52 = vand.u32 15, %v1605_v56  ;;  %v2278_v60 = vsel %vm11879_vm3, %v2245_v41, %v2246_v46 }
 0x223   : > { %v12020_v23 = vsel %vm9672_vm11, 4294967295, %v12019_v23  ;;  %v1572_v31 = vsel %vm1508_vm10, %v1476_v42, %v1540_v32  ;;  %v1477_v50 = vadd.f32 %v9383_v3, %v1438_v29  ;;  %v1356_v28 = vadd.f32 %v7307_v47, %v7195_v53  ;;  %v7197_v26 = vpop.f32.mrf.mxu0 }
 0x224   : > { %12021 = vst [vmem:[#allocation49_spill] sm:$0xff] %v12020_v23  ;;  %v9679_v1 = vpack.c.bf16 %v2439_v20, %v2440_v30  ;;  %v7198_v49 = vadd.f32 %v7197_v26, %v7196_v62  ;;  %v7309_v8 = vpop.f32.mrf.mxu1  ;;  %v9681_v5 = vpack.c.bf16 %v1572_v31, %v1571_v17  ;;  %v2247_v61 = vrot.slane %v1572_v31, 7 }
 0x225   : > { %vm1509_vm14 = vcmp.gt.f32.partialorder %v1477_v50, 0.0  ;;  %v1541_v12 = vmul.f32 0.001, %v1477_v50  ;;  %v1439_v19 = vmul.f32 %v9381_v63, %v1356_v28  ;;  %v7310_v56 = vadd.f32 %v7309_v8, %v7308_v38  ;;  %v7199_v41 = vpop.f32.mrf.mxu0 }
 0x226   : > { %12022 = vst [vmem:[#allocation50_spill] sm:$0xff] %v9679_v1  ;;  %7812 = vmatprep.mubr.msk.bf16.mxu1 %vm9672_vm11, %v9679_v1  ;;  %v7311_v42 = vpop.f32.mrf.mxu1  ;;  %vm9687_vm15 = vcmp.ne.s32.totalorder %v1731_v52, 15  ;;  %v2408_v62 = vrot.slane %v1572_v31, 1  ;;  %v1607_v17 = vadd.s32 136, %v9386_v9  ;;  %v2277_v32 = vsel %vm11879_vm3, %v2246_v46, %v2247_v61 }
 0x227   : > { %v1573_v29 = vsel %vm1509_vm14, %v1477_v50, %v1541_v12  ;;  %v1478_v47 = vadd.f32 %v9383_v3, %v1439_v19  ;;  %v1361_v38 = vadd.f32 %v7310_v56, %v7198_v49  ;;  %v7200_v20 = vpop.f32.mrf.mxu0  ;;  %v9695_v30 = vpack.c.bf16 %v2277_v32, %v2278_v60  ;;  %vm9705_vm5 = vmpackc.low %vm9687_vm15, %vm11860_vm7 }
 0x228   : > { %v7201_v28 = vadd.f32 %v7200_v20, %v7199_v41  ;;  %v7312_v26 = vpop.f32.mrf.mxu1  ;;  %v2409_v8 = vrot.slane %v1573_v29, 1  ;;  %v2248_v52 = vrot.slane %v1573_v29, 7  ;;  %v2438_v50 = vsel %vm11870_vm2, %v2407_v18, %v2408_v62 }
 0x229   : > { %vm1510_vm1 = vcmp.gt.f32.partialorder %v1478_v47, 0.0  ;;  %v1542_v35 = vmul.f32 0.001, %v1478_v47  ;;  %v1440_v31 = vmul.f32 %v9381_v63, %v1361_v38  ;;  %v7313_v34 = vadd.f32 %v7312_v26, %v7311_v42  ;;  %v7202_v4 = vpop.f32.mrf.mxu0 }
 0x22a   : > { %v7314_v1 = vpop.f32.mrf.mxu1  ;;  %v2437_v46 = vsel %vm11870_vm2, %v2408_v62, %v2409_v8  ;;  %v12025_v60 = vmov 0  ;;  %v1745_v49 = vand.u32 15, %v1607_v17  ;;  %v2276_v12 = vsel %vm11879_vm3, %v2247_v61, %v2248_v52 }
 0x22b   : > { %v12026_v60 = vsel %vm9705_vm5, 4294967295, %v12025_v60  ;;  %v1574_v19 = vsel %vm1510_vm1, %v1478_v47, %v1542_v35  ;;  %v1479_v56 = vadd.f32 %v9383_v3, %v1440_v31  ;;  %v1364_v41 = vadd.f32 %v7313_v34, %v7201_v28  ;;  %v7203_v42 = vpop.f32.mrf.mxu0 }
 0x22c   : > { %12027 = vst [vmem:[#allocation51_spill] sm:$0xff] %v12026_v60  ;;  %v9712_v32 = vpack.c.bf16 %v2437_v46, %v2438_v50  ;;  %v7204_v38 = vadd.f32 %v7203_v42, %v7202_v4  ;;  %v7315_v18 = vpop.f32.mrf.mxu1  ;;  %v9714_v62 = vpack.c.bf16 %v1574_v19, %v1573_v29  ;;  %v2249_v53 = vrot.slane %v1574_v19, 7 }
 0x22d   : > { %vm1511_vm9 = vcmp.gt.f32.partialorder %v1479_v56, 0.0  ;;  %v1543_v20 = vmul.f32 0.001, %v1479_v56  ;;  %v1441_v26 = vmul.f32 %v9381_v63, %v1364_v41  ;;  %v7316_v17 = vadd.f32 %v7315_v18, %v7314_v1  ;;  %v7205_v35 = vpop.f32.mrf.mxu0 }
 0x22e   : > { %12028 = vst [vmem:[#allocation52_spill] sm:$0xff] %v9712_v32  ;;  %7813 = vmatmul.mubr.msk.bf16.gmra.mxu1 %vm9705_vm5, %v9712_v32  ;;  %v7317_v61 = vpop.f32.mrf.mxu1  ;;  %vm9720_vm10 = vcmp.ne.s32.totalorder %v1745_v49, 15  ;;  %v2410_v4 = vrot.slane %v1574_v19, 1  ;;  %v1609_v29 = vadd.s32 152, %v9386_v9  ;;  %v2275_v47 = vsel %vm11879_vm3, %v2248_v52, %v2249_v53 }
 0x22f   : > { %v1575_v28 = vsel %vm1511_vm9, %v1479_v56, %v1543_v20  ;;  %v1480_v31 = vadd.f32 %v9383_v3, %v1441_v26  ;;  %v1369_v1 = vadd.f32 %v7316_v17, %v7204_v38  ;;  %v7206_v46 = vpop.f32.mrf.mxu0  ;;  %v9728_v50 = vpack.c.bf16 %v2275_v47, %v2276_v12  ;;  %vm9738_vm15 = vmpackc.low %vm9720_vm10, %vm11860_vm7 }
 0x230   : > { %v7207_v41 = vadd.f32 %v7206_v46, %v7205_v35  ;;  %v7318_v42 = vpop.f32.mrf.mxu1  ;;  %v2411_v18 = vrot.slane %v1575_v28, 1  ;;  %v2250_v49 = vrot.slane %v1575_v28, 7  ;;  %v2436_v56 = vsel %vm11870_vm2, %v2409_v8, %v2410_v4 }
 0x231   : > { %vm1512_vm14 = vcmp.gt.f32.partialorder %v1480_v31, 0.0  ;;  %v1544_v32 = vmul.f32 0.001, %v1480_v31  ;;  %v1442_v19 = vmul.f32 %v9381_v63, %v1369_v1  ;;  %v7319_v60 = vadd.f32 %v7318_v42, %v7317_v61  ;;  %v7208_v23 = vpop.f32.mrf.mxu0 }
 0x232   : > { %v7320_v40 = vpop.f32.mrf.mxu1  ;;  %v2435_v52 = vsel %vm11870_vm2, %v2410_v4, %v2411_v18  ;;  %v12031_v12 = vmov 0  ;;  %v1759_v38 = vand.u32 15, %v1609_v29  ;;  %v2274_v20 = vsel %vm11879_vm3, %v2249_v53, %v2250_v49 }
 0x233   : > { %v12032_v12 = vsel %vm9738_vm15, 4294967295, %v12031_v12  ;;  %v1576_v26 = vsel %vm1512_vm14, %v1480_v31, %v1544_v32  ;;  %v1481_v17 = vadd.f32 %v9383_v3, %v1442_v19  ;;  %v1372_v35 = vadd.f32 %v7319_v60, %v7207_v41  ;;  %v7209_v61 = vpop.f32.mrf.mxu0 }
 0x234   : > { %12033 = vst [vmem:[#allocation53_spill] sm:$0xff] %v12032_v12  ;;  %v9745_v47 = vpack.c.bf16 %v2435_v52, %v2436_v56  ;;  %v7210_v1 = vadd.f32 %v7209_v61, %v7208_v23  ;;  %v7321_v8 = vpop.f32.mrf.mxu1  ;;  %v9747_v4 = vpack.c.bf16 %v1576_v26, %v1575_v28  ;;  %v2251_v34 = vrot.slane %v1576_v26, 7 }
 0x235   : > { %vm1513_vm1 = vcmp.gt.f32.partialorder %v1481_v17, 0.0  ;;  %v1545_v46 = vmul.f32 0.001, %v1481_v17  ;;  %v1443_v42 = vmul.f32 %v9381_v63, %v1372_v35  ;;  %v7322_v29 = vadd.f32 %v7321_v8, %v7320_v40  ;;  %v7211_v32 = vpop.f32.mrf.mxu0 }
 0x236   : > { %12034 = vst [vmem:[#allocation54_spill] sm:$0xff] %v9745_v47  ;;  %7816 = vmatprep.mubr.msk.bf16.mxu1 %vm9738_vm15, %v9745_v47  ;;  %v7323_v53 = vpop.f32.mrf.mxu1  ;;  %vm9753_vm9 = vcmp.ne.s32.totalorder %v1759_v38, 15  ;;  %v2412_v23 = vrot.slane %v1576_v26, 1  ;;  %v1611_v28 = vadd.s32 168, %v9386_v9  ;;  %v2273_v31 = vsel %vm11879_vm3, %v2250_v49, %v2251_v34 }
 0x237   : > { %v1577_v41 = vsel %vm1513_vm1, %v1481_v17, %v1545_v46  ;;  %v1482_v19 = vadd.f32 %v9383_v3, %v1443_v42  ;;  %v1377_v40 = vadd.f32 %v7322_v29, %v7210_v1  ;;  %v7212_v52 = vpop.f32.mrf.mxu0  ;;  %v9761_v56 = vpack.c.bf16 %v2273_v31, %v2274_v20  ;;  %vm9771_vm14 = vmpackc.low %vm9753_vm9, %vm11860_vm7 }
 0x238   : > { %v7213_v35 = vadd.f32 %v7212_v52, %v7211_v32  ;;  %v7324_v61 = vpop.f32.mrf.mxu1  ;;  %v2413_v8 = vrot.slane %v1577_v41, 1  ;;  %v2252_v38 = vrot.slane %v1577_v41, 7  ;;  %v2434_v17 = vsel %vm11870_vm2, %v2411_v18, %v2412_v23 }
 0x239   : > { %vm1514_vm10 = vcmp.gt.f32.partialorder %v1482_v19, 0.0  ;;  %v1546_v47 = vmul.f32 0.001, %v1482_v19  ;;  %v1444_v26 = vmul.f32 %v9381_v63, %v1377_v40  ;;  %v7325_v12 = vadd.f32 %v7324_v61, %v7323_v53  ;;  %v7214_v16 = vpop.f32.mrf.mxu0 }
 0x23a   : > { %v7326_v22 = vpop.f32.mrf.mxu1  ;;  %v2433_v49 = vsel %vm11870_vm2, %v2412_v23, %v2413_v8  ;;  %v12037_v20 = vmov 0  ;;  %v1773_v1 = vand.u32 15, %v1611_v28  ;;  %v2272_v46 = vsel %vm11879_vm3, %v2251_v34, %v2252_v38 }
 0x23b   : > { %v12038_v20 = vsel %vm9771_vm14, 4294967295, %v12037_v20  ;;  %v1578_v42 = vsel %vm1514_vm10, %v1482_v19, %v1546_v47  ;;  %v1483_v29 = vadd.f32 %v9383_v3, %v1444_v26  ;;  %v1380_v32 = vadd.f32 %v7325_v12, %v7213_v35  ;;  %v7215_v53 = vpop.f32.mrf.mxu0 }
 0x23c   : > { %12039 = vst [vmem:[#allocation55_spill] sm:$0xff] %v12038_v20  ;;  %v9778_v31 = vpack.c.bf16 %v2433_v49, %v2434_v17  ;;  %v7216_v40 = vadd.f32 %v7215_v53, %v7214_v16  ;;  %v7327_v18 = vpop.f32.mrf.mxu1  ;;  %v1613_v23 = vadd.s32 184, %v9386_v9  ;;  %v9781_v60 = vpack.c.bf16 %v1578_v42, %v1577_v41 }
 0x23d   : > { %v2253_v52 = vrot.slane %v1578_v42, 7  ;;  %vm1515_vm1 = vcmp.gt.f32.partialorder %v1483_v29, 0.0  ;;  %v1547_v61 = vmul.f32 0.001, %v1483_v29  ;;  %v1445_v28 = vmul.f32 %v9381_v63, %v1380_v32  ;;  %v7217_v12 = vpop.f32.mrf.mxu0 }
 0x23e   : > { %12040 = vst [vmem:[#allocation56_spill] sm:$0xff] %v9778_v31  ;;  %12041 = vst [vmem:[#allocation57_spill] sm:$0xff] %v9781_v60  ;;  %v7328_v44 = vadd.f32 %v7327_v18, %v7326_v22  ;;  %7817 = vmatmul.mubr.msk.bf16.gmra.mxu1 %vm9771_vm14, %v9778_v31  ;;  %v7329_v47 = vpop.f32.mrf.mxu1  ;;  %vm9787_vm9 = vcmp.ne.s32.totalorder %v1773_v1, 15  ;;  %v2414_v16 = vrot.slane %v1578_v42, 1  ;;  %v1787_v53 = vand.u32 15, %v1613_v23 }
 0x23f   : > { %v2271_v41 = vsel %vm11879_vm3, %v2252_v38, %v2253_v52  ;;  %v1579_v19 = vsel %vm1515_vm1, %v1483_v29, %v1547_v61  ;;  %v1484_v35 = vadd.f32 %v9383_v3, %v1445_v28  ;;  %v7218_v63 = vpop.f32.mrf.mxu0  ;;  %v9796_v31 = vld [vmem:[#allocation7] ss:$0 sm:$0xff]  ;;  %vm9806_vm1 = vmpackc.low %vm9787_vm9, %vm11860_vm7  ;;  %v9813_v28 = vld [vmem:[#allocation8] ss:$0 sm:$0xff]  ;;  %vm12067_vm14 = vcmp.lt.s32.totalorder %v9386_v9, 1 }
 0x240   : > { %v1385_v26 = vadd.f32 %v7328_v44, %v7216_v40  ;;  %v9794_v22 = vpack.c.bf16 %v2271_v41, %v2272_v46  ;;  %v7219_v49 = vadd.f32 %v7218_v63, %v7217_v12  ;;  %v7330_v17 = vpop.f32.mrf.mxu1  ;;  %v2415_v32 = vrot.slane %v1579_v19, 1 }
 0x241   : > { %v2254_v18 = vrot.slane %v1579_v19, 7  ;;  %vm1516_vm10 = vcmp.gt.f32.partialorder %v1484_v35, 0.0  ;;  %v1548_v1 = vmul.f32 0.001, %v1484_v35  ;;  %v7331_v20 = vadd.f32 %v7330_v17, %v7329_v47  ;;  %v7220_v38 = vpop.f32.mrf.mxu0 }
 0x242   : > { %12044 = vst [vmem:[#allocation58_spill] sm:$0xff] %v9794_v22  ;;  %v1446_v42 = vmul.f32 %v9796_v31, %v1385_v26  ;;  %v7332_v29 = vpop.f32.mrf.mxu1  ;;  %v2431_v3 = vsel %vm11870_vm2, %v2414_v16, %v2415_v32  ;;  %v2432_v44 = vsel %vm11870_vm2, %v2413_v8, %v2414_v16  ;;  %v12045_v46 = vmov 0 }
 0x243   : > { %v12046_v46 = vsel %vm9806_vm1, 4294967295, %v12045_v46  ;;  %v1615_v40 = vadd.s32 200, %v9386_v9  ;;  %v2270_v23 = vsel %vm11879_vm3, %v2253_v52, %v2254_v18  ;;  %v1580_v61 = vsel %vm1516_vm10, %v1484_v35, %v1548_v1  ;;  %v7221_v41 = vpop.f32.mrf.mxu0 }
 0x244   : > { %12047 = vst [vmem:[#allocation59_spill] sm:$0xff] %v12046_v46  ;;  %v1485_v12 = vadd.f32 %v9813_v28, %v1446_v42  ;;  %v1388_v47 = vadd.f32 %v7331_v20, %v7219_v49  ;;  %v9816_v8 = vpack.c.bf16 %v2431_v3, %v2432_v44  ;;  %v7222_v16 = vadd.f32 %v7221_v41, %v7220_v38  ;;  %v7333_v34 = vpop.f32.mrf.mxu1 }
 0x245   : > { %v9818_v26 = vpack.c.bf16 %v1580_v61, %v1579_v19  ;;  %v7334_v10 = vadd.f32 %v7333_v34, %v7332_v29  ;;  %v7223_v52 = vpop.f32.mrf.mxu0  ;;  %vm9824_vm10 = vcmp.ne.s32.totalorder %v1787_v53, 15  ;;  %v2416_v49 = vrot.slane %v1580_v61, 1 }
 0x246   : > { %12048 = vst [vmem:[#allocation60_spill] sm:$0xff] %v9816_v8  ;;  %vm1517_vm9 = vcmp.gt.f32.partialorder %v1485_v12, 0.0  ;;  %v1549_v63 = vmul.f32 0.001, %v1485_v12  ;;  %v1447_v17 = vmul.f32 %v9796_v31, %v1388_v47  ;;  %7820 = vmatprep.mubr.msk.bf16.mxu1 %vm9806_vm1, %v9816_v8  ;;  %v7335_v35 = vpop.f32.mrf.mxu1  ;;  %v2255_v1 = vrot.slane %v1580_v61, 7 }
 0x247   : > { %12049 = vst [vmem:[#allocation61_spill] sm:$0xff] %v9818_v26  ;;  %v1393_v38 = vadd.f32 %v7334_v10, %v7222_v16  ;;  %v7224_v3 = vpop.f32.mrf.mxu0  ;;  %v1801_v44 = vand.u32 15, %v1615_v40  ;;  %v2430_v10 = vsel %vm11870_vm2, %v2415_v32, %v2416_v49  ;;  %v12053_v40 = vmov 0 }
 0x248   : > { %v1581_v42 = vsel %vm1517_vm9, %v1485_v12, %v1549_v63  ;;  %v1486_v19 = vadd.f32 %v9813_v28, %v1447_v17  ;;  %v7225_v29 = vadd.f32 %v7224_v3, %v7223_v52  ;;  %v7336_v41 = vpop.f32.mrf.mxu1  ;;  %v2269_v8 = vsel %vm11879_vm3, %v2254_v18, %v2255_v1 }
 0x249   : > { %v2256_v47 = vrot.slane %v1581_v42, 7  ;;  %v2417_v34 = vrot.slane %v1581_v42, 1  ;;  %v1448_v46 = vmul.f32 %v9796_v31, %v1393_v38  ;;  %v7337_v58 = vadd.f32 %v7336_v41, %v7335_v35  ;;  %v7226_v6 = vpop.f32.mrf.mxu0 }
 0x24a   : > { %vm1518_vm7 = vcmp.gt.f32.partialorder %v1486_v19, 0.0  ;;  %v1550_v53 = vmul.f32 0.001, %v1486_v19  ;;  %v7338_v61 = vpop.f32.mrf.mxu1  ;;  %vm12052_vm9 = vmmov 1   ;;  %v9843_v18 = vpack.c.bf16 %v2269_v8, %v2270_v23 }
 0x24b   : > { %v2429_v12 = vsel %vm11870_vm2, %v2416_v49, %v2417_v34  ;;  %vm9839_vm1 = vmpackc.low %vm9824_vm10, %vm12052_vm9  ;;  %v2268_v16 = vsel %vm11879_vm3, %v2255_v1, %v2256_v47  ;;  %v1487_v17 = vadd.f32 %v9813_v28, %v1448_v46  ;;  %v1396_v52 = vadd.f32 %v7337_v58, %v7225_v29  ;;  %v7227_v35 = vpop.f32.mrf.mxu0 }
 0x24c   : > { %v12054_v40 = vsel %vm9839_vm1, 4294967295, %v12053_v40  ;;  %12056 = vst [vmem:[#allocation63_spill] sm:$0xff] %v9843_v18  ;;  %v1582_v63 = vsel %vm1518_vm7, %v1486_v19, %v1550_v53  ;;  %v9848_v38 = vpack.c.bf16 %v2429_v12, %v2430_v10  ;;  %v7228_v49 = vadd.f32 %v7227_v35, %v7226_v6  ;;  %v7339_v3 = vpop.f32.mrf.mxu1 }
 0x24d   : > { %12055 = vst [vmem:[#allocation62_spill] sm:$0xff] %v12054_v40  ;;  %v2257_v32 = vrot.slane %v1582_v63, 7  ;;  %v9850_v20 = vpack.c.bf16 %v1582_v63, %v1581_v42  ;;  %vm1519_vm10 = vcmp.gt.f32.partialorder %v1487_v17, 0.0  ;;  %v1551_v41 = vmul.f32 0.001, %v1487_v17  ;;  %v7229_v1 = vpop.f32.mrf.mxu0 }
 0x24e   : > { %12057 = vst [vmem:[#allocation64_spill] sm:$0xff] %v9848_v38  ;;  %v1449_v23 = vmul.f32 %v9796_v31, %v1396_v52  ;;  %v7340_v8 = vadd.f32 %v7339_v3, %v7338_v61  ;;  %7821 = vmatmul.mubr.msk.bf16.gmra.mxu1 %vm9839_vm1, %v9848_v38  ;;  %v7341_v46 = vpop.f32.mrf.mxu1  ;;  %vm9856_vm7 = vcmp.ne.s32.totalorder %v1801_v44, 15  ;;  %v2418_v19 = vrot.slane %v1582_v63, 1 }
 0x24f   : > { %12058 = vst [vmem:[#allocation65_spill] sm:$0xff] %v9850_v20  ;;  %v1617_v6 = vadd.s32 216, %v9386_v9  ;;  %v2267_v42 = vsel %vm11879_vm3, %v2256_v47, %v2257_v32  ;;  %v1583_v29 = vsel %vm1519_vm10, %v1487_v17, %v1551_v41  ;;  %v7230_v12 = vpop.f32.mrf.mxu0  ;;  %vm12062_vm10 = vcmp.lt.s32.totalorder %v9386_v9, 7  ;;  %vm9876_vm1 = vmpackc.low %vm9856_vm7, %vm12052_vm9 }
 0x250   : > { %v1488_v53 = vadd.f32 %v9813_v28, %v1449_v23  ;;  %v1401_v61 = vadd.f32 %v7340_v8, %v7228_v49  ;;  %v9864_v10 = vpack.c.bf16 %v2267_v42, %v2268_v16  ;;  %v2258_v52 = vrot.slane %v1583_v29, 7  ;;  %v7342_v3 = vpop.f32.mrf.mxu1  ;;  %vm12063_vm3 = vmmov %vm12062_vm10 }
 0x251   : > { %v7231_v35 = vadd.f32 %v7230_v12, %v7229_v1  ;;  %v2419_v44 = vrot.slane %v1583_v29, 1  ;;  %v7343_v40 = vadd.f32 %v7342_v3, %v7341_v46  ;;  %v7232_v55 = vpop.f32.mrf.mxu0  ;;  %v2428_v16 = vsel %vm12063_vm3, %v2417_v34, %v2418_v19 }
 0x252   : > { %12061 = vst [vmem:[#allocation66_spill] sm:$0xff] %v9864_v10  ;;  %vm1520_vm2 = vcmp.gt.f32.partialorder %v1488_v53, 0.0  ;;  %v1552_v38 = vmul.f32 0.001, %v1488_v53  ;;  %v1450_v63 = vmul.f32 %v9796_v31, %v1401_v61  ;;  %v7344_v47 = vpop.f32.mrf.mxu1  ;;  %v12064_v49 = vmov 0 }
 0x253   : > { %v2427_v17 = vsel %vm12062_vm10, %v2418_v19, %v2419_v44  ;;  %v12065_v49 = vsel %vm9876_vm1, 4294967295, %v12064_v49  ;;  %v1815_v41 = vand.u32 15, %v1617_v6  ;;  %v2266_v23 = vsel %vm12067_vm14, %v2257_v32, %v2258_v52  ;;  %v7233_v42 = vpop.f32.mrf.mxu0 }
 0x254   : > { %12066 = vst [vmem:[#allocation67_spill] sm:$0xff] %v12065_v49  ;;  %v1584_v8 = vsel %vm1520_vm2, %v1488_v53, %v1552_v38  ;;  %v1489_v1 = vadd.f32 %v9813_v28, %v1450_v63  ;;  %v1404_v46 = vadd.f32 %v7343_v40, %v7231_v35  ;;  %v9883_v61 = vpack.c.bf16 %v2427_v17, %v2428_v16  ;;  %v7345_v58 = vpop.f32.mrf.mxu1 }
 0x255   : > { %v2259_v34 = vrot.slane %v1584_v8, 7  ;;  %v7234_v19 = vadd.f32 %v7233_v42, %v7232_v55  ;;  %v1619_v12 = vadd.s32 232, %v9386_v9  ;;  %v9887_v3 = vpack.c.bf16 %v1584_v8, %v1583_v29  ;;  %v7235_v40 = vpop.f32.mrf.mxu0 }
 0x256   : > { %12068 = vst [vmem:[#allocation68_spill] sm:$0xff] %v9883_v61  ;;  %vm1521_vm3 = vcmp.gt.f32.partialorder %v1489_v1, 0.0  ;;  %v1553_v6 = vmul.f32 0.001, %v1489_v1  ;;  %v1451_v32 = vmul.f32 %v9796_v31, %v1404_v46  ;;  %v7346_v38 = vadd.f32 %v7345_v58, %v7344_v47  ;;  %7824 = vmatprep.mubr.msk.bf16.mxu1 %vm9876_vm1, %v9883_v61  ;;  %v7347_v53 = vpop.f32.mrf.mxu1 }
 0x257   : > { %12069 = vst [vmem:[#allocation69_spill] sm:$0xff] %v9887_v3  ;;  %vm9893_vm2 = vcmp.ne.s32.totalorder %v1815_v41, 15  ;;  %v2420_v55 = vrot.slane %v1584_v8, 1  ;;  %v2265_v29 = vsel %vm12067_vm14, %v2258_v52, %v2259_v34  ;;  %v7236_v46 = vpop.f32.mrf.mxu0  ;;  %v1829_v59 = vand.u32 15, %v1619_v12 }
 0x258   : > { %v1585_v63 = vsel %vm1521_vm3, %v1489_v1, %v1553_v6  ;;  %v1490_v17 = vadd.f32 %v9813_v28, %v1451_v32  ;;  %v1409_v16 = vadd.f32 %v7346_v38, %v7234_v19  ;;  %v9900_v47 = vpack.c.bf16 %v2265_v29, %v2266_v23  ;;  %v7348_v61 = vpop.f32.mrf.mxu1  ;;  %vm12073_vm3 = vmmov %vm12062_vm10 }
 0x259   : > { %v2260_v42 = vrot.slane %v1585_v63, 7  ;;  %v7237_v58 = vadd.f32 %v7236_v46, %v7235_v40  ;;  %v2421_v49 = vrot.slane %v1585_v63, 1  ;;  %v7349_v8 = vadd.f32 %v7348_v61, %v7347_v53  ;;  %vm9910_vm14 = vmpackc.low %vm9893_vm2, %vm12052_vm9 }
 0x25a   : > { %12072 = vst [vmem:[#allocation70_spill] sm:$0xff] %v9900_v47  ;;  %vm1522_vm7 = vcmp.gt.f32.partialorder %v1490_v17, 0.0  ;;  %v1554_v41 = vmul.f32 0.001, %v1490_v17  ;;  %v1452_v21 = vmul.f32 %v9796_v31, %v1409_v16  ;;  %v2426_v1 = vsel %vm12073_vm3, %v2419_v44, %v2420_v55 }
 0x25b   : > { %v2425_v52 = vsel %vm12062_vm10, %v2420_v55, %v2421_v49  ;;  %v12074_v23 = vmov 0  ;;  %v1621_v19 = vadd.s32 248, %v9386_v9  ;;  %vm12076_vm1 = vcmp.lt.s32.totalorder %v9386_v9, 1  ;;  %vm12082_vm10 = vmmov %vm12073_vm3 }
 0x25c   : > { %v12075_v23 = vsel %vm9910_vm14, 4294967295, %v12074_v23  ;;  %v2264_v12 = vsel %vm12076_vm1, %v2259_v34, %v2260_v42  ;;  %v1586_v6 = vsel %vm1522_vm7, %v1490_v17, %v1554_v41  ;;  %v1491_v61 = vadd.f32 %v9813_v28, %v1452_v21  ;;  %vm12081_vm7 = vmmov %vm12073_vm3 }
 0x25d   : > { %v1412_v32 = vadd.f32 %v7349_v8, %v7237_v58  ;;  %v9918_v38 = vpack.c.bf16 %v2425_v52, %v2426_v1  ;;  %v2261_v40 = vrot.slane %v1586_v6, 7  ;;  %v12077_v44 = vmov 0.0  }
 0x25e   : > { %v9921_v53 = vrot.slane %v12077_v44, 1  ;;  %v2422_v35 = vrot.slane %v1586_v6, 1  ;;  %v9923_v55 = vpack.c.bf16 %v1586_v6, %v1585_v63  ;;  %vm1523_vm2 = vcmp.gt.f32.partialorder %v1491_v61, 0.0 }
 0x25f   : > { %v1555_v29 = vmul.f32 0.001, %v1491_v61  ;;  %v1453_v16 = vmul.f32 %v9796_v31, %v1412_v32  ;;  %7825 = vmatmul.mubr.msk.bf16.gmra.mxu1 %vm9910_vm14, %v9918_v38  ;;  %vm9929_vm1 = vcmp.ne.s32.totalorder %v1829_v59, 15  ;;  %v1626_v17 = vand.u32 15, %v9386_v9 }
 0x260   : > { %12078 = vst [vmem:[#allocation71_spill] sm:$0xff] %v9923_v55  ;;  %v9935_v34 = vsel %vm12081_vm7, %v2421_v49, %v2422_v35  ;;  %v9940_v63 = vsel %vm12082_vm10, %v2422_v35, %v9921_v53  ;;  %vm12083_vm3 = vcmp.lt.s32.totalorder %v9386_v9, 1  ;;  %v1843_v41 = vand.u32 15, %v1621_v19 }
 0x261   : > { %v2263_v31 = vsel %vm12083_vm3, %v2260_v42, %v2261_v40  ;;  %v1587_v46 = vsel %vm1523_vm2, %v1491_v61, %v1555_v29  ;;  %v1492_v59 = vadd.f32 %v9813_v28, %v1453_v16  ;;  %v1592_v6 = vadd.s32 16, %v9386_v9  ;;  %vm9956_vm2 = vmpackc.low %vm9929_vm1, %vm12052_vm9 }
 0x262   : > { %v2678_v8 = vrot.slane %v1587_v46, 7  ;;  %v2774_v49 = vrot.slane %v1587_v46, 1  ;;  %v9948_v52 = vpack.c.bf16 %v2263_v31, %v2264_v12  ;;  %v12085_v28 = vmov 0 }
 0x263   : > { %vm1524_vm7 = vcmp.gt.f32.partialorder %v1492_v59, 0.0  ;;  %v1556_v1 = vmul.f32 0.001, %v1492_v59  ;;  %v12086_v28 = vsel %vm9956_vm2, 4294967295, %v12085_v28  ;;  %vm2006_vm3 = vcmp.ne.s32.totalorder %v1626_v17, 0 }
 0x264   : > { %12084 = vst [vmem:[#allocation72_spill] sm:$0xff] %v9948_v52  ;;  %v2777_v32 = vsel %vm12082_vm10, %v2422_v35, %v2774_v49  ;;  %vm12087_vm14 = vcmp.lt.s32.totalorder %v9386_v9, 1  ;;  %vm2069_vm15 = vcmp.ne.s32.totalorder %v1843_v41, 15  ;;  %vm9973_vm1 = vmpackc.low %vm12052_vm9, %vm2006_vm3  ;;  %v1640_v21 = vand.u32 15, %v1592_v6  ;;  %v8253_v6 = vld [vmem:[#allocation10 + $0xb0] sm:$0xff]  }
 0x265   : > { %v2681_v42 = vsel %vm12087_vm14, %v2261_v40, %v2678_v8  ;;  %v1588_v19 = vsel %vm1524_vm7, %v1492_v59, %v1556_v1  ;;  %v9963_v12 = vpack.c.bf16 %v2777_v32, %v9935_v34  ;;  %vm12092_vm7 = vmmov %vm12082_vm10 }
 0x266   : > { %v9965_v61 = vrot.slane %v1588_v19, 7  ;;  %v2775_v29 = vrot.slane %v1588_v19, 1  ;;  %v9967_v35 = vpack.c.bf16 %v1588_v19, %v1587_v46  ;;  %vm12093_vm10 = vmmov %vm12092_vm7 }
 0x267   : > { %7828 = vmatprep.mubr.msk.bf16.mxu1 %vm9956_vm2, %v9963_v12  ;;  %vm9989_vm2 = vmpackc.low %vm2069_vm15, %vm12052_vm9  ;;  %vm2008_vm15 = vcmp.ne.s32.totalorder %v1640_v21, 0  ;;  %v8260_v21 = vld [vmem:[#allocation10 + $0x230] sm:$0xff]  }
 0x268   : > { %12088 = vst [vmem:[#allocation73_spill] sm:$0xff] %v9965_v61  ;;  %12089 = vst [vmem:[#allocation74_spill] sm:$0xff] %v9967_v35  ;;  %v2711_v17 = vsel %vm12087_vm14, %v9965_v61, %v9394_v37  ;;  %v9983_v31 = vsel %vm12092_vm7, %v2774_v49, %v2775_v29  ;;  %v2807_v46 = vsel %vm12093_vm10, %v2775_v29, %v9424_v0 }
 0x269   : > { %vm12096_vm3 = vmmov %vm12087_vm14  ;;  %v6749_v1 = vpack.c.bf16 %v9411_v54, %v2711_v17  ;;  %v6842_v37 = vpack.c.bf16 %v2807_v46, %v9983_v31  ;;  %v8254_v17 = vld [vmem:[#allocation10 + $0xa8] sm:$0xff]  }
 0x26a   : > { %v2680_v41 = vsel %vm12096_vm3, %v2678_v8, %v9965_v61  ;;  %vm12098_vm14 = vmmov %vm12092_vm7  ;;  %v8338_v8 = vld [vmem:[#allocation10 + $0xb8] sm:$0xff]  }
 0x26b   : > { %v9998_v49 = vpack.c.bf16 %v2680_v41, %v2681_v42  ;;  %v10003_v32 = vsel %vm12098_vm14, %v2775_v29, %v9921_v53  ;;  %6750 = vmatmul.mubr.msk.bf16.vlgmr.msra.gmra.mxu0 %vm9973_vm1, %v6749_v1  ;;  %7829 = vmatmul.mubr.msk.bf16.gmra.mxu1 %vm9989_vm2, %v6842_v37  ;;  %v11907_v42 = vmov 0.0|0.0   ;;  %v1594_v29 = vadd.s32 32, %v9386_v9  ;;  %vm12099_vm7 = vmmov %vm12096_vm3 }
 0x26c   : > { %7833 = vmatpush3.bf16.msra.mxu0 %v8338_v8  ;;  %3121 = vmatprep.mubr.bf16.mxu0 %v9451_v25  ;;  %v2294_v46 = vsel %vm12099_vm7, %v2261_v40, %v9398_v39  ;;  %vm10018_vm10 = vmpackc.low %vm12052_vm9, %vm2008_vm15  ;;  %v12100_v41 = vmov 0  ;;  %v8255_v8 = vld [vmem:[#allocation10 + $0xa0] sm:$0xff]   ;;  %v1596_v40 = vadd.s32 48, %v9386_v9 }
 0x26d   : > { %12097 = vst [vmem:[#allocation75_spill] sm:$0xff] %v9998_v49  ;;  %3579 = vmatprep.mubr.bf16.mxu1 %v11907_v42  ;;  %7834 = vmatprep.subr.bf16.mxu0 %v8253_v6  ;;  %v12101_v41 = vsel %vm10018_vm10, 4294967295, %v12100_v41  ;;  %v6869_v1 = vpack.c.bf16 %v9398_v39, %v2294_v46  ;;  %v1654_v37 = vand.u32 15, %v1594_v29  ;;  %v8262_v29 = vld [vmem:[#allocation10 + $0x228] sm:$0xff]   ;;  %v12102_v46 = vmov 0 }
 0x26f   : > { %vm2010_vm3 = vcmp.ne.s32.totalorder %v1654_v37, 0  ;;  %v8263_v37 = vld [vmem:[#allocation10 + $0x220] sm:$0xff]  }
 0x270   : > { %7835 = vmatpush3.bf16.msra.mxu0 %v8253_v6  ;;  %v8256_v6 = vld [vmem:[#allocation10 + $0x98] sm:$0xff]   ;;  %vm10033_vm14 = vmpackc.low %vm12052_vm9, %vm2010_vm3 }
 0x271   : > { %7836 = vmatprep.subr.bf16.mxu0 %v8254_v17  ;;  %v12103_v46 = vsel %vm10033_vm14, 4294967295, %v12102_v46 }
 0x273   : > { %6753 = vmatmul.mubr.msk.bf16.gmra.mxu0 %vm10018_vm10, %v9476_v43  ;;  %6870 = vmatmul.mubr.msk.bf16.vlgmr.msra.gmra.mxu1 %vm9973_vm1, %v6869_v1  ;;  %v1668_v1 = vand.u32 15, %v1596_v40  ;;  %v12105_v40 = vmov 0 }
 0x274   : > { %3129 = vmatprep.mubr.bf16.mxu0 %v9503_v13  ;;  %3587 = vmatprep.mubr.bf16.mxu1 %v9405_v48  ;;  %v8257_v48 = vld [vmem:[#allocation10 + $0x90] sm:$0xff]  }
 0x275   : > { %7837 = vmatpush3.bf16.msra.mxu0 %v8254_v17  ;;  %7881 = vmatpush3.bf16.msra.mxu1 %v9867_v7  ;;  %v12104_v7 = vpack.c.bf16 %v9411_v54, %v9419_v57  ;;  %vm2012_vm15 = vcmp.ne.s32.totalorder %v1668_v1, 0  ;;  %v1598_v17 = vadd.s32 64, %v9386_v9  ;;  %v8261_v57 = vld [vmem:[#allocation10 + $0x80] sm:$0xff]   ;;  %v8265_v1 = vld [vmem:[#allocation10 + $0x210] sm:$0xff]  }
 0x276   : > { %7838 = vmatprep.subr.bf16.mxu0 %v8255_v8  ;;  %7882 = vmatprep.subr.bf16.mxu1 %v8260_v21  ;;  %vm10049_vm7 = vmpackc.low %vm12052_vm9, %vm2012_vm15 }
 0x277   : > { %v12106_v40 = vsel %vm10049_vm7, 4294967295, %v12105_v40  ;;  %v1682_v54 = vand.u32 15, %v1598_v17  ;;  %v1602_v17 = vadd.s32 96, %v9386_v9 }
 0x279   : > { %7839 = vmatpush3.bf16.msra.mxu0 %v8255_v8  ;;  %7883 = vmatpush3.bf16.msra.mxu1 %v8260_v21  ;;  %v8258_v8 = vld [vmem:[#allocation10 + $0x88] sm:$0xff]   ;;  %v8264_v21 = vld [vmem:[#allocation10 + $0x218] sm:$0xff]   ;;  %vm2014_vm3 = vcmp.ne.s32.totalorder %v1682_v54, 0  ;;  %v1604_v54 = vadd.s32 112, %v9386_v9 }
 0x27a   : > { %7840 = vmatprep.subr.bf16.mxu0 %v8256_v6  ;;  %7884 = vmatprep.subr.bf16.mxu1 %v8262_v29  ;;  %vm10063_vm15 = vmpackc.low %vm12052_vm9, %vm2014_vm3 }
 0x27b   : > { %6756 = vmatmul.mubr.msk.bf16.gmra.mxu0 %vm10033_vm14, %v9517_v36  ;;  %6873 = vmatmul.mubr.msk.bf16.gmra.mxu1 %vm10018_vm10, %v12104_v7 }
 0x27c   : > { %3137 = vmatprep.mubr.bf16.mxu0 %v9539_v11  ;;  %3595 = vmatprep.mubr.bf16.mxu1 %v9451_v25 }
 0x27d   : > { %7841 = vmatpush3.bf16.msra.mxu0 %v8256_v6  ;;  %7885 = vmatpush3.bf16.msra.mxu1 %v8262_v29  ;;  %v1600_v6 = vadd.s32 80, %v9386_v9  ;;  %v8266_v29 = vld [vmem:[#allocation10 + $0x1f8] sm:$0xff]  }
 0x27e   : > { %7842 = vmatprep.subr.bf16.mxu0 %v8257_v48  ;;  %7886 = vmatprep.subr.bf16.mxu1 %v8263_v37 }
 0x27f   : > { %v1696_v7 = vand.u32 15, %v1600_v6  ;;  %v1606_v6 = vadd.s32 128, %v9386_v9 }
 0x281   : > { %7843 = vmatpush3.bf16.msra.mxu0 %v8257_v48  ;;  %7887 = vmatpush3.bf16.msra.mxu1 %v8263_v37  ;;  %v8268_v48 = vld [vmem:[#allocation10 + $0x208] sm:$0xff]   ;;  %v12107_v37 = vmov 0  ;;  %vm2016_vm3 = vcmp.ne.s32.totalorder %v1696_v7, 0  ;;  %v1608_v7 = vadd.s32 144, %v9386_v9 }
 0x282   : > { %7844 = vmatprep.subr.bf16.mxu0 %v8258_v8  ;;  %7888 = vmatprep.subr.bf16.mxu1 %v8264_v21  ;;  %v12108_v37 = vsel %vm10063_vm15, 4294967295, %v12107_v37 }
 0x283   : > { %6759 = vmatmul.mubr.msk.bf16.gmra.mxu0 %vm10049_vm7, %v9555_v33  ;;  %6876 = vmatmul.mubr.msk.bf16.gmra.mxu1 %vm10033_vm14, %v9476_v43  ;;  %v8269_v43 = vld [vmem:[#allocation10 + $0x200] sm:$0xff]   ;;  %vm10077_vm14 = vmpackc.low %vm12052_vm9, %vm2016_vm3 }
 0x284   : > { %3145 = vmatprep.mubr.bf16.mxu0 %v9577_v15  ;;  %3603 = vmatprep.mubr.bf16.mxu1 %v9503_v13 }
 0x285   : > { %7845 = vmatpush3.bf16.msra.mxu0 %v8258_v8  ;;  %7889 = vmatpush3.bf16.msra.mxu1 %v8264_v21  ;;  %v12109_v8 = vmov 0  ;;  %v1710_v21 = vand.u32 15, %v1602_v17  ;;  %v1752_v17 = vand.u32 15, %v1608_v7 }
 0x286   : > { %7846 = vmatprep.subr.bf16.mxu0 %v8261_v57  ;;  %7890 = vmatprep.subr.bf16.mxu1 %v8265_v1  ;;  %v12110_v8 = vsel %vm10077_vm14, 4294967295, %v12109_v8 }
 0x287   : > { %vm2018_vm3 = vcmp.ne.s32.totalorder %v1710_v21, 0  ;;  %v1610_v21 = vadd.s32 160, %v9386_v9 }
 0x289   : > { %7847 = vmatpush3.bf16.msra.mxu0 %v8261_v57  ;;  %7891 = vmatpush3.bf16.msra.mxu1 %v8265_v1  ;;  %v12111_v57 = vmov 0  ;;  %v1724_v1 = vand.u32 15, %v1604_v54  ;;  %v12118_v54 = vmov 0 }
 0x28a   : > { %7622 = vmatprep.subr.bf16.mxu0 %v8266_v29  ;;  %7892 = vmatprep.subr.bf16.mxu1 %v8268_v48  ;;  %v12113_v29 = vmov 0 }
 0x28b   : > { %6762 = vmatmul.mubr.msk.bf16.gmra.mxu0 %vm10063_vm15, %v9593_v45  ;;  %6879 = vmatmul.mubr.msk.bf16.gmra.mxu1 %vm10049_vm7, %v9517_v36  ;;  %vm10092_vm7 = vmpackc.low %vm12052_vm9, %vm2018_vm3 }
 0x28c   : > { %3153 = vmatprep.mubr.bf16.mxu0 %v9615_v27  ;;  %3611 = vmatprep.mubr.bf16.mxu1 %v9539_v11  ;;  %v12112_v57 = vsel %vm10092_vm7, 4294967295, %v12111_v57 }
 0x28d   : > { %7893 = vmatpush3.bf16.msra.mxu1 %v8268_v48  ;;  %v1738_v48 = vand.u32 15, %v1606_v6  ;;  %v1612_v6 = vadd.s32 176, %v9386_v9 }
 0x28e   : > { %7894 = vmatprep.subr.bf16.mxu1 %v8269_v43 }
 0x28f   : > { %v1780_v7 = vand.u32 15, %v1612_v6  ;;  %v1616_v6 = vadd.s32 208, %v9386_v9 }
 0x291   : > { %7895 = vmatpush3.bf16.msra.mxu1 %v8269_v43  ;;  %v12115_v43 = vmov 0 }
 0x292   : > { %7928 = vmatprep.subr.mxu1 %v12077_v44 }
 0x293   : > { %6765 = vmatmul.mubr.msk.bf16.gmra.mxu0 %vm10077_vm14, %v9629_v2  ;;  %6882 = vmatmul.mubr.msk.bf16.gmra.mxu1 %vm10063_vm15, %v9555_v33  ;;  %vm2020_vm15 = vcmp.ne.s32.totalorder %v1724_v1, 0  ;;  %v1766_v1 = vand.u32 15, %v1610_v21  ;;  %v12124_v21 = vmov 0 }
 0x294   : > { %3161 = vmatprep.mubr.bf16.mxu0 %v9648_v51  ;;  %3619 = vmatprep.mubr.bf16.mxu1 %v9577_v15  ;;  %vm10106_vm3 = vmpackc.low %vm12052_vm9, %vm2020_vm15 }
 0x295   : > { %v12114_v29 = vsel %vm10106_vm3, 4294967295, %v12113_v29 }
 0x29b   : > { %6768 = vmatmul.mubr.msk.bf16.gmra.mxu0 %vm10092_vm7, %v9662_v24  ;;  %6885 = vmatmul.mubr.msk.bf16.gmra.mxu1 %vm10077_vm14, %v9593_v45  ;;  %vm2022_vm14 = vcmp.ne.s32.totalorder %v1738_v48, 0  ;;  %v12121_v48 = vmov 0 }
 0x29c   : > { %3169 = vmatprep.mubr.bf16.mxu0 %v9681_v5  ;;  %3627 = vmatprep.mubr.bf16.mxu1 %v9615_v27  ;;  %vm10120_vm15 = vmpackc.low %vm12052_vm9, %vm2022_vm14 }
 0x29d   : > { %v12116_v43 = vsel %vm10120_vm15, 4294967295, %v12115_v43 }
 0x29e   : > { %12117 = vst [vmem:[#allocation76_spill] sm:$0xff] %v12116_v43  ;;  %v12168_v43 = vld [vmem:[#allocation64_spill] sm:$0xff] }
 0x2a3   : > { %6771 = vmatmul.mubr.msk.bf16.gmra.mxu0 %vm10106_vm3, %v9695_v30  ;;  %6888 = vmatmul.mubr.msk.bf16.gmra.mxu1 %vm10092_vm7, %v9629_v2  ;;  %vm2024_vm7 = vcmp.ne.s32.totalorder %v1752_v17, 0  ;;  %v1614_v17 = vadd.s32 192, %v9386_v9 }
 0x2a4   : > { %3177 = vmatprep.mubr.bf16.mxu0 %v9714_v62  ;;  %3635 = vmatprep.mubr.bf16.mxu1 %v9648_v51  ;;  %vm10134_vm14 = vmpackc.low %vm12052_vm9, %vm2024_vm7 }
 0x2a5   : > { %v12119_v54 = vsel %vm10134_vm14, 4294967295, %v12118_v54 }
 0x2a6   : > { %12120 = vst [vmem:[#allocation77_spill] sm:$0xff] %v12119_v54  ;;  %v8277_v54 = vld [vmem:[#allocation10 + $0x198] sm:$0xff]  }
 0x2ab   : > { %6774 = vmatmul.mubr.msk.bf16.gmra.mxu0 %vm10120_vm15, %v9728_v50  ;;  %6891 = vmatmul.mubr.msk.bf16.gmra.mxu1 %vm10106_vm3, %v9662_v24  ;;  %vm2026_vm3 = vcmp.ne.s32.totalorder %v1766_v1, 0  ;;  %v1794_v1 = vand.u32 15, %v1614_v17  ;;  %v1808_v17 = vand.u32 15, %v1616_v6  ;;  %v12130_v6 = vmov 0 }
 0x2ac   : > { %3185 = vmatprep.mubr.bf16.mxu0 %v9747_v4  ;;  %3643 = vmatprep.mubr.bf16.mxu1 %v9681_v5  ;;  %vm10148_vm7 = vmpackc.low %vm12052_vm9, %vm2026_vm3 }
 0x2ad   : > { %v12122_v48 = vsel %vm10148_vm7, 4294967295, %v12121_v48 }
 0x2ae   : > { %12123 = vst [vmem:[#allocation78_spill] sm:$0xff] %v12122_v48 }
 0x2b3   : > { %6777 = vmatmul.mubr.msk.bf16.gmra.mxu0 %vm10134_vm14, %v9761_v56  ;;  %6894 = vmatmul.mubr.msk.bf16.gmra.mxu1 %vm10120_vm15, %v9695_v30  ;;  %vm2028_vm15 = vcmp.ne.s32.totalorder %v1780_v7, 0  ;;  %v12127_v7 = vmov 0 }
 0x2b4   : > { %3193 = vmatprep.mubr.bf16.mxu0 %v9781_v60  ;;  %3651 = vmatprep.mubr.bf16.mxu1 %v9714_v62  ;;  %vm10162_vm3 = vmpackc.low %vm12052_vm9, %vm2028_vm15 }
 0x2b5   : > { %v12125_v21 = vsel %vm10162_vm3, 4294967295, %v12124_v21 }
 0x2b6   : > { %12126 = vst [vmem:[#allocation79_spill] sm:$0xff] %v12125_v21 }
 0x2bb   : > { %6780 = vmatmul.mubr.msk.bf16.gmra.mxu0 %vm10148_vm7, %v9794_v22  ;;  %6897 = vmatmul.mubr.msk.bf16.gmra.mxu1 %vm10134_vm14, %v9728_v50  ;;  %vm2030_vm14 = vcmp.ne.s32.totalorder %v1794_v1, 0  ;;  %v1618_v1 = vadd.s32 224, %v9386_v9 }
 0x2bc   : > { %3201 = vmatprep.mubr.bf16.mxu0 %v9818_v26  ;;  %3659 = vmatprep.mubr.bf16.mxu1 %v9747_v4  ;;  %vm10176_vm15 = vmpackc.low %vm12052_vm9, %vm2030_vm14 }
 0x2bd   : > { %v12128_v7 = vsel %vm10176_vm15, 4294967295, %v12127_v7  ;;  %v10180_v42 = vpop.f32.mrf.mxu1  ;;  %v1822_v58 = vand.u32 15, %v1618_v1  ;;  %v12133_v1 = vmov 0 }
 0x2be   : > { %12129 = vst [vmem:[#allocation80_spill] sm:$0xff] %v12128_v7  ;;  %v12137_v7 = vmov 0 }
 0x2bf   : > { %v10191_v19 = vpop.f32.mrf.mxu1 }
 0x2c1   : > { %v10198_v44 = vpop.f32.mrf.mxu1 }
 0x2c3   : > { %6783 = vmatmul.mubr.msk.bf16.gmra.mxu0 %vm10162_vm3, %v9843_v18  ;;  %6900 = vmatmul.mubr.msk.bf16.gmra.mxu1 %vm10148_vm7, %v9761_v56  ;;  %vm2032_vm7 = vcmp.ne.s32.totalorder %v1808_v17, 0  ;;  %v1620_v17 = vadd.s32 240, %v9386_v9  ;;  %v10209_v61 = vpop.f32.mrf.mxu1 }
 0x2c4   : > { %3209 = vmatprep.mubr.bf16.mxu0 %v9850_v20  ;;  %3667 = vmatprep.mubr.bf16.mxu1 %v9781_v60  ;;  %vm10194_vm14 = vmpackc.low %vm12052_vm9, %vm2032_vm7  ;;  %v12154_v60 = vld [vmem:[#allocation50_spill] sm:$0xff] }
 0x2c5   : > { %v12131_v6 = vsel %vm10194_vm14, 4294967295, %v12130_v6  ;;  %v1836_v21 = vand.u32 15, %v1620_v17 }
 0x2c6   : > { %12132 = vst [vmem:[#allocation81_spill] sm:$0xff] %v12131_v6 }
 0x2cb   : > { %6786 = vmatmul.mubr.msk.bf16.gmra.mxu0 %vm10176_vm15, %v9864_v10  ;;  %6903 = vmatmul.mubr.msk.bf16.gmra.mxu1 %vm10162_vm3, %v9794_v22  ;;  %vm2034_vm3 = vcmp.ne.s32.totalorder %v1822_v58, 0  ;;  %v12163_v22 = vld [vmem:[#allocation59_spill] sm:$0xff] }
 0x2cc   : > { %3217 = vmatprep.mubr.bf16.mxu0 %v9887_v3  ;;  %3675 = vmatprep.mubr.bf16.mxu1 %v9818_v26  ;;  %vm10212_vm7 = vmpackc.low %vm12052_vm9, %vm2034_vm3  ;;  %vm2036_vm3 = vcmp.ne.s32.totalorder %v1836_v21, 0 }
 0x2cd   : > { %v12134_v1 = vsel %vm10212_vm7, 4294967295, %v12133_v1  ;;  %v10216_v39 = vpop.f32.mrf.mxu1  ;;  %vm10233_vm10 = vmpackc.low %vm12052_vm9, %vm2036_vm3  ;;  %vm12187_vm9 = vnez %v12101_v41  ;;  %vm12191_vm3 = vnez %v12110_v8 }
 0x2ce   : > { %12135 = vst [vmem:[#allocation82_spill] sm:$0xff] %v12134_v1  ;;  %v12138_v7 = vsel %vm10233_vm10, 4294967295, %v12137_v7  ;;  %v8278_v1 = vld [vmem:[#allocation10 + $0x1d0] sm:$0xff]  }
 0x2cf   : > { %v10226_v58 = vpop.f32.mrf.mxu1  ;;  %12139 = vst [vmem:[#allocation83_spill] sm:$0xff] %v12138_v7  ;;  %v8273_v7 = vld [vmem:[#allocation10 + $0x1a8] sm:$0xff]  }
 0x2d3   : > { %6789 = vmatmul.mubr.msk.bf16.gmra.mxu0 %vm10194_vm14, %v9900_v47  ;;  %6906 = vmatmul.mubr.msk.bf16.gmra.mxu1 %vm10176_vm15, %v9843_v18  ;;  %vm12136_vm15 = vcmp.lt.s32.totalorder %v9386_v9, 7 }
 0x2d4   : > { %3225 = vmatprep.mubr.bf16.mxu0 %v9923_v55  ;;  %3683 = vmatprep.mubr.bf16.mxu1 %v9850_v20  ;;  %v2453_v17 = vsel %vm12136_vm15, %v9921_v53, %v9424_v0  ;;  %v10237_v20 = vpop.f32.mrf.mxu1 }
 0x2d5   : > { %v6917_v6 = vpack.c.bf16 %v2453_v17, %v9921_v53 }
 0x2d6   : > { %v10249_v0 = vpop.f32.mrf.mxu1 }
 0x2db   : > { %6792 = vmatmul.mubr.msk.bf16.gmra.mxu0 %vm10212_vm7, %v9948_v52  ;;  %6909 = vmatmul.mubr.msk.bf16.gmra.mxu1 %vm10194_vm14, %v9864_v10  ;;  %v8272_v10 = vld [vmem:[#allocation10 + $0x1e8] sm:$0xff]  }
 0x2dc   : > { %3233 = vmatprep.mubr.bf16.mxu0 %v9967_v35  ;;  %3691 = vmatprep.mubr.bf16.mxu1 %v9887_v3  ;;  %v8267_v35 = vld [vmem:[#allocation10 + $0x1b8] sm:$0xff]   ;;  %v8270_v3 = vld [vmem:[#allocation10 + $0x1f0] sm:$0xff]  }
 0x2de   : > { %v10251_v21 = vpop.f32.mrf.mxu1 }
 0x2e0   : > { %v10253_v17 = vpop.f32.mrf.mxu1 }
 0x2e2   : > { %v10267_v48 = vpop.f32.mrf.mxu1 }
 0x2e3   : > { %6795 = vmatmul.mubr.msk.bf16.gmra.mxu0 %vm10233_vm10, %v9998_v49  ;;  %6912 = vmatmul.mubr.msk.bf16.gmra.mxu1 %vm10212_vm7, %v9900_v47  ;;  %v12140_v49 = vld [vmem:[#allocation36_spill] sm:$0xff] }
 0x2e4   : > { %3699 = vmatprep.mubr.bf16.mxu1 %v9923_v55  ;;  %7848 = vmatprep.mubr.msk.bf16.mxu0 %vm9438_vm8, %v6917_v6  ;;  %v12142_v55 = vld [vmem:[#allocation40_spill] sm:$0xff]  ;;  %v8271_v6 = vld [vmem:[#allocation10 + $0x1b0] sm:$0xff]   ;;  %v10269_v18 = vpop.f32.mrf.mxu1 }
 0x2e5   : > { %v12151_v47 = vld [vmem:[#allocation48_spill] sm:$0xff] }
 0x2eb   : > { %6915 = vmatmul.mubr.msk.bf16.gmra.mxu1 %vm10233_vm10, %v9948_v52  ;;  %7849 = vmatmul.mubr.msk.bf16.vlgmr.msra.gmra.mxu0 %vm9490_vm12, %v12140_v49  ;;  %v8274_v52 = vld [vmem:[#allocation10 + $0x1e0] sm:$0xff]  }
 0x2ec   : > { %7623 = vmatpush3.bf16.msra.mxu0 %v8267_v35  ;;  %7852 = vmatprep.mubr.msk.bf16.mxu0 %vm9529_vm0, %v12142_v55  ;;  %v12144_v35 = vld [vmem:[#allocation42_spill] sm:$0xff]  ;;  %v8282_v49 = vld [vmem:[#allocation10 + $0x1c0] sm:$0xff]  }
 0x2ed   : > { %7896 = vmatprep.mubr.msk.bf16.mxu1 %vm9438_vm8, %v12142_v55  ;;  %7624 = vmatprep.subr.bf16.mxu0 %v8270_v3  ;;  %v8275_v3 = vld [vmem:[#allocation10 + $0x1a0] sm:$0xff]   ;;  %v12157_v55 = vld [vmem:[#allocation53_spill] sm:$0xff] }
 0x2ee   : > { %vm12158_vm8 = vnez %v12157_v55 }
 0x2f0   : > { %7625 = vmatpush3.bf16.msra.mxu0 %v8271_v6  ;;  %v8276_v6 = vld [vmem:[#allocation10 + $0x1d8] sm:$0xff]  }
 0x2f1   : > { %7626 = vmatprep.subr.bf16.mxu0 %v8272_v10  ;;  %v10283_v10 = vpop.f32.mrf.mxu1 }
 0x2f2   : > { %12148 = vst [vmem:[#allocation36_spill] sm:$0xff] %v10283_v10  ;;  %v8281_v10 = vld [vmem:[#allocation10 + $0x188] sm:$0xff]  }
 0x2f3   : > { %7853 = vmatmul.mubr.msk.bf16.gmra.mxu0 %vm9567_vm6, %v12144_v35  ;;  %7897 = vmatmul.mubr.msk.bf16.vlgmr.msra.gmra.mxu1 %vm9490_vm12, %v12144_v35  ;;  %v10285_v26 = vpop.f32.mrf.mxu1  ;;  %v12149_v35 = vld [vmem:[#allocation46_spill] sm:$0xff] }
 0x2f4   : > { %7856 = vmatprep.mubr.msk.bf16.mxu0 %vm9605_vm13, %v12146_v14  ;;  %7900 = vmatprep.mubr.msk.bf16.mxu1 %vm9529_vm0, %v12146_v14  ;;  %vm12164_vm0 = vnez %v12163_v22 }
 0x2f5   : > { %7627 = vmatpush3.bf16.msra.mxu0 %v8273_v7  ;;  %v8279_v7 = vld [vmem:[#allocation10 + $0x190] sm:$0xff]  }
 0x2f6   : > { %7628 = vmatprep.subr.bf16.mxu0 %v8274_v52  ;;  %v10299_v52 = vpop.f32.mrf.mxu1 }
 0x2f9   : > { %7629 = vmatpush3.bf16.msra.mxu0 %v8275_v3  ;;  %v8280_v3 = vld [vmem:[#allocation10 + $0x1c8] sm:$0xff]  }
 0x2fa   : > { %7630 = vmatprep.subr.bf16.mxu0 %v8276_v6  ;;  %v10301_v6 = vpop.f32.mrf.mxu1 }
 0x2fb   : > { %7857 = vmatmul.mubr.msk.bf16.gmra.mxu0 %vm9639_vm4, %v12149_v35  ;;  %7901 = vmatmul.mubr.msk.bf16.gmra.mxu1 %vm9567_vm6, %v12149_v35 }
 0x2fc   : > { %7860 = vmatprep.mubr.msk.bf16.mxu0 %vm9672_vm11, %v12151_v47  ;;  %7904 = vmatprep.mubr.msk.bf16.mxu1 %vm9605_vm13, %v12151_v47 }
 0x2fd   : > { %7631 = vmatpush3.bf16.msra.mxu0 %v8277_v54  ;;  %v12156_v54 = vld [vmem:[#allocation52_spill] sm:$0xff] }
 0x2fe   : > { %7632 = vmatprep.subr.bf16.mxu0 %v8278_v1  ;;  %v10303_v35 = vpop.f32.mrf.mxu1  ;;  %v8283_v1 = vld [vmem:[#allocation10 + $0x180] sm:$0xff]  }
 0x2ff   : > { %12153 = vst [vmem:[#allocation39_spill] sm:$0xff] %v10303_v35  ;;  %v12160_v35 = vld [vmem:[#allocation55_spill] sm:$0xff] }
 0x300   : > { %v10317_v47 = vpop.f32.mrf.mxu1  ;;  %vm12161_vm12 = vnez %v12160_v35 }
 0x301   : > { %7633 = vmatpush3.bf16.msra.mxu0 %v8279_v7 }
 0x302   : > { %7634 = vmatprep.subr.bf16.mxu0 %v8280_v3  ;;  %v10319_v7 = vpop.f32.mrf.mxu1  ;;  %v12159_v3 = vld [vmem:[#allocation54_spill] sm:$0xff] }
 0x303   : > { %7861 = vmatmul.mubr.msk.bf16.gmra.mxu0 %vm9705_vm5, %v12154_v60  ;;  %7905 = vmatmul.mubr.msk.bf16.gmra.mxu1 %vm9639_vm4, %v12154_v60  ;;  %v12162_v60 = vld [vmem:[#allocation56_spill] sm:$0xff]  ;;  %vm12172_vm4 = vnez %v12075_v23 }
 0x304   : > { %7864 = vmatprep.mubr.msk.bf16.mxu0 %vm12158_vm8, %v12156_v54  ;;  %7908 = vmatprep.mubr.msk.bf16.mxu1 %vm9672_vm11, %v12156_v54  ;;  %v12166_v54 = vld [vmem:[#allocation62_spill] sm:$0xff]  ;;  %vm12173_vm11 = vnez %v12086_v28 }
 0x305   : > { %7635 = vmatpush3.bf16.msra.mxu0 %v8281_v10  ;;  %v10333_v10 = vpop.f32.mrf.mxu1  ;;  %vm12167_vm6 = vnez %v12166_v54 }
 0x306   : > { %7636 = vmatprep.subr.bf16.mxu0 %v8282_v49  ;;  %v12165_v49 = vld [vmem:[#allocation60_spill] sm:$0xff] }
 0x309   : > { %7637 = vmatpush3.bf16.msra.mxu0 %v8283_v1  ;;  %v12169_v1 = vld [vmem:[#allocation67_spill] sm:$0xff] }
 0x30a   : > { %vm12170_vm13 = vnez %v12169_v1  ;;  %v12178_v1 = vld [vmem:[#allocation35_spill] sm:$0xff] }
 0x30b   : > { %7865 = vmatmul.mubr.msk.bf16.gmra.mxu0 %vm12161_vm12, %v12159_v3  ;;  %7909 = vmatmul.mubr.msk.bf16.gmra.mxu1 %vm9705_vm5, %v12159_v3  ;;  %vm12179_vm5 = vmmov %vm12136_vm15  ;;  %vm12190_vm15 = vnez %v12108_v37 }
 0x30c   : > { %7868 = vmatprep.mubr.msk.bf16.mxu0 %vm12164_vm0, %v12162_v60  ;;  %7912 = vmatprep.mubr.msk.bf16.mxu1 %vm12158_vm8, %v12162_v60  ;;  %v12171_v60 = vld [vmem:[#allocation68_spill] sm:$0xff]  ;;  %vm12192_vm8 = vnez %v12112_v57 }
 0x30e   : > { %v10335_v14 = vpop.f32.mrf.mxu1 }
 0x310   : > { %v10349_v55 = vpop.f32.mrf.mxu1 }
 0x312   : > { %v10351_v3 = vpop.f32.mrf.mxu1 }
 0x313   : > { %7869 = vmatmul.mubr.msk.bf16.gmra.mxu0 %vm12167_vm6, %v12165_v49  ;;  %7913 = vmatmul.mubr.msk.bf16.gmra.mxu1 %vm12161_vm12, %v12165_v49  ;;  %vm12193_vm12 = vnez %v12114_v29 }
 0x314   : > { %7872 = vmatprep.mubr.msk.bf16.mxu0 %vm12170_vm13, %v12168_v43  ;;  %7916 = vmatprep.mubr.msk.bf16.mxu1 %vm12164_vm0, %v12168_v43  ;;  %v10365_v35 = vpop.f32.mrf.mxu1  ;;  %v12175_v43 = vpack.c.bf16 %v9940_v63, %v9935_v34  ;;  %v4124_v34 = vsel %vm12179_vm5, %v9921_v53, %v12178_v1 }
 0x315   : > { %v7082_v23 = vpack.c.bf16 %v4124_v34, %v9921_v53 }
 0x31b   : > { %7873 = vmatmul.mubr.msk.bf16.gmra.mxu0 %vm12172_vm4, %v12171_v60  ;;  %7917 = vmatmul.mubr.msk.bf16.gmra.mxu1 %vm12167_vm6, %v12171_v60 }
 0x31c   : > { %7876 = vmatprep.mubr.msk.bf16.mxu0 %vm12173_vm11, %v9918_v38  ;;  %7920 = vmatprep.mubr.msk.bf16.mxu1 %vm12170_vm13, %v9918_v38  ;;  %v12176_v38 = vpack.c.bf16 %v10003_v32, %v9983_v31 }
 0x31f   : > { %v10367_v22 = vpop.f32.mrf.mxu1 }
 0x320   : > { %12174 = vst [vmem:[#allocation40_spill] sm:$0xff] %v10367_v22 }
 0x321   : > { %v10369_v49 = vpop.f32.mrf.mxu1 }
 0x323   : > { %7877 = vmatmul.mubr.msk.bf16.gmra.mxu0 %vm9989_vm2, %v12175_v43  ;;  %7921 = vmatmul.mubr.msk.bf16.gmra.mxu1 %vm12172_vm4, %v9963_v12  ;;  %v10385_v54 = vpop.f32.mrf.mxu1  ;;  %v12182_v43 = vld [vmem:[#allocation38_spill] sm:$0xff] }
 0x324   : > { %4430 = vmatprep.mubr.bf16.mxu0 %v9451_v25  ;;  %7924 = vmatprep.mubr.msk.bf16.mxu1 %vm12173_vm11, %v12176_v38  ;;  %12177 = vst [vmem:[#allocation41_spill] sm:$0xff] %v10385_v54  ;;  %v12181_v25 = vld [vmem:[#allocation37_spill] sm:$0xff] }
 0x325   : > { %v10391_v63 = vpop.f32.mrf.mxu1  ;;  %v12183_v31 = vpack.c.bf16 %v12181_v25, %v12182_v43 }
 0x32b   : > { %v7366_v12 = vpop.f32.mrf.mxu0  ;;  %v10394_v60 = vpop.f32.mrf.mxu1  ;;  %6990 = vmatmul.mubr.msk.bf16.vlgmr.msra.gmra.mxu0 %vm9973_vm1, %v12183_v31  ;;  %7925 = vmatmul.mubr.msk.bf16.gmra.mxu1 %vm9989_vm2, %v7082_v23  ;;  %vm12188_vm2 = vnez %v12103_v46  ;;  %vm12189_vm1 = vnez %v12106_v40 }
 0x32c   : > { %12180 = vst [vmem:[#allocation42_spill] sm:$0xff] %v10394_v60  ;;  %4438 = vmatprep.mubr.bf16.mxu0 %v9503_v13 }
 0x32d   : > { %v7367_v28 = vpop.f32.mrf.mxu0  ;;  %v10404_v32 = vpop.f32.mrf.mxu1 }
 0x32e   : > { %12184 = vst [vmem:[#allocation43_spill] sm:$0xff] %v10404_v32  ;;  %v7368_v38 = vadd.f32 %v7367_v28, %v7366_v12 }
 0x32f   : > { %v7369_v1 = vpop.f32.mrf.mxu0  ;;  %v10406_v53 = vpop.f32.mrf.mxu1 }
 0x330   : > { %12185 = vst [vmem:[#allocation44_spill] sm:$0xff] %v10406_v53  ;;  %v3277_v59 = vadd.f32 %v7368_v38, %v10191_v19 }
 0x331   : > { %v7370_v34 = vpop.f32.mrf.mxu0  ;;  %v10408_v60 = vpop.f32.mrf.mxu1 }
 0x332   : > { %12186 = vst [vmem:[#allocation45_spill] sm:$0xff] %v10408_v60  ;;  %v7371_v54 = vadd.f32 %v7370_v34, %v7369_v1 }
 0x333   : > { %v7372_v25 = vpop.f32.mrf.mxu0  ;;  %v7502_v43 = vpop.f32.mrf.mxu1  ;;  %6993 = vmatmul.mubr.msk.bf16.gmra.mxu0 %vm12187_vm9, %v9517_v36 }
 0x334   : > { %4446 = vmatprep.mubr.bf16.mxu0 %v9539_v11  ;;  %v3280_v34 = vadd.f32 %v7371_v54, %v10209_v61 }
 0x335   : > { %v7373_v13 = vpop.f32.mrf.mxu0  ;;  %v7503_v16 = vpop.f32.mrf.mxu1 }
 0x336   : > { %v7374_v23 = vadd.f32 %v7373_v13, %v7372_v25  ;;  %v7504_v12 = vadd.f32 %v7503_v16, %v7502_v43 }
 0x337   : > { %v7375_v31 = vpop.f32.mrf.mxu0  ;;  %v7505_v28 = vpop.f32.mrf.mxu1 }
 0x338   : > { %v10415_v53 = vadd.f32 %v7504_v12, %v3277_v59  ;;  %v3285_v25 = vadd.f32 %v10180_v42, %v7374_v23 }
 0x339   : > { %v7376_v60 = vpop.f32.mrf.mxu0  ;;  %v7506_v1 = vpop.f32.mrf.mxu1 }
 0x33a   : > { %v7377_v32 = vadd.f32 %v7376_v60, %v7375_v31  ;;  %v7507_v22 = vadd.f32 %v7506_v1, %v7505_v28 }
 0x33b   : > { %v7378_v41 = vpop.f32.mrf.mxu0  ;;  %v7508_v36 = vpop.f32.mrf.mxu1  ;;  %6996 = vmatmul.mubr.msk.bf16.gmra.mxu0 %vm12188_vm2, %v9555_v33 }
 0x33c   : > { %4454 = vmatprep.mubr.bf16.mxu0 %v9577_v15  ;;  %v10422_v11 = vadd.f32 %v7507_v22, %v3280_v34  ;;  %v3288_v12 = vadd.f32 %v10198_v44, %v7377_v32 }
 0x33d   : > { %v7379_v19 = vpop.f32.mrf.mxu0  ;;  %v7509_v38 = vpop.f32.mrf.mxu1 }
 0x33e   : > { %v7380_v43 = vadd.f32 %v7379_v19, %v7378_v41  ;;  %v7510_v13 = vadd.f32 %v7509_v38, %v7508_v36 }
 0x33f   : > { %v7381_v16 = vpop.f32.mrf.mxu0  ;;  %v7511_v61 = vpop.f32.mrf.mxu1 }
 0x340   : > { %v10425_v54 = vadd.f32 %v7510_v13, %v3285_v25  ;;  %v3293_v28 = vadd.f32 %v7380_v43, %v10226_v58 }
 0x341   : > { %v7382_v60 = vpop.f32.mrf.mxu0  ;;  %v7512_v59 = vpop.f32.mrf.mxu1 }
 0x342   : > { %v7383_v46 = vadd.f32 %v7382_v60, %v7381_v16  ;;  %v7513_v33 = vadd.f32 %v7512_v59, %v7511_v61 }
 0x343   : > { %v7384_v31 = vpop.f32.mrf.mxu0  ;;  %v7514_v15 = vpop.f32.mrf.mxu1  ;;  %6999 = vmatmul.mubr.msk.bf16.gmra.mxu0 %vm12189_vm1, %v9593_v45 }
 0x344   : > { %4462 = vmatprep.mubr.bf16.mxu0 %v9615_v27  ;;  %v10432_v42 = vadd.f32 %v7513_v33, %v3288_v12  ;;  %v3296_v38 = vadd.f32 %v7383_v46, %v10249_v0 }
 0x345   : > { %v7385_v22 = vpop.f32.mrf.mxu0  ;;  %v7515_v23 = vpop.f32.mrf.mxu1 }
 0x346   : > { %v7386_v1 = vadd.f32 %v7385_v22, %v7384_v31  ;;  %v7516_v34 = vadd.f32 %v7515_v23, %v7514_v15 }
 0x347   : > { %v7387_v41 = vpop.f32.mrf.mxu0  ;;  %v7517_v44 = vpop.f32.mrf.mxu1 }
 0x348   : > { %v10435_v32 = vadd.f32 %v7516_v34, %v3293_v28  ;;  %v3301_v16 = vadd.f32 %v10216_v39, %v7386_v1 }
 0x349   : > { %v7388_v36 = vpop.f32.mrf.mxu0  ;;  %v7518_v19 = vpop.f32.mrf.mxu1 }
 0x34a   : > { %v7389_v40 = vadd.f32 %v7388_v36, %v7387_v41  ;;  %v7519_v45 = vadd.f32 %v7518_v19, %v7517_v44 }
 0x34b   : > { %v7390_v25 = vpop.f32.mrf.mxu0  ;;  %v7520_v27 = vpop.f32.mrf.mxu1  ;;  %7002 = vmatmul.mubr.msk.bf16.gmra.mxu0 %vm12190_vm15, %v9629_v2 }
 0x34c   : > { %4470 = vmatprep.mubr.bf16.mxu0 %v9648_v51  ;;  %v10442_v58 = vadd.f32 %v7519_v45, %v3296_v38  ;;  %v3304_v31 = vadd.f32 %v10237_v20, %v7389_v40 }
 0x34d   : > { %v7391_v43 = vpop.f32.mrf.mxu0  ;;  %v7521_v13 = vpop.f32.mrf.mxu1 }
 0x34e   : > { %v7392_v61 = vadd.f32 %v7391_v43, %v7390_v25  ;;  %v7522_v60 = vadd.f32 %v7521_v13, %v7520_v27 }
 0x34f   : > { %v7393_v59 = vpop.f32.mrf.mxu0  ;;  %v7523_v0 = vpop.f32.mrf.mxu1 }
 0x350   : > { %v10445_v12 = vadd.f32 %v7522_v60, %v3301_v16  ;;  %v3309_v28 = vadd.f32 %v7392_v61, %v10253_v17 }
 0x351   : > { %v7394_v46 = vpop.f32.mrf.mxu0  ;;  %v7524_v33 = vpop.f32.mrf.mxu1 }
 0x352   : > { %v7395_v37 = vadd.f32 %v7394_v46, %v7393_v59  ;;  %v7525_v2 = vadd.f32 %v7524_v33, %v7523_v0 }
 0x353   : > { %v7396_v15 = vpop.f32.mrf.mxu0  ;;  %v7526_v51 = vpop.f32.mrf.mxu1  ;;  %7005 = vmatmul.mubr.msk.bf16.gmra.mxu0 %vm12191_vm3, %v9662_v24 }
 0x354   : > { %4478 = vmatprep.mubr.bf16.mxu0 %v9681_v5  ;;  %v10452_v39 = vadd.f32 %v7525_v2, %v3304_v31  ;;  %v3312_v38 = vadd.f32 %v7395_v37, %v10269_v18 }
 0x355   : > { %v7397_v22 = vpop.f32.mrf.mxu0  ;;  %v7527_v23 = vpop.f32.mrf.mxu1 }
 0x356   : > { %v7398_v1 = vadd.f32 %v7397_v22, %v7396_v15  ;;  %v7528_v34 = vadd.f32 %v7527_v23, %v7526_v51 }
 0x357   : > { %v7399_v41 = vpop.f32.mrf.mxu0  ;;  %v7529_v20 = vpop.f32.mrf.mxu1 }
 0x358   : > { %v10455_v44 = vadd.f32 %v7528_v34, %v3309_v28  ;;  %v3317_v27 = vadd.f32 %v10251_v21, %v7398_v1 }
 0x359   : > { %v7400_v36 = vpop.f32.mrf.mxu0  ;;  %v7530_v19 = vpop.f32.mrf.mxu1 }
 0x35a   : > { %v7401_v8 = vadd.f32 %v7400_v36, %v7399_v41  ;;  %v7531_v24 = vadd.f32 %v7530_v19, %v7529_v20  ;;  %v12194_v41 = vld [vmem:[#allocation76_spill] sm:$0xff]  ;;  %v12196_v20 = vld [vmem:[#allocation57_spill] sm:$0xff] }
 0x35b   : > { %v7402_v40 = vpop.f32.mrf.mxu0  ;;  %v7532_v5 = vpop.f32.mrf.mxu1  ;;  %7008 = vmatmul.mubr.msk.bf16.gmra.mxu0 %vm12192_vm8, %v9695_v30  ;;  %vm12195_vm0 = vnez %v12194_v41 }
 0x35c   : > { %4486 = vmatprep.mubr.bf16.mxu0 %v9714_v62  ;;  %v10462_v17 = vadd.f32 %v7531_v24, %v3312_v38  ;;  %v3320_v0 = vadd.f32 %v10267_v48, %v7401_v8  ;;  %v12197_v38 = vld [vmem:[#allocation36_spill] sm:$0xff] }
 0x35d   : > { %v7403_v45 = vpop.f32.mrf.mxu0  ;;  %v7533_v25 = vpop.f32.mrf.mxu1 }
 0x35e   : > { %v7404_v43 = vadd.f32 %v7403_v45, %v7402_v40  ;;  %v7534_v13 = vadd.f32 %v7533_v25, %v7532_v5 }
 0x35f   : > { %v7405_v16 = vpop.f32.mrf.mxu0  ;;  %v7535_v18 = vpop.f32.mrf.mxu1 }
 0x360   : > { %v10465_v61 = vadd.f32 %v7534_v13, %v3317_v27  ;;  %v3325_v37 = vadd.f32 %v7404_v43, %v10285_v26 }
 0x361   : > { %v7406_v60 = vpop.f32.mrf.mxu0  ;;  %v7536_v59 = vpop.f32.mrf.mxu1 }
 0x362   : > { %v7407_v57 = vadd.f32 %v7406_v60, %v7405_v16  ;;  %v7537_v30 = vadd.f32 %v7536_v59, %v7535_v18  ;;  %v12198_v60 = vld [vmem:[#allocation58_spill] sm:$0xff]  ;;  %v12199_v59 = vld [vmem:[#allocation77_spill] sm:$0xff] }
 0x363   : > { %v7408_v46 = vpop.f32.mrf.mxu0  ;;  %v7538_v62 = vpop.f32.mrf.mxu1  ;;  %7011 = vmatmul.mubr.msk.bf16.gmra.mxu0 %vm12193_vm12, %v9728_v50  ;;  %vm12200_vm6 = vnez %v12199_v59 }
 0x364   : > { %4494 = vmatprep.mubr.bf16.mxu0 %v9747_v4  ;;  %v10472_v21 = vadd.f32 %v7537_v30, %v3320_v0  ;;  %v3328_v1 = vadd.f32 %v7407_v57, %v10301_v6  ;;  %v12201_v0 = vld [vmem:[#allocation61_spill] sm:$0xff] }
 0x365   : > { %v7409_v33 = vpop.f32.mrf.mxu0  ;;  %v7539_v31 = vpop.f32.mrf.mxu1 }
 0x366   : > { %v7410_v2 = vadd.f32 %v7409_v33, %v7408_v46  ;;  %v7540_v15 = vadd.f32 %v7539_v31, %v7538_v62 }
 0x367   : > { %v7411_v51 = vpop.f32.mrf.mxu0  ;;  %v7541_v48 = vpop.f32.mrf.mxu1 }
 0x368   : > { %v10475_v22 = vadd.f32 %v7540_v15, %v3325_v37  ;;  %v3333_v8 = vadd.f32 %v12197_v38, %v7410_v2 }
 0x369   : > { %v7412_v23 = vpop.f32.mrf.mxu0  ;;  %v7542_v28 = vpop.f32.mrf.mxu1 }
 0x36a   : > { %v7413_v29 = vadd.f32 %v7412_v23, %v7411_v51  ;;  %v7543_v50 = vadd.f32 %v7542_v28, %v7541_v48 }
 0x36b   : > { %v7414_v34 = vpop.f32.mrf.mxu0  ;;  %v7544_v4 = vpop.f32.mrf.mxu1  ;;  %7014 = vmatmul.mubr.msk.bf16.gmra.mxu0 %vm12195_vm0, %v9761_v56 }
 0x36c   : > { %4502 = vmatprep.mubr.bf16.mxu0 %v12196_v20  ;;  %v10482_v26 = vadd.f32 %v7543_v50, %v3328_v1  ;;  %v3336_v43 = vadd.f32 %v10299_v52, %v7413_v29  ;;  %v12202_v50 = vld [vmem:[#allocation63_spill] sm:$0xff] }
 0x36d   : > { %v7415_v36 = vpop.f32.mrf.mxu0  ;;  %v7545_v19 = vpop.f32.mrf.mxu1 }
 0x36e   : > { %v7416_v24 = vadd.f32 %v7415_v36, %v7414_v34  ;;  %v7546_v40 = vadd.f32 %v7545_v19, %v7544_v4  ;;  %v12203_v34 = vld [vmem:[#allocation78_spill] sm:$0xff]  ;;  %v12205_v4 = vld [vmem:[#allocation65_spill] sm:$0xff]  ;;  %v12207_v36 = vld [vmem:[#allocation39_spill] sm:$0xff] }
 0x36f   : > { %v7417_v5 = vpop.f32.mrf.mxu0  ;;  %v7547_v6 = vpop.f32.mrf.mxu1  ;;  %vm12204_vm13 = vnez %v12203_v34  ;;  %v12215_v34 = vld [vmem:[#allocation71_spill] sm:$0xff] }
 0x370   : > { %v10485_v45 = vadd.f32 %v7546_v40, %v3333_v8  ;;  %v3341_v62 = vadd.f32 %v7416_v24, %v10317_v47 }
 0x371   : > { %v7418_v25 = vpop.f32.mrf.mxu0  ;;  %v7548_v27 = vpop.f32.mrf.mxu1 }
 0x372   : > { %v7419_v13 = vadd.f32 %v7418_v25, %v7417_v5  ;;  %v7549_v56 = vadd.f32 %v7548_v27, %v7547_v6 }
 0x373   : > { %v7420_v16 = vpop.f32.mrf.mxu0  ;;  %v7550_v18 = vpop.f32.mrf.mxu1  ;;  %7017 = vmatmul.mubr.msk.bf16.gmra.mxu0 %vm12200_vm6, %v12198_v60  ;;  %v12211_v60 = vld [vmem:[#allocation69_spill] sm:$0xff] }
 0x374   : > { %4510 = vmatprep.mubr.bf16.mxu0 %v12201_v0  ;;  %v10492_v57 = vadd.f32 %v7549_v56, %v3336_v43  ;;  %v3344_v48 = vadd.f32 %v7419_v13, %v10333_v10 }
 0x375   : > { %v7421_v30 = vpop.f32.mrf.mxu0  ;;  %v7551_v46 = vpop.f32.mrf.mxu1 }
 0x376   : > { %v7422_v33 = vadd.f32 %v7421_v30, %v7420_v16  ;;  %v7552_v31 = vadd.f32 %v7551_v46, %v7550_v18  ;;  %v12208_v16 = vld [vmem:[#allocation66_spill] sm:$0xff]  ;;  %v12209_v18 = vld [vmem:[#allocation79_spill] sm:$0xff] }
 0x377   : > { %v7423_v37 = vpop.f32.mrf.mxu0  ;;  %v7553_v52 = vpop.f32.mrf.mxu1  ;;  %vm12210_vm4 = vnez %v12209_v18 }
 0x378   : > { %v10495_v2 = vadd.f32 %v7552_v31, %v3341_v62  ;;  %v3349_v19 = vadd.f32 %v12207_v36, %v7422_v33 }
 0x379   : > { %v7424_v15 = vpop.f32.mrf.mxu0  ;;  %v7554_v51 = vpop.f32.mrf.mxu1 }
 0x37a   : > { %v7425_v23 = vadd.f32 %v7424_v15, %v7423_v37  ;;  %v7555_v28 = vadd.f32 %v7554_v51, %v7553_v52 }
 0x37b   : > { %v7426_v1 = vpop.f32.mrf.mxu0  ;;  %v7556_v29 = vpop.f32.mrf.mxu1  ;;  %7020 = vmatmul.mubr.msk.bf16.gmra.mxu0 %vm12204_vm13, %v12202_v50  ;;  %v12213_v50 = vld [vmem:[#allocation80_spill] sm:$0xff] }
 0x37c   : > { %4518 = vmatprep.mubr.bf16.mxu0 %v12205_v4  ;;  %v10502_v47 = vadd.f32 %v7555_v28, %v3344_v48  ;;  %v3352_v25 = vadd.f32 %v10319_v7, %v7425_v23  ;;  %vm12214_vm11 = vnez %v12213_v50 }
 0x37d   : > { %v7427_v41 = vpop.f32.mrf.mxu0  ;;  %v7557_v20 = vpop.f32.mrf.mxu1 }
 0x37e   : > { %12206 = vst [vmem:[#allocation46_spill] sm:$0xff] %v10502_v47  ;;  %v7428_v38 = vadd.f32 %v7427_v41, %v7426_v1  ;;  %v7558_v8 = vadd.f32 %v7557_v20, %v7556_v29  ;;  %v12212_v29 = vld [vmem:[#allocation70_spill] sm:$0xff] }
 0x37f   : > { %v7429_v24 = vpop.f32.mrf.mxu0  ;;  %v7559_v10 = vpop.f32.mrf.mxu1 }
 0x380   : > { %v10505_v40 = vadd.f32 %v7558_v8, %v3349_v19  ;;  %v3357_v46 = vadd.f32 %v7428_v38, %v10349_v55 }
 0x381   : > { %v7430_v5 = vpop.f32.mrf.mxu0  ;;  %v7560_v6 = vpop.f32.mrf.mxu1 }
 0x382   : > { %v7431_v27 = vadd.f32 %v7430_v5, %v7429_v24  ;;  %v7561_v43 = vadd.f32 %v7560_v6, %v7559_v10 }
 0x383   : > { %v7432_v13 = vpop.f32.mrf.mxu0  ;;  %v7562_v56 = vpop.f32.mrf.mxu1  ;;  %7023 = vmatmul.mubr.msk.bf16.gmra.mxu0 %vm12210_vm4, %v12208_v16 }
 0x384   : > { %4526 = vmatprep.mubr.bf16.mxu0 %v12211_v60  ;;  %v10512_v59 = vadd.f32 %v7561_v43, %v3352_v25  ;;  %v3360_v51 = vadd.f32 %v7431_v27, %v10365_v35  ;;  %v12217_v43 = vld [vmem:[#allocation72_spill] sm:$0xff] }
 0x385   : > { %v7433_v0 = vpop.f32.mrf.mxu0  ;;  %v7563_v30 = vpop.f32.mrf.mxu1 }
 0x386   : > { %v7434_v62 = vadd.f32 %v7433_v0, %v7432_v13  ;;  %v7564_v33 = vadd.f32 %v7563_v30, %v7562_v56  ;;  %v12219_v56 = vld [vmem:[#allocation74_spill] sm:$0xff] }
 0x387   : > { %v7435_v31 = vpop.f32.mrf.mxu0  ;;  %v7565_v7 = vpop.f32.mrf.mxu1 }
 0x388   : > { %v10515_v37 = vadd.f32 %v7564_v33, %v3357_v46  ;;  %v3365_v20 = vadd.f32 %v10335_v14, %v7434_v62 }
 0x389   : > { %v7436_v52 = vpop.f32.mrf.mxu0  ;;  %v7566_v15 = vpop.f32.mrf.mxu1 }
 0x38a   : > { %v7437_v48 = vadd.f32 %v7436_v52, %v7435_v31  ;;  %v7567_v23 = vadd.f32 %v7566_v15, %v7565_v7 }
 0x38b   : > { %v7438_v28 = vpop.f32.mrf.mxu0  ;;  %v7568_v1 = vpop.f32.mrf.mxu1  ;;  %7026 = vmatmul.mubr.msk.bf16.gmra.mxu0 %vm12214_vm11, %v12212_v29 }
 0x38c   : > { %4534 = vmatprep.mubr.bf16.mxu0 %v12215_v34  ;;  %v10522_v55 = vadd.f32 %v7567_v23, %v3360_v51  ;;  %v3368_v5 = vadd.f32 %v10351_v3, %v7437_v48  ;;  %v12220_v23 = vld [vmem:[#allocation75_spill] sm:$0xff]  ;;  %v12224_v34 = vld [vmem:[#allocation34_spill] sm:$0xff] }
 0x38d   : > { %v7439_v4 = vpop.f32.mrf.mxu0  ;;  %v7569_v41 = vpop.f32.mrf.mxu1 }
 0x38e   : > { %12216 = vst [vmem:[#allocation47_spill] sm:$0xff] %v10522_v55  ;;  %v7440_v36 = vadd.f32 %v7439_v4, %v7438_v28  ;;  %v7570_v19 = vadd.f32 %v7569_v41, %v7568_v1  ;;  %v12222_v1 = vmov 0.0|0.0   ;;  %v12225_v4 = vld [vmem:[#allocation73_spill] sm:$0xff] }
 0x38f   : > { %v7441_v38 = vpop.f32.mrf.mxu0  ;;  %v7571_v35 = vpop.f32.mrf.mxu1  ;;  %v12231_v28 = vld [vmem:[#allocation45_spill] sm:$0xff] }
 0x390   : > { %v10525_v8 = vadd.f32 %v7570_v19, %v3365_v20  ;;  %v3373_v60 = vadd.f32 %v7440_v36, %v10369_v49  ;;  %v12227_v20 = vld [vmem:[#allocation40_spill] sm:$0xff] }
 0x391   : > { %v7442_v24 = vpop.f32.mrf.mxu0  ;;  %v7572_v10 = vpop.f32.mrf.mxu1 }
 0x392   : > { %v7573_v6 = vadd.f32 %v7572_v10, %v7571_v35  ;;  %v7443_v0 = vadd.f32 %v7442_v24, %v7441_v38 }
 0x393   : > { %v7444_v25 = vpop.f32.mrf.mxu0  ;;  %v7574_v27 = vpop.f32.mrf.mxu1  ;;  %7029 = vmatmul.mubr.msk.bf16.gmra.mxu0 %vm10194_vm14, %v12217_v43  ;;  %vm12226_vm14 = vcmp.lt.s32.totalorder %v9386_v9, 1  ;;  %v4967_v9 = vld [vmem:[%s12240_s3 + $0x10] sm:$0xff] }
 0x394   : > { %4542 = vmatprep.mubr.bf16.mxu0 %v12219_v56  ;;  %v10532_v14 = vadd.f32 %v7573_v6, %v3368_v5  ;;  %v3376_v52 = vadd.f32 %v7443_v0, %v10391_v63  ;;  %v3998_v41 = vsel %vm12226_vm14, %v12225_v4, %v12224_v34 }
 0x395   : > { %v7445_v16 = vpop.f32.mrf.mxu0  ;;  %v7575_v18 = vpop.f32.mrf.mxu1 }
 0x396   : > { %v7446_v30 = vadd.f32 %v7445_v16, %v7444_v25  ;;  %v7576_v46 = vadd.f32 %v7575_v18, %v7574_v27  ;;  %v7034_v25 = vpack.c.bf16 %v12224_v34, %v3998_v41  ;;  %v12228_v27 = vld [vmem:[#allocation41_spill] sm:$0xff] }
 0x397   : > { %v7447_v62 = vpop.f32.mrf.mxu0  ;;  %v7577_v3 = vpop.f32.mrf.mxu1 }
 0x398   : > { %v10535_v33 = vadd.f32 %v7576_v46, %v3373_v60  ;;  %v3381_v63 = vadd.f32 %v12227_v20, %v7446_v30  ;;  %v12230_v46 = vld [vmem:[#allocation43_spill] sm:$0xff] }
 0x399   : > { %v7448_v31 = vpop.f32.mrf.mxu0  ;;  %v7578_v7 = vpop.f32.mrf.mxu1 }
 0x39a   : > { %v7579_v15 = vadd.f32 %v7578_v7, %v7577_v3  ;;  %v7449_v36 = vadd.f32 %v7448_v31, %v7447_v62 }
 0x39b   : > { %v7450_v51 = vpop.f32.mrf.mxu0  ;;  %v7580_v48 = vpop.f32.mrf.mxu1  ;;  %7032 = vmatmul.mubr.msk.bf16.gmra.mxu0 %vm10212_vm7, %v12220_v23 }
 0x39c   : > { %4550 = vmatprep.mubr.bf16.mxu0 %v12222_v1  ;;  %v10542_v49 = vadd.f32 %v7579_v15, %v3376_v52  ;;  %v3384_v43 = vadd.f32 %v12228_v27, %v7449_v36  ;;  %v12233_v36 = vld [vmem:[#allocation42_spill] sm:$0xff] }
 0x39d   : > { %v7451_v29 = vpop.f32.mrf.mxu0  ;;  %v7581_v50 = vpop.f32.mrf.mxu1 }
 0x39e   : > { %12223 = vst [vmem:[#allocation48_spill] sm:$0xff] %v10542_v49  ;;  %v7452_v19 = vadd.f32 %v7451_v29, %v7450_v51  ;;  %v7582_v38 = vadd.f32 %v7581_v50, %v7580_v48 }
 0x39f   : > { %v7453_v35 = vpop.f32.mrf.mxu0  ;;  %v7583_v24 = vpop.f32.mrf.mxu1 }
 0x3a0   : > { %v10549_v10 = vadd.f32 %v7582_v38, %v3381_v63  ;;  %v3389_v62 = vadd.f32 %v7452_v19, %v12230_v46 }
 0x3a1   : > { %v7454_v5 = vpop.f32.mrf.mxu0  ;;  %v7584_v6 = vpop.f32.mrf.mxu1 }
 0x3a2   : > { %v7585_v13 = vadd.f32 %v7584_v6, %v7583_v24  ;;  %v7455_v3 = vadd.f32 %v7454_v5, %v7453_v35 }
 0x3a3   : > { %v7456_v56 = vpop.f32.mrf.mxu0  ;;  %v7586_v16 = vpop.f32.mrf.mxu1  ;;  %7035 = vmatmul.mubr.msk.bf16.gmra.mxu0 %vm10233_vm10, %v7034_v25  ;;  %vm8921_vm10 = vmmov 0  }
 0x3a4   : > { %v10555_v60 = vadd.f32 %v7585_v13, %v3384_v43  ;;  %v3392_v1 = vadd.f32 %v7455_v3, %v12231_v28 }
 0x3a5   : > { %v7457_v0 = vpop.f32.mrf.mxu0  ;;  %v7587_v30 = vpop.f32.mrf.mxu1 }
 0x3a6   : > { %v7458_v31 = vadd.f32 %v7457_v0, %v7456_v56  ;;  %v7588_v7 = vadd.f32 %v7587_v30, %v7586_v16 }
 0x3a7   : > { %v7459_v52 = vpop.f32.mrf.mxu0  ;;  %v7589_v15 = vpop.f32.mrf.mxu1 }
 0x3a8   : > { %v10558_v51 = vadd.f32 %v7588_v7, %v3389_v62  ;;  %v3397_v19 = vadd.f32 %v12233_v36, %v7458_v31 }
 0x3a9   : > { %v7460_v48 = vpop.f32.mrf.mxu0  ;;  %v7590_v23 = vpop.f32.mrf.mxu1 }
 0x3aa   : > { %v7591_v29 = vadd.f32 %v7590_v23, %v7589_v15  ;;  %v7461_v38 = vadd.f32 %v7460_v48, %v7459_v52 }
 0x3ab   : > { %v7592_v50 = vpop.f32.mrf.mxu1  ;;  %v7850_v34 = vpop.f32.mrf.mxu0 }
 0x3ac   : > { %v10561_v4 = vadd.f32 %v7591_v29, %v3392_v1  ;;  %v10564_v41 = vadd.f32 %v7850_v34, %v10425_v54  ;;  %v12234_v54 = vld [vmem:[#allocation44_spill] sm:$0xff] }
 0x3ad   : > { %v7593_v20 = vpop.f32.mrf.mxu1  ;;  %v3742_v63 = vpop.f32.mrf.mxu0  ;;  %v3400_v56 = vadd.f32 %v12234_v54, %v7461_v38  ;;  %v12242_v38 = vmov 0.0  }
 0x3ae   : > { %12232 = vst [vmem:[#allocation49_spill] sm:$0xff] %v10561_v4  ;;  %v7594_v35 = vadd.f32 %v7593_v20, %v7592_v50  ;;  %v10568_v24 = vadd.f32 %v3742_v63, %v10415_v53  ;;  %7960 = vmatprep.mubr.msk.f32.mxu1 %vm8921_vm10, %v12242_v38 }
 0x3af   : > { %v7595_v5 = vpop.f32.mrf.mxu1  ;;  %v7851_v6 = vpop.f32.mrf.mxu0 }
 0x3b0   : > { %v10571_v25 = vadd.f32 %v7851_v6, %v10432_v42  ;;  %v3702_v27 = vadd.f32 %v7594_v35, %v3397_v19 }
 0x3b1   : > { %v7596_v43 = vpop.f32.mrf.mxu1  ;;  %v10573_v13 = vpop.f32.mrf.mxu0 }
 0x3b2   : > { %v7597_v16 = vadd.f32 %v7596_v43, %v7595_v5  ;;  %v4978_v43 = vld [vmem:[%s12240_s3 + $0x68] sm:$0xff] }
 0x3b3   : > { %v7854_v18 = vpop.f32.mrf.mxu0 }
 0x3b4   : > { %v10577_v0 = vadd.f32 %v7854_v18, %v10445_v12  ;;  %v10579_v30 = vadd.f32 %v7597_v16, %v3400_v56  ;;  %v4977_v16 = vld [vmem:[%s12240_s3 + $0x60] sm:$0xff] }
 0x3b5   : > { %v3758_v53 = vpop.f32.mrf.mxu0 }
 0x3b6   : > { %v10582_v46 = vadd.f32 %v3758_v53, %v10435_v32 }
 0x3b7   : > { %v7855_v62 = vpop.f32.mrf.mxu0 }
 0x3b8   : > { %v10585_v42 = vadd.f32 %v7855_v62, %v10452_v39  ;;  %v4976_v62 = vld [vmem:[%s12240_s3 + $0x58] sm:$0xff] }
 0x3b9   : > { %v10587_v3 = vpop.f32.mrf.mxu0 }
 0x3bb   : > { %v7858_v31 = vpop.f32.mrf.mxu0 }
 0x3bc   : > { %v10590_v7 = vadd.f32 %v7858_v31, %v10465_v61 }
 0x3bd   : > { %v3774_v52 = vpop.f32.mrf.mxu0 }
 0x3be   : > { %v10593_v12 = vadd.f32 %v3774_v52, %v10455_v44 }
 0x3bf   : > { %v7859_v15 = vpop.f32.mrf.mxu0 }
 0x3c0   : > { %v10596_v48 = vadd.f32 %v7859_v15, %v10472_v21 }
 0x3c1   : > { %v10598_v32 = vpop.f32.mrf.mxu0 }
 0x3c3   : > { %v7862_v23 = vpop.f32.mrf.mxu0 }
 0x3c4   : > { %v10601_v39 = vadd.f32 %v7862_v23, %v10485_v45  ;;  %v4975_v23 = vld [vmem:[%s12240_s3 + $0x50] sm:$0xff] }
 0x3c5   : > { %v3790_v28 = vpop.f32.mrf.mxu0 }
 0x3c6   : > { %v10604_v1 = vadd.f32 %v3790_v28, %v10475_v22 }
 0x3c7   : > { %v7863_v61 = vpop.f32.mrf.mxu0 }
 0x3c8   : > { %v10607_v29 = vadd.f32 %v7863_v61, %v10492_v57  ;;  %v4980_v57 = vld [vmem:[%s12240_s3 + $0x78] sm:$0xff] }
 0x3c9   : > { %v10609_v44 = vpop.f32.mrf.mxu0  ;;  %7929 = vmatpush3.msra.mxu1 %v4980_v57  ;;  %v4973_v57 = vld [vmem:[%s12240_s3 + $0x40] sm:$0xff] }
 0x3ca   : > { %12235 = vst [vmem:[#allocation50_spill] sm:$0xff] %v10607_v29  ;;  %7930 = vmatprep.subr.mxu1 %v12242_v38 }
 0x3cb   : > { %v7866_v50 = vpop.f32.mrf.mxu0 }
 0x3cc   : > { %v10612_v21 = vadd.f32 %v7866_v50, %v10505_v40 }
 0x3cd   : > { %v3806_v34 = vpop.f32.mrf.mxu0 }
 0x3ce   : > { %12236 = vst [vmem:[#allocation51_spill] sm:$0xff] %v10612_v21  ;;  %v10615_v20 = vadd.f32 %v3806_v34, %v10495_v2  ;;  %v3746_v21 = vadd.f32 %v10573_v13, %v10422_v11 }
 0x3cf   : > { %v7867_v45 = vpop.f32.mrf.mxu0 }
 0x3d0   : > { %12237 = vst [vmem:[#allocation52_spill] sm:$0xff] %v10615_v20  ;;  %v10618_v63 = vadd.f32 %v7867_v45, %v10512_v59  ;;  %v4979_v59 = vld [vmem:[%s12240_s3 + $0x70] sm:$0xff] }
 0x3d1   : > { %v10620_v22 = vpop.f32.mrf.mxu0  ;;  %7931 = vmatpush3.msra.mxu1 %v4979_v59 }
 0x3d2   : > { %12238 = vst [vmem:[#allocation53_spill] sm:$0xff] %v10618_v63  ;;  %12239 = vst [vmem:[#allocation54_spill] sm:$0xff] %v10620_v22  ;;  %7932 = vmatprep.subr.mxu1 %v12242_v38 }
 0x3d3   : > { %v7870_v36 = vpop.f32.mrf.mxu0  ;;  %7933 = vmatpush3.msra.mxu1 %v4978_v43 }
 0x3d4   : > { %v10626_v19 = vadd.f32 %v7870_v36, %v10525_v8  ;;  %7934 = vmatprep.subr.mxu1 %v12242_v38 }
 0x3d5   : > { %v3822_v40 = vpop.f32.mrf.mxu0  ;;  %7935 = vmatpush3.msra.mxu1 %v4977_v16 }
 0x3d6   : > { %12241 = vst [vmem:[#allocation55_spill] sm:$0xff] %v10626_v19  ;;  %v10630_v2 = vadd.f32 %v3822_v40, %v10515_v37  ;;  %7936 = vmatprep.subr.mxu1 %v12242_v38 }
 0x3d7   : > { %v7871_v35 = vpop.f32.mrf.mxu0  ;;  %7937 = vmatpush3.msra.mxu1 %v4976_v62 }
 0x3d8   : > { %12243 = vst [vmem:[#allocation56_spill] sm:$0xff] %v10630_v2  ;;  %v10636_v5 = vadd.f32 %v7871_v35, %v10532_v14  ;;  %7938 = vmatprep.subr.mxu1 %v12242_v38 }
 0x3d9   : > { %v10638_v6 = vpop.f32.mrf.mxu0  ;;  %7939 = vmatpush3.msra.mxu1 %v4975_v23 }
 0x3da   : > { %12244 = vst [vmem:[#allocation59_spill] sm:$0xff] %v10636_v5  ;;  %12245 = vst [vmem:[#allocation60_spill] sm:$0xff] %v10638_v6  ;;  %7940 = vmatprep.subr.mxu1 %v12242_v38 }
 0x3db   : > { %v7874_v8 = vpop.f32.mrf.mxu0 }
 0x3dc   : > { %v10645_v37 = vadd.f32 %v7874_v8, %v10549_v10 }
 0x3dd   : > { %v3838_v54 = vpop.f32.mrf.mxu0 }
 0x3de   : > { %12246 = vst [vmem:[#allocation62_spill] sm:$0xff] %v10645_v37  ;;  %v10649_v14 = vadd.f32 %v3838_v54, %v10535_v33  ;;  %v4972_v54 = vld [vmem:[%s12240_s3 + $0x38] sm:$0xff] }
 0x3df   : > { %v7875_v56 = vpop.f32.mrf.mxu0 }
 0x3e0   : > { %12247 = vst [vmem:[#allocation64_spill] sm:$0xff] %v10649_v14  ;;  %v10655_v18 = vadd.f32 %v7875_v56, %v10555_v60  ;;  %v10669_v60 = vpop.f32.mrf.mxu1 }
 0x3e1   : > { %v10657_v53 = vpop.f32.mrf.mxu0 }
 0x3e2   : > { %12248 = vst [vmem:[#allocation67_spill] sm:$0xff] %v10655_v18  ;;  %12249 = vst [vmem:[#allocation68_spill] sm:$0xff] %v10657_v53  ;;  %v4593_v61 = vpop.f32.mrf.mxu1 }
 0x3e3   : > { %v7878_v10 = vpop.f32.mrf.mxu0 }
 0x3e4   : > { %v10663_v33 = vadd.f32 %v7878_v10, %v3702_v27  ;;  %v10684_v36 = vpop.f32.mrf.mxu1 }
 0x3e5   : > { %v3854_v31 = vpop.f32.mrf.mxu0 }
 0x3e6   : > { %12250 = vst [vmem:[#allocation35_spill] sm:$0xff] %v10663_v33  ;;  %v10667_v52 = vadd.f32 %v3854_v31, %v10558_v51  ;;  %v4974_v51 = vld [vmem:[%s12240_s3 + $0x48] sm:$0xff]  ;;  %v4596_v8 = vpop.f32.mrf.mxu1 }
 0x3e7   : > { %v7879_v15 = vpop.f32.mrf.mxu0  ;;  %7941 = vmatpush3.msra.mxu1 %v4974_v51  ;;  %v4970_v51 = vld [vmem:[%s12240_s3 + $0x28] sm:$0xff] }
 0x3e8   : > { %12251 = vst [vmem:[#allocation37_spill] sm:$0xff] %v10667_v52  ;;  %v10675_v28 = vadd.f32 %v7879_v15, %v10579_v30  ;;  %7942 = vmatprep.subr.mxu1 %v12242_v38  ;;  %v10697_v16 = vpop.f32.mrf.mxu1  ;;  %v4966_v33 = vld [vmem:[%s12240_s3 + $0x8] sm:$0xff] }
 0x3e9   : > { %v10677_v27 = vpop.f32.mrf.mxu0  ;;  %7943 = vmatpush3.msra.mxu1 %v4973_v57 }
 0x3ea   : > { %12252 = vst [vmem:[#allocation38_spill] sm:$0xff] %v10675_v28  ;;  %12253 = vst [vmem:[#allocation76_spill] sm:$0xff] %v10677_v27  ;;  %7944 = vmatprep.subr.mxu1 %v12242_v38  ;;  %v10699_v31 = vpop.f32.mrf.mxu1 }
 0x3eb   : > { %v7638_v50 = vpop.f32.mrf.mxu0  ;;  %7945 = vmatpush3.msra.mxu1 %v4972_v54  ;;  %v4968_v54 = vld [vmem:[%s12240_s3 + $0x18] sm:$0xff] }
 0x3ec   : > { %7946 = vmatprep.subr.mxu1 %v12242_v38 }
 0x3ed   : > { %v7639_v34 = vpop.f32.mrf.mxu0 }
 0x3ee   : > { %v7640_v45 = vadd.f32 %v7639_v34, %v7638_v50  ;;  %v4971_v50 = vld [vmem:[%s12240_s3 + $0x30] sm:$0xff] }
 0x3ef   : > { %v7641_v30 = vpop.f32.mrf.mxu0  ;;  %7947 = vmatpush3.msra.mxu1 %v4971_v50 }
 0x3f0   : > { %v4594_v40 = vadd.f32 %v7640_v45, %v4593_v61  ;;  %7948 = vmatprep.subr.mxu1 %v12242_v38  ;;  %v4969_v45 = vld [vmem:[%s12240_s3 + $0x20] sm:$0xff] }
 0x3f1   : > { %v7642_v35 = vpop.f32.mrf.mxu0  ;;  %7949 = vmatpush3.msra.mxu1 %v4970_v51 }
 0x3f2   : > { %v10691_v59 = vadd.f32 %v4594_v40, %v10568_v24  ;;  %v10701_v24 = vpop.f32.mrf.mxu1  ;;  %7950 = vmatprep.subr.mxu1 %v12242_v38 }
 0x3f3   : > { %v7644_v43 = vpop.f32.mrf.mxu0  ;;  %7951 = vmatpush3.msra.mxu1 %v4969_v45  ;;  %v4965_v45 = vld [vmem:[%s12240_s3] sm:$0xff] }
 0x3f4   : > { %v4612_v57 = vpop.f32.mrf.mxu1  ;;  %7952 = vmatprep.subr.mxu1 %v12242_v38 }
 0x3f5   : > { %v7645_v56 = vpop.f32.mrf.mxu0  ;;  %7953 = vmatpush3.msra.mxu1 %v4968_v54 }
 0x3f6   : > { %v10723_v28 = vpop.f32.mrf.mxu1  ;;  %7954 = vmatprep.subr.mxu1 %v12242_v38  ;;  %v7646_v19 = vadd.f32 %v7645_v56, %v7644_v43 }
 0x3f7   : > { %v7647_v10 = vpop.f32.mrf.mxu0  ;;  %7955 = vmatpush3.msra.mxu1 %v4967_v9 }
 0x3f8   : > { %7956 = vmatprep.subr.mxu1 %v12242_v38  ;;  %v10733_v4 = vpop.f32.mrf.mxu1 }
 0x3f9   : > { %v7648_v62 = vpop.f32.mrf.mxu0  ;;  %7957 = vmatpush3.msra.mxu1 %v4966_v33  ;;  %v7643_v33 = vadd.f32 %v7642_v35, %v7641_v30  ;;  %v10758_v35 = vld [vmem:[#allocation11] ss:$0 sm:$0xff] }
 0x3fa   : > { %7958 = vmatprep.subr.mxu1 %v12242_v38  ;;  %v10737_v18 = vpop.f32.mrf.mxu1  ;;  %v7649_v20 = vadd.f32 %v7648_v62, %v7647_v10  ;;  %v4759_v11 = vmul.f32 %v10758_v35, %v10691_v59  ;;  %v10771_v10 = vld [vmem:[#allocation13] ss:$0 sm:$0xff] }
 0x3fb   : > { %v7650_v15 = vpop.f32.mrf.mxu0  ;;  %7959 = vmatpush3.msra.mxu1 %v4965_v45  ;;  %v4597_v45 = vadd.f32 %v7643_v33, %v4596_v8 }
 0x3fc   : > { %7963 = vmatprep.subr.mxu1 %v12242_v38  ;;  %v10739_v14 = vpop.f32.mrf.mxu1  ;;  %v4602_v38 = vadd.f32 %v10669_v60, %v7646_v19  ;;  %v4605_v56 = vadd.f32 %v10684_v36, %v7649_v20  ;;  %v4798_v59 = vadd.f32 %v10771_v10, %v4759_v11 }
 0x3fd   : > { %v7651_v23 = vpop.f32.mrf.mxu0  ;;  %v4721_v47 = vadd.f32 %v4597_v45, %v3746_v21 }
 0x3fe   : > { %v10745_v49 = vpop.f32.mrf.mxu1  ;;  %v4722_v43 = vadd.f32 %v4602_v38, %v10564_v41  ;;  %v7652_v19 = vadd.f32 %v7651_v23, %v7650_v15  ;;  %v4723_v38 = vadd.f32 %v4605_v56, %v10571_v25  ;;  %vm4830_vm7 = vcmp.gt.f32.partialorder %v4798_v59, 0.0 }
 0x3ff   : > { %v7653_v61 = vpop.f32.mrf.mxu0  ;;  %v4760_v13 = vmul.f32 %v10758_v35, %v4721_v47 }
 0x400   : > { %v10747_v6 = vpop.f32.mrf.mxu1  ;;  %v4761_v62 = vmul.f32 %v10758_v35, %v4722_v43  ;;  %v4610_v20 = vadd.f32 %v7652_v19, %v10699_v31  ;;  %v4762_v25 = vmul.f32 %v10758_v35, %v4723_v38  ;;  %v4862_v19 = vmul.f32 0.001, %v4798_v59 }
 0x401   : > { %v7654_v34 = vpop.f32.mrf.mxu0  ;;  %v4799_v47 = vadd.f32 %v10771_v10, %v4760_v13 }
 0x402   : > { %v10756_v30 = vpop.f32.mrf.mxu1  ;;  %v7655_v60 = vadd.f32 %v7654_v34, %v7653_v61  ;;  %v3762_v34 = vadd.f32 %v10587_v3, %v10442_v58  ;;  %v4800_v43 = vadd.f32 %v10771_v10, %v4761_v62  ;;  %v4724_v31 = vadd.f32 %v4610_v20, %v10582_v46 }
 0x403   : > { %v7656_v40 = vpop.f32.mrf.mxu0  ;;  %v4863_v58 = vmul.f32 0.001, %v4799_v47  ;;  %vm4831_vm5 = vcmp.gt.f32.partialorder %v4799_v47, 0.0  ;;  %v4801_v46 = vadd.f32 %v10771_v10, %v4762_v25 }
 0x404   : > { %v10769_v21 = vpop.f32.mrf.mxu1  ;;  %v4613_v15 = vadd.f32 %v7655_v60, %v4612_v57  ;;  %vm4832_vm9 = vcmp.gt.f32.partialorder %v4800_v43, 0.0  ;;  %v4864_v60 = vmul.f32 0.001, %v4800_v43 }
 0x405   : > { %v7657_v50 = vpop.f32.mrf.mxu0  ;;  %v10807_v13 = vsel %vm4831_vm5, %v4799_v47, %v4863_v58  ;;  %vm4833_vm2 = vcmp.gt.f32.partialorder %v4801_v46, 0.0 }
 0x406   : > { %v7658_v36 = vadd.f32 %v7657_v50, %v7656_v40  ;;  %v10784_v45 = vpop.f32.mrf.mxu1  ;;  %v4725_v40 = vadd.f32 %v4613_v15, %v3762_v34 }
 0x407   : > { %v7659_v51 = vpop.f32.mrf.mxu0 }
 0x408   : > { %v10795_v56 = vpop.f32.mrf.mxu1 }
 0x409   : > { %v7660_v27 = vpop.f32.mrf.mxu0 }
 0x40a   : > { %v7661_v23 = vadd.f32 %v7660_v27, %v7659_v51  ;;  %v4618_v27 = vadd.f32 %v10697_v16, %v7658_v36  ;;  %v3778_v36 = vadd.f32 %v10598_v32, %v10462_v17 }
 0x40b   : > { %v7662_v54 = vpop.f32.mrf.mxu0 }
 0x40c   : > { %v4621_v50 = vadd.f32 %v10701_v24, %v7661_v23  ;;  %v4726_v16 = vadd.f32 %v4618_v27, %v10577_v0  ;;  %v10814_v0 = vpop.f32.mrf.mxu1  ;;  %v4865_v23 = vmul.f32 0.001, %v4801_v46 }
 0x40d   : > { %v7663_v52 = vpop.f32.mrf.mxu0 }
 0x40e   : > { %v7664_v57 = vadd.f32 %v7663_v52, %v7662_v54  ;;  %v4763_v52 = vmul.f32 %v10758_v35, %v4724_v31  ;;  %v4764_v54 = vmul.f32 %v10758_v35, %v4725_v40  ;;  %v4765_v47 = vmul.f32 %v10758_v35, %v4726_v16  ;;  %v10837_v25 = vpop.f32.mrf.mxu1 }
 0x40f   : > { %v7665_v9 = vpop.f32.mrf.mxu0 }
 0x410   : > { %v4626_v24 = vadd.f32 %v7664_v57, %v10733_v4  ;;  %v10817_v4 = vsel %vm4830_vm7, %v4798_v59, %v4862_v19  ;;  %v4803_v32 = vadd.f32 %v10771_v10, %v4764_v54  ;;  %v10842_v57 = vsel %vm4833_vm2, %v4801_v46, %v4865_v23 }
 0x411   : > { %v7666_v37 = vpop.f32.mrf.mxu0  ;;  %v4926_v17 = vadd.f32 %v10807_v13, %v10817_v4  ;;  %v3794_v19 = vadd.f32 %v10609_v44, %v10482_v26 }
 0x412   : > { %v7667_v3 = vadd.f32 %v7666_v37, %v7665_v9  ;;  %v4727_v37 = vadd.f32 %v4621_v50, %v10585_v42  ;;  %v10820_v42 = vsel %vm4832_vm9, %v4800_v43, %v4864_v60  ;;  %v4804_v50 = vadd.f32 %v10771_v10, %v4765_v47  ;;  %v10853_v60 = vpop.f32.mrf.mxu1 }
 0x413   : > { %v10741_v5 = vpop.f32.mrf.mxu0  ;;  %vm4835_vm15 = vcmp.gt.f32.partialorder %v4803_v32, 0.0 }
 0x414   : > { %v4629_v62 = vadd.f32 %v7667_v3, %v10739_v14  ;;  %v4802_v14 = vadd.f32 %v10771_v10, %v4763_v52  ;;  %v4868_v54 = vmul.f32 0.001, %v4804_v50  ;;  %vm4836_vm3 = vcmp.gt.f32.partialorder %v4804_v50, 0.0 }
 0x415   : > { %v10743_v53 = vpop.f32.mrf.mxu0 }
 0x416   : > { %v7670_v38 = vadd.f32 %v10743_v53, %v10741_v5  ;;  %v4729_v53 = vadd.f32 %v4629_v62, %v3778_v36  ;;  %v4866_v40 = vmul.f32 0.001, %v4802_v14  ;;  %vm4834_vm1 = vcmp.gt.f32.partialorder %v4802_v14, 0.0 }
 0x417   : > { %v7671_v2 = vpop.f32.mrf.mxu0  ;;  %v10872_v23 = vsel %vm4836_vm3, %v4804_v50, %v4868_v54  ;;  %v12256_v54 = vld [vmem:[#allocation54_spill] sm:$0xff] }
 0x418   : > { %v4634_v59 = vadd.f32 %v10723_v28, %v7670_v38  ;;  %v4768_v58 = vmul.f32 %v10758_v35, %v4729_v53 }
 0x419   : > { %v7672_v63 = vpop.f32.mrf.mxu0 }
 0x41a   : > { %v7673_v20 = vadd.f32 %v7672_v63, %v7671_v2  ;;  %v4728_v63 = vadd.f32 %v4626_v24, %v10593_v12  ;;  %v4766_v2 = vmul.f32 %v10758_v35, %v4727_v37  ;;  %v4927_v12 = vadd.f32 %v4926_v17, %v10820_v42 }
 0x41b   : > { %v10750_v55 = vpop.f32.mrf.mxu0  ;;  %v4730_v3 = vadd.f32 %v4634_v59, %v10590_v7  ;;  %v10857_v24 = vsel %vm4834_vm1, %v4802_v14, %v4866_v40 }
 0x41c   : > { %v4637_v34 = vadd.f32 %v10737_v18, %v7673_v20  ;;  %v4767_v28 = vmul.f32 %v10758_v35, %v4728_v63  ;;  %v4867_v18 = vmul.f32 0.001, %v4803_v32  ;;  %v4928_v46 = vadd.f32 %v4927_v12, %v10842_v57  ;;  %v10869_v20 = vpop.f32.mrf.mxu1 }
 0x41d   : > { %v10754_v22 = vpop.f32.mrf.mxu0 }
 0x41e   : > { %v7676_v43 = vadd.f32 %v10754_v22, %v10750_v55  ;;  %v4805_v55 = vadd.f32 %v10771_v10, %v4766_v2  ;;  %v4806_v37 = vadd.f32 %v10771_v10, %v4767_v28  ;;  %v4929_v36 = vadd.f32 %v4928_v46, %v10857_v24  ;;  %v12254_v46 = vld [vmem:[#allocation50_spill] sm:$0xff] }
 0x41f   : > { %v10761_v8 = vpop.f32.mrf.mxu0 }
 0x420   : > { %vm4837_vm8 = vcmp.gt.f32.partialorder %v4805_v55, 0.0  ;;  %v4869_v26 = vmul.f32 0.001, %v4805_v55  ;;  %v4870_v14 = vmul.f32 0.001, %v4806_v37  ;;  %vm4838_vm12 = vcmp.gt.f32.partialorder %v4806_v37, 0.0 }
 0x421   : > { %v10764_v33 = vpop.f32.mrf.mxu0 }
 0x422   : > { %v7679_v31 = vadd.f32 %v10764_v33, %v10761_v8  ;;  %v4731_v8 = vadd.f32 %v4637_v34, %v10596_v48  ;;  %v4642_v33 = vadd.f32 %v7676_v43, %v10747_v6  ;;  %v10863_v48 = vsel %vm4835_vm15, %v4803_v32, %v4867_v18  ;;  %v10886_v43 = vpop.f32.mrf.mxu1 }
 0x423   : > { %v10774_v41 = vpop.f32.mrf.mxu0  ;;  %v4807_v6 = vadd.f32 %v10771_v10, %v4768_v58  ;;  %v4930_v17 = vadd.f32 %v4929_v36, %v10863_v48  ;;  %v10879_v32 = vsel %vm4837_vm8, %v4805_v55, %v4869_v26  ;;  %v12257_v26 = vld [vmem:[#allocation52_spill] sm:$0xff] }
 0x424   : > { %v4645_v52 = vadd.f32 %v7679_v31, %v10769_v21  ;;  %v4769_v21 = vmul.f32 %v10758_v35, %v4730_v3  ;;  %v4770_v62 = vmul.f32 %v10758_v35, %v4731_v8  ;;  %v4732_v38 = vadd.f32 %v4642_v33, %v10604_v1 }
 0x425   : > { %v10778_v61 = vpop.f32.mrf.mxu0  ;;  %v4871_v53 = vmul.f32 0.001, %v4807_v6  ;;  %vm4839_vm0 = vcmp.gt.f32.partialorder %v4807_v6, 0.0  ;;  %v10890_v31 = vsel %vm4838_vm12, %v4806_v37, %v4870_v14 }
 0x426   : > { %v7682_v7 = vadd.f32 %v10778_v61, %v10774_v41  ;;  %v4733_v41 = vadd.f32 %v4645_v52, %v3794_v19  ;;  %v4808_v59 = vadd.f32 %v10771_v10, %v4769_v21  ;;  %v4809_v34 = vadd.f32 %v10771_v10, %v4770_v62  ;;  %v4676_v19 = vpop.f32.mrf.mxu1  ;;  %v12255_v52 = vld [vmem:[#allocation46_spill] sm:$0xff] }
 0x427   : > { %v10787_v29 = vpop.f32.mrf.mxu0  ;;  %v10898_v58 = vsel %vm4839_vm0, %v4807_v6, %v4871_v53  ;;  %v3810_v37 = vadd.f32 %v12256_v54, %v12255_v52 }
 0x428   : > { %v4650_v47 = vadd.f32 %v10745_v49, %v7682_v7  ;;  %v4771_v49 = vmul.f32 %v10758_v35, %v4732_v38  ;;  %v4872_v3 = vmul.f32 0.001, %v4808_v59  ;;  %v4873_v8 = vmul.f32 0.001, %v4809_v34 }
 0x429   : > { %v10793_v51 = vpop.f32.mrf.mxu0  ;;  %vm4840_vm6 = vcmp.gt.f32.partialorder %v4808_v59, 0.0  ;;  %vm4841_vm13 = vcmp.gt.f32.partialorder %v4809_v34, 0.0 }
 0x42a   : > { %v7685_v63 = vadd.f32 %v10793_v51, %v10787_v29  ;;  %v4931_v29 = vadd.f32 %v4930_v17, %v10872_v23  ;;  %v4772_v51 = vmul.f32 %v10758_v35, %v4733_v41  ;;  %v4810_v33 = vadd.f32 %v10771_v10, %v4771_v49  ;;  %v12259_v49 = vld [vmem:[#allocation47_spill] sm:$0xff] }
 0x42b   : > { %v10797_v11 = vpop.f32.mrf.mxu0  ;;  %v10911_v38 = vsel %vm4840_vm6, %v4808_v59, %v4872_v3  ;;  %v10913_v36 = vsel %vm4841_vm13, %v4809_v34, %v4873_v8  ;;  %v12258_v34 = vld [vmem:[#allocation51_spill] sm:$0xff] }
 0x42c   : > { %v4932_v50 = vadd.f32 %v4931_v29, %v10879_v32  ;;  %v4874_v41 = vmul.f32 0.001, %v4810_v33  ;;  %vm4842_vm4 = vcmp.gt.f32.partialorder %v4810_v33, 0.0  ;;  %v12260_v29 = vld [vmem:[#allocation60_spill] sm:$0xff] }
 0x42d   : > { %v10805_v9 = vpop.f32.mrf.mxu0 }
 0x42e   : > { %v7688_v1 = vadd.f32 %v10805_v9, %v10797_v11  ;;  %v4734_v11 = vadd.f32 %v4650_v47, %v10601_v39  ;;  %v4653_v9 = vadd.f32 %v10756_v30, %v7685_v63  ;;  %v4933_v39 = vadd.f32 %v4932_v50, %v10890_v31  ;;  %v10915_v47 = vpop.f32.mrf.mxu1 }
 0x42f   : > { %v10822_v15 = vpop.f32.mrf.mxu0  ;;  %v4811_v30 = vadd.f32 %v10771_v10, %v4772_v51  ;;  %v3826_v51 = vadd.f32 %v12260_v29, %v12259_v49 }
 0x430   : > { %v4658_v28 = vadd.f32 %v7688_v1, %v10795_v56  ;;  %v4735_v56 = vadd.f32 %v4653_v9, %v12254_v46  ;;  %v4934_v7 = vadd.f32 %v4933_v39, %v10898_v58 }
 0x431   : > { %v10831_v5 = vpop.f32.mrf.mxu0  ;;  %vm4843_vm11 = vcmp.gt.f32.partialorder %v4811_v30, 0.0 }
 0x432   : > { %v7691_v40 = vadd.f32 %v10831_v5, %v10822_v15  ;;  %v4773_v5 = vmul.f32 %v10758_v35, %v4734_v11  ;;  %v4736_v6 = vadd.f32 %v4658_v28, %v12257_v26  ;;  %v4774_v17 = vmul.f32 %v10758_v35, %v4735_v56 }
 0x433   : > { %v7692_v27 = vpop.f32.mrf.mxu0  ;;  %v4935_v53 = vadd.f32 %v4934_v7, %v10911_v38  ;;  %v10925_v11 = vsel %vm4842_vm4, %v4810_v33, %v4874_v41 }
 0x434   : > { %v4812_v63 = vadd.f32 %v10771_v10, %v4773_v5  ;;  %v4775_v59 = vmul.f32 %v10758_v35, %v4736_v6  ;;  %v4813_v8 = vadd.f32 %v10771_v10, %v4774_v17  ;;  %v12261_v5 = vld [vmem:[#allocation53_spill] sm:$0xff]  ;;  %v12263_v17 = vld [vmem:[#allocation55_spill] sm:$0xff] }
 0x435   : > { %v7693_v22 = vpop.f32.mrf.mxu0  ;;  %v4936_v50 = vadd.f32 %v4935_v53, %v10913_v36 }
 0x436   : > { %v7694_v18 = vadd.f32 %v7693_v22, %v7692_v27  ;;  %v4661_v27 = vadd.f32 %v7691_v40, %v10837_v25  ;;  %v4875_v25 = vmul.f32 0.001, %v4811_v30  ;;  %v4689_v40 = vpop.f32.mrf.mxu1  ;;  %v4876_v3 = vmul.f32 0.001, %v4812_v63 }
 0x437   : > { %v7695_v16 = vpop.f32.mrf.mxu0  ;;  %v4937_v46 = vadd.f32 %v4936_v50, %v10925_v11  ;;  %vm4844_vm14 = vcmp.gt.f32.partialorder %v4812_v63, 0.0  ;;  %vm4845_vm7 = vcmp.gt.f32.partialorder %v4813_v8, 0.0 }
 0x438   : > { %v4666_v21 = vadd.f32 %v10784_v45, %v7694_v18  ;;  %v4737_v1 = vadd.f32 %v4661_v27, %v3810_v37  ;;  %v10940_v52 = vpop.f32.mrf.mxu1  ;;  %v10944_v6 = vsel %vm4844_vm14, %v4812_v63, %v4876_v3  ;;  %v12265_v63 = vld [vmem:[#allocation68_spill] sm:$0xff] }
 0x439   : > { %v7696_v44 = vpop.f32.mrf.mxu0 }
 0x43a   : > { %v7697_v22 = vadd.f32 %v7696_v44, %v7695_v16  ;;  %v4776_v39 = vmul.f32 %v10758_v35, %v4737_v1 }
 0x43b   : > { %v7698_v61 = vpop.f32.mrf.mxu0 }
 0x43c   : > { %v4669_v45 = vadd.f32 %v10814_v0, %v7697_v22  ;;  %v10930_v0 = vsel %vm4843_vm11, %v4811_v30, %v4875_v25  ;;  %v12262_v30 = vld [vmem:[#allocation56_spill] sm:$0xff] }
 0x43d   : > { %v7699_v2 = vpop.f32.mrf.mxu0  ;;  %v4938_v54 = vadd.f32 %v4937_v46, %v10930_v0 }
 0x43e   : > { %v7700_v14 = vadd.f32 %v7699_v2, %v7698_v61  ;;  %v4738_v61 = vadd.f32 %v4666_v21, %v12258_v34  ;;  %v4739_v33 = vadd.f32 %v4669_v45, %v12261_v5  ;;  %v4877_v21 = vmul.f32 0.001, %v4813_v8  ;;  %v12264_v45 = vld [vmem:[#allocation48_spill] sm:$0xff] }
 0x43f   : > { %v7701_v12 = vpop.f32.mrf.mxu0  ;;  %v3842_v53 = vadd.f32 %v12265_v63, %v12264_v45  ;;  %v4939_v34 = vadd.f32 %v4938_v54, %v10944_v6 }
 0x440   : > { %v4778_v41 = vmul.f32 %v10758_v35, %v4739_v33 }
 0x441   : > { %v7702_v55 = vpop.f32.mrf.mxu0 }
 0x442   : > { %v7703_v16 = vadd.f32 %v7702_v55, %v7701_v12  ;;  %v4674_v12 = vadd.f32 %v7700_v14, %v10869_v20  ;;  %v4814_v20 = vadd.f32 %v10771_v10, %v4775_v59  ;;  %v4692_v59 = vpop.f32.mrf.mxu1 }
 0x443   : > { %v7704_v15 = vpop.f32.mrf.mxu0 }
 0x444   : > { %v4677_v28 = vadd.f32 %v7703_v16, %v4676_v19  ;;  %v4740_v27 = vadd.f32 %v4674_v12, %v12262_v30  ;;  %v4878_v14 = vmul.f32 0.001, %v4814_v20  ;;  %vm4846_vm5 = vcmp.gt.f32.partialorder %v4814_v20, 0.0  ;;  %v10964_v46 = vpop.f32.mrf.mxu1 }
 0x445   : > { %v7705_v62 = vpop.f32.mrf.mxu0 }
 0x446   : > { %v7706_v9 = vadd.f32 %v7705_v62, %v7704_v15  ;;  %v4777_v15 = vmul.f32 %v10758_v35, %v4738_v61  ;;  %v4741_v37 = vadd.f32 %v4677_v28, %v3826_v51  ;;  %v4815_v62 = vadd.f32 %v10771_v10, %v4776_v39 }
 0x447   : > { %v7707_v44 = vpop.f32.mrf.mxu0  ;;  %v10956_v51 = vsel %vm4845_vm7, %v4813_v8, %v4877_v21  ;;  %v10959_v50 = vsel %vm4846_vm5, %v4814_v20, %v4878_v14  ;;  %v12268_v14 = vld [vmem:[#allocation62_spill] sm:$0xff] }
 0x448   : > { %v4682_v19 = vadd.f32 %v10853_v60, %v7706_v9  ;;  %v4816_v60 = vadd.f32 %v10771_v10, %v4777_v15  ;;  %v4780_v61 = vmul.f32 %v10758_v35, %v4741_v37  ;;  %v4879_v12 = vmul.f32 0.001, %v4815_v62 }
 0x449   : > { %v7708_v2 = vpop.f32.mrf.mxu0  ;;  %v4817_v9 = vadd.f32 %v10771_v10, %v4778_v41  ;;  %vm4847_vm9 = vcmp.gt.f32.partialorder %v4815_v62, 0.0  ;;  %v4940_v8 = vadd.f32 %v4939_v34, %v10956_v51 }
 0x44a   : > { %v7709_v18 = vadd.f32 %v7708_v2, %v7707_v44  ;;  %v4779_v44 = vmul.f32 %v10758_v35, %v4740_v27  ;;  %v4742_v1 = vadd.f32 %v4682_v19, %v12263_v17  ;;  %v12266_v2 = vld [vmem:[#allocation59_spill] sm:$0xff]  ;;  %v4880_v28 = vmul.f32 0.001, %v4816_v60 }
 0x44b   : > { %v7710_v55 = vpop.f32.mrf.mxu0  ;;  %vm4848_vm2 = vcmp.gt.f32.partialorder %v4816_v60, 0.0  ;;  %v4819_v15 = vadd.f32 %v10771_v10, %v4780_v61  ;;  %v10969_v30 = vsel %vm4847_vm9, %v4815_v62, %v4879_v12  ;;  %v4881_v27 = vmul.f32 0.001, %v4817_v9  ;;  %v4705_v62 = vpop.f32.mrf.mxu1 }
 0x44c   : > { %v4685_v7 = vadd.f32 %v10886_v43, %v7709_v18  ;;  %v12267_v18 = vld [vmem:[#allocation64_spill] sm:$0xff]  ;;  %v4818_v39 = vadd.f32 %v10771_v10, %v4779_v44  ;;  %v4781_v5 = vmul.f32 %v10758_v35, %v4742_v1  ;;  %v4941_v54 = vadd.f32 %v4940_v8, %v10959_v50 }
 0x44d   : > { %v7711_v56 = vpop.f32.mrf.mxu0  ;;  %v10973_v37 = vsel %vm4848_vm2, %v4816_v60, %v4880_v28  ;;  %vm4849_vm1 = vcmp.gt.f32.partialorder %v4817_v9, 0.0  ;;  %v4883_v17 = vmul.f32 0.001, %v4819_v15  ;;  %vm4851_vm3 = vcmp.gt.f32.partialorder %v4819_v15, 0.0 }
 0x44e   : > { %v7712_v22 = vadd.f32 %v7711_v56, %v7710_v55  ;;  %v4743_v49 = vadd.f32 %v4685_v7, %v12266_v2  ;;  %v4882_v21 = vmul.f32 0.001, %v4818_v39  ;;  %v4820_v41 = vadd.f32 %v10771_v10, %v4781_v5 }
 0x44f   : > { %v7713_v26 = vpop.f32.mrf.mxu0  ;;  %v4942_v44 = vadd.f32 %v4941_v54, %v10969_v30  ;;  %vm4850_vm15 = vcmp.gt.f32.partialorder %v4818_v39, 0.0  ;;  %v10980_v60 = vsel %vm4849_vm1, %v4817_v9, %v4881_v27  ;;  %v7927_v9 = vpop.f32.mrf.mxu1  ;;  %v10991_v28 = vsel %vm4851_vm3, %v4819_v15, %v4883_v17  ;;  %v12270_v15 = vld [vmem:[#allocation37_spill] sm:$0xff]  ;;  %v12272_v54 = vld [vmem:[#allocation76_spill] sm:$0xff] }
 0x450   : > { %v4690_v25 = vadd.f32 %v7712_v22, %v4689_v40  ;;  %v4782_v20 = vmul.f32 %v10758_v35, %v4743_v49  ;;  %v10987_v61 = vsel %vm4850_vm15, %v4818_v39, %v4882_v21  ;;  %v4884_v2 = vmul.f32 0.001, %v4820_v41  ;;  %v12269_v49 = vld [vmem:[#allocation67_spill] sm:$0xff] }
 0x451   : > { %v7714_v16 = vpop.f32.mrf.mxu0  ;;  %v4943_v63 = vadd.f32 %v4942_v44, %v10973_v37  ;;  %vm4852_vm8 = vcmp.gt.f32.partialorder %v4820_v41, 0.0 }
 0x452   : > { %v7715_v43 = vadd.f32 %v7714_v16, %v7713_v26  ;;  %v4744_v55 = vadd.f32 %v4690_v25, %v12267_v18 }
 0x453   : > { %v7716_v29 = vpop.f32.mrf.mxu0 }
 0x454   : > { %v4693_v40 = vadd.f32 %v7715_v43, %v4692_v59  ;;  %v4783_v7 = vmul.f32 %v10758_v35, %v4744_v55 }
 0x455   : > { %v7717_v3 = vpop.f32.mrf.mxu0 }
 0x456   : > { %v7718_v33 = vadd.f32 %v7717_v3, %v7716_v29  ;;  %v4745_v19 = vadd.f32 %v4693_v40, %v3842_v53  ;;  %v4822_v53 = vadd.f32 %v10771_v10, %v4783_v7  ;;  %v4944_v40 = vadd.f32 %v4943_v63, %v10980_v60 }
 0x457   : > { %v7719_v56 = vpop.f32.mrf.mxu0 }
 0x458   : > { %v4698_v22 = vadd.f32 %v10915_v47, %v7718_v33  ;;  %v4821_v47 = vadd.f32 %v10771_v10, %v4782_v20  ;;  %v4784_v43 = vmul.f32 %v10758_v35, %v4745_v19  ;;  %v4945_v39 = vadd.f32 %v4944_v40, %v10987_v61 }
 0x459   : > { %v7720_v26 = vpop.f32.mrf.mxu0  ;;  %v4886_v33 = vmul.f32 0.001, %v4822_v53  ;;  %vm4854_vm0 = vcmp.gt.f32.partialorder %v4822_v53, 0.0 }
 0x45a   : > { %v4746_v25 = vadd.f32 %v4698_v22, %v12268_v14  ;;  %v7721_v16 = vadd.f32 %v7720_v26, %v7719_v56  ;;  %vm4853_vm12 = vcmp.gt.f32.partialorder %v4821_v47, 0.0  ;;  %v4823_v55 = vadd.f32 %v10771_v10, %v4784_v43  ;;  %v12271_v22 = vld [vmem:[#allocation49_spill] sm:$0xff]  ;;  %v4708_v26 = vpop.f32.mrf.mxu1 }
 0x45b   : > { %v7722_v1 = vpop.f32.mrf.mxu0  ;;  %v10997_v56 = vsel %vm4852_vm8, %v4820_v41, %v4884_v2  ;;  %v3858_v7 = vadd.f32 %v12272_v54, %v12271_v22  ;;  %v4946_v21 = vadd.f32 %v4945_v39, %v10991_v28  ;;  %v12273_v39 = vld [vmem:[#allocation35_spill] sm:$0xff] }
 0x45c   : > { %v4701_v45 = vadd.f32 %v10940_v52, %v7721_v16  ;;  %v4785_v59 = vmul.f32 %v10758_v35, %v4746_v25  ;;  %v4885_v52 = vmul.f32 0.001, %v4821_v47  ;;  %v4887_v16 = vmul.f32 0.001, %v4823_v55 }
 0x45d   : > { %v7723_v34 = vpop.f32.mrf.mxu0  ;;  %v4947_v17 = vadd.f32 %v4946_v21, %v10997_v56  ;;  %vm4855_vm6 = vcmp.gt.f32.partialorder %v4823_v55, 0.0 }
 0x45e   : > { %v4747_v29 = vadd.f32 %v4701_v45, %v12269_v49  ;;  %v7724_v12 = vadd.f32 %v7723_v34, %v7722_v1  ;;  %v4824_v8 = vadd.f32 %v10771_v10, %v4785_v59  ;;  %v11003_v14 = vsel %vm4853_vm12, %v4821_v47, %v4885_v52 }
 0x45f   : > { %v7725_v18 = vpop.f32.mrf.mxu0  ;;  %v11008_v1 = vsel %vm4854_vm0, %v4822_v53, %v4886_v33  ;;  %v4948_v34 = vadd.f32 %v4947_v17, %v11003_v14  ;;  %v11012_v49 = vsel %vm4855_vm6, %v4823_v55, %v4887_v16 }
 0x460   : > { %v4786_v3 = vmul.f32 %v10758_v35, %v4747_v29  ;;  %v4706_v5 = vadd.f32 %v7724_v12, %v4705_v62  ;;  %v4888_v43 = vmul.f32 0.001, %v4824_v8  ;;  %vm4856_vm13 = vcmp.gt.f32.partialorder %v4824_v8, 0.0 }
 0x461   : > { %v7726_v20 = vpop.f32.mrf.mxu0  ;;  %v4949_v53 = vadd.f32 %v4948_v34, %v11008_v1 }
 0x462   : > { %v4748_v27 = vadd.f32 %v4706_v5, %v12270_v15  ;;  %v7727_v19 = vadd.f32 %v7726_v20, %v7725_v18  ;;  %v4825_v62 = vadd.f32 %v10771_v10, %v4786_v3  ;;  %v11017_v52 = vsel %vm4856_vm13, %v4824_v8, %v4888_v43 }
 0x463   : > { %v7728_v25 = vpop.f32.mrf.mxu0  ;;  %v4950_v55 = vadd.f32 %v4949_v53, %v11012_v49  ;;  %v5060_v53 = vld [vmem:[#allocation16 + $0x38] sm:$0xff] }
 0x464   : > { %v4787_v44 = vmul.f32 %v10758_v35, %v4748_v27  ;;  %v4709_v41 = vadd.f32 %v7727_v19, %v4708_v26  ;;  %v4889_v29 = vmul.f32 0.001, %v4825_v62  ;;  %vm4857_vm4 = vcmp.gt.f32.partialorder %v4825_v62, 0.0 }
 0x465   : > { %v7729_v45 = vpop.f32.mrf.mxu0  ;;  %v4951_v8 = vadd.f32 %v4950_v55, %v11017_v52  ;;  %v5053_v55 = vld [vmem:[#allocation16] sm:$0xff] }
 0x466   : > { %v4826_v63 = vadd.f32 %v10771_v10, %v4787_v44  ;;  %v4749_v59 = vadd.f32 %v4709_v41, %v3858_v7  ;;  %v7730_v47 = vadd.f32 %v7729_v45, %v7728_v25  ;;  %v11022_v15 = vsel %vm4857_vm4, %v4825_v62, %v4889_v29  ;;  %v12274_v7 = vld [vmem:[#allocation38_spill] sm:$0xff] }
 0x467   : > { %v7731_v2 = vpop.f32.mrf.mxu0  ;;  %v4952_v21 = vadd.f32 %v4951_v8, %v11022_v15  ;;  %v11060_v8 = vld [vmem:[#allocation19 + $0xc8] ss:$16 sps:$4 sm:$0xff]  }
 0x468   : > { %v4788_v12 = vmul.f32 %v10758_v35, %v4749_v59  ;;  %v4714_v40 = vadd.f32 %v10964_v46, %v7730_v47  ;;  %v4890_v3 = vmul.f32 0.001, %v4826_v63  ;;  %vm4858_vm11 = vcmp.gt.f32.partialorder %v4826_v63, 0.0 }
 0x469   : > { %v7732_v18 = vpop.f32.mrf.mxu0 }
 0x46a   : > { %v4827_v5 = vadd.f32 %v10771_v10, %v4788_v12  ;;  %v4750_v33 = vadd.f32 %v4714_v40, %v12273_v39  ;;  %v7733_v20 = vadd.f32 %v7732_v18, %v7731_v2  ;;  %v11026_v22 = vsel %vm4858_vm11, %v4826_v63, %v4890_v3  ;;  %v5058_v3 = vld [vmem:[#allocation16 + $0x28] sm:$0xff]  ;;  %v5056_v39 = vld [vmem:[#allocation16 + $0x18] sm:$0xff] }
 0x46b   : > { %v4953_v44 = vadd.f32 %v4952_v21, %v11026_v22  ;;  %v12275_v18 = vmov 0.0   ;;  %v11072_v21 = vld [vmem:[#allocation19 + $0x88] ss:$16 sps:$4 sm:$0xff]  }
 0x46c   : > { %v4891_v27 = vmul.f32 0.001, %v4827_v5  ;;  %v4789_v46 = vmul.f32 %v10758_v35, %v4750_v33  ;;  %v4717_v19 = vadd.f32 %v7927_v9, %v7733_v20  ;;  %vm4859_vm14 = vcmp.gt.f32.partialorder %v4827_v5, 0.0  ;;  %v5055_v33 = vld [vmem:[#allocation16 + $0x10] sm:$0xff]  ;;  %v5054_v20 = vld [vmem:[#allocation16 + $0x8] sm:$0xff] }
 0x46e   : > { %v4828_v54 = vadd.f32 %v10771_v10, %v4789_v46  ;;  %v4751_v26 = vadd.f32 %v4717_v19, %v12274_v7  ;;  %v11031_v25 = vsel %vm4859_vm14, %v4827_v5, %v4891_v27  ;;  %v5057_v5 = vld [vmem:[#allocation16 + $0x20] sm:$0xff]  ;;  %v11051_v27 = vld [vmem:[#allocation19 + $0xe8] ss:$16 sps:$4 sm:$0xff]  }
 0x46f   : > { %v4954_v17 = vadd.f32 %v4953_v44, %v11031_v25  ;;  %v11053_v46 = vld [vmem:[#allocation19 + $0xec] ss:$16 sps:$4 sm:$0xff]   ;;  %v11066_v7 = vld [vmem:[#allocation19 + $0xa8] ss:$16 sps:$4 sm:$0xff]  }
 0x470   : > { %vm4860_vm7 = vcmp.gt.f32.partialorder %v4828_v54, 0.0  ;;  %v4892_v16 = vmul.f32 0.001, %v4828_v54  ;;  %v4790_v62 = vmul.f32 %v10758_v35, %v4751_v26  ;;  %v11055_v19 = vld [vmem:[#allocation19 + $0xcc] ss:$16 sps:$4 sm:$0xff]   ;;  %5579 = vmatprep.subr.bf16.mxu0 %v11053_v46 }
 0x471   : > { %5580 = vmatpush1.bf16.msra.mxu0 %v11051_v27  ;;  %v11069_v26 = vld [vmem:[#allocation19 + $0x8c] ss:$16 sps:$4 sm:$0xff]  }
 0x472   : > { %v11035_v9 = vsel %vm4860_vm7, %v4828_v54, %v4892_v16  ;;  %v4829_v41 = vadd.f32 %v10771_v10, %v4790_v62  ;;  %v5059_v10 = vld [vmem:[#allocation16 + $0x30] sm:$0xff]  ;;  %5581 = vmatprep.subr.bf16.mxu0 %v11055_v19  ;;  %v11078_v62 = vld [vmem:[#allocation19 + $0x68] ss:$16 sps:$4 sm:$0xff]   ;;  %v4981_v44 = vld [vmem:[#allocation14] sm:$0x1] }
 0x473   : > { %v4955_v45 = vadd.f32 %v4954_v17, %v11035_v9  ;;  %v11063_v54 = vld [vmem:[#allocation19 + $0xac] ss:$16 sps:$4 sm:$0xff]  }
 0x474   : > { %vm4861_vm5 = vcmp.gt.f32.partialorder %v4829_v41, 0.0  ;;  %v4893_v43 = vmul.f32 0.001, %v4829_v41  ;;  %v11075_v16 = vld [vmem:[#allocation19 + $0x6c] ss:$16 sps:$4 sm:$0xff]  }
 0x475   : > { %5582 = vmatpush1.bf16.msra.mxu0 %v11060_v8 }
 0x476   : > { %v11040_v63 = vsel %vm4861_vm5, %v4829_v41, %v4893_v43  ;;  %5583 = vmatprep.subr.bf16.mxu0 %v11063_v54 }
 0x477   : > { %v4956_v59 = vadd.f32 %v4955_v45, %v11040_v63 }
 0x479   : > { %v4957_v47 = vrot.slane %v4956_v59, 4  ;;  %5584 = vmatpush1.bf16.msra.mxu0 %v11066_v7 }
 0x47a   : > { %5585 = vmatprep.subr.bf16.mxu0 %v11069_v26 }
 0x47b   : > { %v4958_v34 = vadd.f32 %v4957_v47, %v4956_v59  ;;  %v8301_v59 = vld [vmem:[#allocation19 + $0xe4] ss:$16 sps:$4 sm:$0xff]   ;;  %v8299_v47 = vld [vmem:[#allocation19 + $0xe0] ss:$16 sps:$4 sm:$0xff]  }
 0x47d   : > { %v4959_v2 = vrot.slane %v4958_v34, 2  ;;  %5586 = vmatpush1.bf16.msra.mxu0 %v11072_v21 }
 0x47e   : > { %5587 = vmatprep.subr.bf16.mxu0 %v11075_v16 }
 0x47f   : > { %v4960_v35 = vadd.f32 %v4959_v2, %v4958_v34  ;;  %v8307_v34 = vld [vmem:[#allocation19 + $0xc4] ss:$16 sps:$4 sm:$0xff]   ;;  %v8305_v2 = vld [vmem:[#allocation19 + $0xc0] ss:$16 sps:$4 sm:$0xff]  }
 0x481   : > { %v4961_v29 = vrot.slane %v4960_v35, 1  ;;  %5588 = vmatpush1.bf16.msra.mxu0 %v11078_v62 }
 0x483   : > { %v4962_v12 = vadd.f32 %v4961_v29, %v4960_v35  ;;  %v8310_v35 = vld [vmem:[#allocation19 + $0xa4] ss:$16 sps:$4 sm:$0xff]   ;;  %v8308_v29 = vld [vmem:[#allocation19 + $0xa0] ss:$16 sps:$4 sm:$0xff]  }
 0x485   : > { %v4964_v40 = vmul.f32 0.00390625, %v4962_v12  ;;  %v8313_v12 = vld [vmem:[#allocation19 + $0x84] ss:$16 sps:$4 sm:$0xff]  }
 0x487   : > { %7961 = vmatmul.mubr.f32.vlgmr.msra.gmra.mxu1 %v4964_v40  ;;  %v8311_v40 = vld [vmem:[#allocation19 + $0x80] ss:$16 sps:$4 sm:$0xff]  }
 0x488   : > { %7964 = vmatpush3.msra.mxu1 %v5060_v53  ;;  %7979 = vmatprep.mubr.msk.f32.mxu1 %vm8921_vm10, %v12275_v18  ;;  %vm5062_vm10 = vcmask 523264   ;;  %v8316_v53 = vld [vmem:[#allocation19 + $0x64] ss:$16 sps:$4 sm:$0xff]  }
 0x489   : > { %7965 = vmatprep.subr.mxu1 %v12275_v18 }
 0x48a   : > { %7966 = vmatpush3.msra.mxu1 %v5059_v10  ;;  %v8314_v10 = vld [vmem:[#allocation19 + $0x60] ss:$16 sps:$4 sm:$0xff]  }
 0x48b   : > { %7967 = vmatprep.subr.mxu1 %v12275_v18 }
 0x48c   : > { %7968 = vmatpush3.msra.mxu1 %v5058_v3  ;;  %v8322_v3 = vld [vmem:[#allocation19 + $0x44] ss:$16 sps:$4 sm:$0xff]  }
 0x48d   : > { %7969 = vmatprep.subr.mxu1 %v12275_v18 }
 0x48e   : > { %7970 = vmatpush3.msra.mxu1 %v5057_v5  ;;  %v11084_v5 = vld [vmem:[#allocation19 + $0x48] ss:$16 sps:$4 sm:$0xff]  }
 0x48f   : > { %7971 = vmatprep.subr.mxu1 %v12275_v18 }
 0x490   : > { %7972 = vmatpush3.msra.mxu1 %v5056_v39  ;;  %v11086_v39 = vld [vmem:[#allocation19 + $0x2c] ss:$16 sps:$4 sm:$0xff]  }
 0x491   : > { %7973 = vmatprep.subr.mxu1 %v12275_v18 }
 0x492   : > { %7974 = vmatpush3.msra.mxu1 %v5055_v33  ;;  %v8320_v33 = vld [vmem:[#allocation19 + $0x40] ss:$16 sps:$4 sm:$0xff]  }
 0x493   : > { %7975 = vmatprep.subr.mxu1 %v12275_v18 }
 0x494   : > { %7976 = vmatpush3.msra.mxu1 %v5054_v20  ;;  %v8325_v20 = vld [vmem:[#allocation19 + $0x24] ss:$16 sps:$4 sm:$0xff]  }
 0x495   : > { %7977 = vmatprep.subr.mxu1 %v12275_v18  ;;  %v11082_v18 = vld [vmem:[#allocation19 + $0x4c] ss:$16 sps:$4 sm:$0xff]  }
 0x496   : > { %7978 = vmatpush3.msra.mxu1 %v5053_v55  ;;  %5589 = vmatprep.subr.bf16.mxu0 %v11082_v18  ;;  %v11090_v55 = vld [vmem:[#allocation19 + $0x28] ss:$16 sps:$4 sm:$0xff]  }
 0x497   : > { %5386 = vmatprep.subr.bf16.mxu1 %v8301_v59  ;;  %5590 = vmatpush1.bf16.msra.mxu0 %v11084_v5  ;;  %v8326_v59 = vld [vmem:[#allocation19] ss:$16 sps:$4 sm:$0xff]  }
 0x498   : > { %5591 = vmatprep.subr.bf16.mxu0 %v11086_v39 }
 0x49b   : > { %5592 = vmatpush1.bf16.msra.mxu0 %v11090_v55 }
 0x547   : > { %v5048_v41 = vpop.f32.mrf.mxu1 }
 0x548   : > { %v5049_v17 = vadd.f32 %v5048_v41, %v4981_v44  ;;  %v8323_v44 = vld [vmem:[#allocation19 + $0x20] ss:$16 sps:$4 sm:$0xff]   ;;  %v11093_v41 = vld [vmem:[#allocation19 + $0xc] ss:$16 sps:$4 sm:$0xff]  }
 0x549   : > { %v7962_v43 = vpop.f32.mrf.mxu1  ;;  %5593 = vmatprep.subr.bf16.mxu0 %v11093_v41 }
 0x54a   : > { %v5052_v45 = vmax.f32 %v5049_v17, 0.0  ;;  %v8328_v17 = vld [vmem:[#allocation19 + $0x4] ss:$16 sps:$4 sm:$0xff]   ;;  %v8922_v43 = vmov 0  }
 0x54b   : > { %5611 = vmatprep.mubr.bf16.mxu0 %v8922_v43 }
 0x54c   : > { %7980 = vmatmul.mubr.msk.f32.vlgmr.msra.gmra.mxu1 %vm5062_vm10, %v5052_v45  ;;  %v11098_v45 = vld [vmem:[#allocation19 + $0x8] ss:$16 sps:$4 sm:$0xff]  }
 0x54d   : > { %5387 = vmatpush1.bf16.msra.mxu1 %v8299_v47  ;;  %5418 = vmatprep.mubr.bf16.mxu1 %v8922_v43  ;;  %v5061_v47 = vld [vmem:[#allocation17] sm:$0x1] }
 0x54e   : > { %5388 = vmatprep.subr.bf16.mxu1 %v8307_v34  ;;  %5594 = vmatpush1.bf16.msra.mxu0 %v11098_v45 }
 0x551   : > { %5389 = vmatpush1.bf16.msra.mxu1 %v8305_v2 }
 0x552   : > { %5390 = vmatprep.subr.bf16.mxu1 %v8310_v35 }
 0x555   : > { %5391 = vmatpush1.bf16.msra.mxu1 %v8308_v29 }
 0x556   : > { %5392 = vmatprep.subr.bf16.mxu1 %v8313_v12 }
 0x559   : > { %5393 = vmatpush1.bf16.msra.mxu1 %v8311_v40 }
 0x55a   : > { %5394 = vmatprep.subr.bf16.mxu1 %v8316_v53 }
 0x55d   : > { %5395 = vmatpush1.bf16.msra.mxu1 %v8314_v10  ;;  %v12276_v10 = vld [vmem:[#allocation33_spill] sm:$0xff] }
 0x55e   : > { %5396 = vmatprep.subr.bf16.mxu1 %v8322_v3  ;;  %v11104_v3 = vsub.s32 0, %v12276_v10 }
 0x561   : > { %5397 = vmatpush1.bf16.msra.mxu1 %v8320_v33 }
 0x562   : > { %5398 = vmatprep.subr.bf16.mxu1 %v8325_v20 }
 0x565   : > { %5399 = vmatpush1.bf16.msra.mxu1 %v8323_v44 }
 0x566   : > { %5400 = vmatprep.subr.bf16.mxu1 %v8328_v17 }
 0x569   : > { %5401 = vmatpush1.bf16.msra.mxu1 %v8326_v59 }
 0x56a   : > { %7982 = vmatprep.subr.bf16.mxu1 %v11053_v46 }
 0x60c   : > { %v5132_v34 = vpop.f32.mrf.mxu1 }
 0x60d   : > { %v5133_v2 = vadd.f32 %v5132_v34, %v5061_v47  ;;  %v5772_v34 = vld [vmem:[#allocation20] sm:$0xf] }
 0x60e   : > { %v7981_v35 = vpop.f32.mrf.mxu1 }
 0x60f   : > { %v5136_v29 = vsub.f32 0.0, %v5133_v2  ;;  %v5788_v2 = vsub.s32 3, %v12276_v10  ;;  %v5922_v35 = vld [vmem:[#allocation22] sm:$0xf] }
 0x611   : > { %v5137_v12 = vmul.f32 1.442695, %v5136_v29  ;;  %v11222_v29 = vrot.slane %v5772_v34, %v11104_v3 }
 0x613   : > { %8332 = vpow2.f32 %v5137_v12 }
 0x620   : > { %v8333_v40 = vpop.eup %8332 }
 0x621   : > { %v5139_v53 = vadd.f32 1.0, %v8333_v40  ;;  %v11233_v40 = vrot.slane %v5772_v34, %v5788_v2 }
 0x623   : > { %8334 = vrcp.f32 %v5139_v53 }
 0x630   : > { %v8335_v33 = vpop.eup %8334 }
 0x631   : > { %v11107_v20 = vrot.slane %v8335_v33, %v11104_v3 }
 0x633   : > { %v5146_v46 = vmul.f32 %v11107_v20, %v10817_v4  ;;  %v5147_v44 = vmul.f32 %v11107_v20, %v10807_v13  ;;  %v5148_v59 = vmul.f32 %v11107_v20, %v10820_v42  ;;  %v5149_v47 = vmul.f32 %v11107_v20, %v10842_v57 }
 0x634   : > { %v5150_v4 = vmul.f32 %v11107_v20, %v10857_v24  ;;  %v5151_v42 = vmul.f32 %v11107_v20, %v10863_v48  ;;  %v5152_v24 = vmul.f32 %v11107_v20, %v10872_v23  ;;  %v5153_v48 = vmul.f32 %v11107_v20, %v10879_v32 }
 0x635   : > { %v5178_v17 = vpack.c.bf16 %v5147_v44, %v5146_v46  ;;  %v5179_v13 = vpack.c.bf16 %v5149_v47, %v5148_v59  ;;  %v5154_v23 = vmul.f32 %v11107_v20, %v10890_v31  ;;  %v5155_v32 = vmul.f32 %v11107_v20, %v10898_v58 }
 0x636   : > { %v5180_v57 = vpack.c.bf16 %v5151_v42, %v5150_v4  ;;  %v5157_v31 = vmul.f32 %v11107_v20, %v10913_v36  ;;  %v5161_v36 = vmul.f32 %v11107_v20, %v10956_v51  ;;  %v5165_v51 = vmul.f32 %v11107_v20, %v10980_v60 }
 0x637   : > { %5419 = vmatmul.mubr.bf16.vlgmr.msra.gmra.mxu1 %v5178_v17  ;;  %5612 = vmatmul.mubr.bf16.vlgmr.msra.gmra.mxu0 %v5178_v17  ;;  %v5169_v60 = vmul.f32 %v11107_v20, %v11003_v14  ;;  %v5173_v14 = vmul.f32 %v11107_v20, %v11022_v15  ;;  %v5177_v15 = vmul.f32 %v11107_v20, %v11040_v63 }
 0x638   : > { %7990 = vmatpush1.bf16.msra.mxu1 %v11051_v27  ;;  %5428 = vmatprep.mubr.bf16.mxu1 %v8922_v43  ;;  %v5181_v27 = vpack.c.bf16 %v5153_v48, %v5152_v24  ;;  %v11227_v63 = vrot.slane %v5922_v35, %v11104_v3  ;;  %v11239_v44 = vrot.slane %v5922_v35, %v5788_v2  ;;  %v8339_v24 = vld [vmem:[%s9223_s17] sm:$0xff]  ;;  %v8346_v2 = vld [vmem:[%s9223_s17 + $0x38] sm:$0xff] }
 0x639   : > { %5621 = vmatprep.mubr.bf16.mxu0 %v8922_v43  ;;  %7983 = vmatprep.subr.bf16.mxu1 %v11055_v19  ;;  %v5182_v19 = vpack.c.bf16 %v5155_v32, %v5154_v23 }
 0x63c   : > { %7991 = vmatpush1.bf16.msra.mxu1 %v11060_v8  ;;  %v5156_v8 = vmul.f32 %v11107_v20, %v10911_v38  ;;  %v5160_v38 = vmul.f32 %v11107_v20, %v10944_v6  ;;  %v5164_v6 = vmul.f32 %v11107_v20, %v10973_v37  ;;  %v5168_v37 = vmul.f32 %v11107_v20, %v10997_v56 }
 0x63d   : > { %7984 = vmatprep.subr.bf16.mxu1 %v11063_v54  ;;  %v5158_v54 = vmul.f32 %v11107_v20, %v10925_v11  ;;  %v5162_v11 = vmul.f32 %v11107_v20, %v10959_v50  ;;  %v5166_v50 = vmul.f32 %v11107_v20, %v10987_v61  ;;  %v5170_v61 = vmul.f32 %v11107_v20, %v11008_v1 }
 0x63e   : > { %v5183_v58 = vpack.c.bf16 %v5157_v31, %v5156_v8  ;;  %v5172_v56 = vmul.f32 %v11107_v20, %v11017_v52  ;;  %v5174_v1 = vmul.f32 %v11107_v20, %v11026_v22  ;;  %v5176_v52 = vmul.f32 %v11107_v20, %v11035_v9 }
 0x63f   : > { %5429 = vmatmul.mubr.bf16.gmra.mxu1 %v5179_v13  ;;  %5622 = vmatmul.mubr.bf16.gmra.mxu0 %v5179_v13  ;;  %v5784_v22 = vsub.s32 2, %v12276_v10 }
 0x640   : > { %5438 = vmatprep.mubr.bf16.mxu1 %v8922_v43  ;;  %5631 = vmatprep.mubr.bf16.mxu0 %v8922_v43 }
 0x641   : > { %7992 = vmatpush1.bf16.msra.mxu1 %v11066_v7  ;;  %v5159_v7 = vmul.f32 %v11107_v20, %v10930_v0  ;;  %v5163_v0 = vmul.f32 %v11107_v20, %v10969_v30  ;;  %v5167_v30 = vmul.f32 %v11107_v20, %v10991_v28  ;;  %v5171_v28 = vmul.f32 %v11107_v20, %v11012_v49 }
 0x642   : > { %7985 = vmatprep.subr.bf16.mxu1 %v11069_v26  ;;  %v5175_v49 = vmul.f32 %v11107_v20, %v11031_v25  ;;  %v5780_v25 = vsub.s32 1, %v12276_v10  ;;  %v11224_v9 = vrot.slane %v5772_v34, %v5784_v22  ;;  %v11229_v12 = vrot.slane %v5922_v35, %v5784_v22 }
 0x643   : > { %v5184_v26 = vpack.c.bf16 %v5159_v7, %v5158_v54 }
 0x644   : > { %v11237_v46 = vrot.slane %v5922_v35, %v5780_v25 }
 0x645   : > { %7993 = vmatpush1.bf16.msra.mxu1 %v11072_v21  ;;  %v5185_v21 = vpack.c.bf16 %v5161_v36, %v5160_v38  ;;  %v8341_v38 = vld [vmem:[%s9223_s17 + $0x8] sm:$0xff] }
 0x646   : > { %7986 = vmatprep.subr.bf16.mxu1 %v11075_v16  ;;  %v5186_v16 = vpack.c.bf16 %v5163_v0, %v5162_v11 }
 0x647   : > { %5439 = vmatmul.mubr.bf16.gmra.mxu1 %v5180_v57  ;;  %5632 = vmatmul.mubr.bf16.gmra.mxu0 %v5180_v57 }
 0x648   : > { %5448 = vmatprep.mubr.bf16.mxu1 %v8922_v43  ;;  %5641 = vmatprep.mubr.bf16.mxu0 %v8922_v43 }
 0x649   : > { %7994 = vmatpush1.bf16.msra.mxu1 %v11078_v62  ;;  %v5187_v62 = vpack.c.bf16 %v5165_v51, %v5164_v6 }
 0x64a   : > { %7987 = vmatprep.subr.bf16.mxu1 %v11082_v18  ;;  %v5188_v18 = vpack.c.bf16 %v5167_v30, %v5166_v50 }
 0x64d   : > { %7995 = vmatpush1.bf16.msra.mxu1 %v11084_v5  ;;  %v5189_v5 = vpack.c.bf16 %v5169_v60, %v5168_v37 }
 0x64e   : > { %7988 = vmatprep.subr.bf16.mxu1 %v11086_v39  ;;  %v5190_v39 = vpack.c.bf16 %v5171_v28, %v5170_v61  ;;  %v8344_v28 = vld [vmem:[%s9223_s17 + $0x30] sm:$0xff] }
 0x64f   : > { %5449 = vmatmul.mubr.bf16.gmra.mxu1 %v5181_v27  ;;  %5642 = vmatmul.mubr.bf16.gmra.mxu0 %v5181_v27  ;;  %v8340_v27 = vld [vmem:[%s9223_s17 + $0x10] sm:$0xff] }
 0x650   : > { %5458 = vmatprep.mubr.bf16.mxu1 %v8922_v43  ;;  %5651 = vmatprep.mubr.bf16.mxu0 %v8922_v43 }
 0x651   : > { %7996 = vmatpush1.bf16.msra.mxu1 %v11090_v55  ;;  %v5191_v55 = vpack.c.bf16 %v5173_v14, %v5172_v56 }
 0x652   : > { %7989 = vmatprep.subr.bf16.mxu1 %v11093_v41  ;;  %v5192_v41 = vpack.c.bf16 %v5175_v49, %v5174_v1 }
 0x655   : > { %7997 = vmatpush1.bf16.msra.mxu1 %v11098_v45  ;;  %v5193_v45 = vpack.c.bf16 %v5177_v15, %v5176_v52 }
 0x657   : > { %5459 = vmatmul.mubr.bf16.gmra.mxu1 %v5182_v19  ;;  %5652 = vmatmul.mubr.bf16.gmra.mxu0 %v5182_v19 }
 0x658   : > { %5468 = vmatprep.mubr.bf16.mxu1 %v8922_v43  ;;  %5661 = vmatprep.mubr.bf16.mxu0 %v8922_v43 }
 0x65f   : > { %5469 = vmatmul.mubr.bf16.gmra.mxu1 %v5183_v58  ;;  %5662 = vmatmul.mubr.bf16.gmra.mxu0 %v5183_v58 }
 0x660   : > { %5478 = vmatprep.mubr.bf16.mxu1 %v8922_v43  ;;  %5671 = vmatprep.mubr.bf16.mxu0 %v8922_v43 }
 0x667   : > { %5479 = vmatmul.mubr.bf16.gmra.mxu1 %v5184_v26  ;;  %5672 = vmatmul.mubr.bf16.gmra.mxu0 %v5184_v26 }
 0x668   : > { %5488 = vmatprep.mubr.bf16.mxu1 %v8922_v43  ;;  %5681 = vmatprep.mubr.bf16.mxu0 %v8922_v43 }
 0x66f   : > { %5489 = vmatmul.mubr.bf16.gmra.mxu1 %v5185_v21  ;;  %5682 = vmatmul.mubr.bf16.gmra.mxu0 %v5185_v21  ;;  %v8342_v21 = vld [vmem:[%s9223_s17 + $0x18] sm:$0xff] }
 0x670   : > { %5498 = vmatprep.mubr.bf16.mxu1 %v8922_v43  ;;  %5691 = vmatprep.mubr.bf16.mxu0 %v8922_v43 }
 0x677   : > { %5499 = vmatmul.mubr.bf16.gmra.mxu1 %v5186_v16  ;;  %5692 = vmatmul.mubr.bf16.gmra.mxu0 %v5186_v16 }
 0x678   : > { %5508 = vmatprep.mubr.bf16.mxu1 %v8922_v43  ;;  %5701 = vmatprep.mubr.bf16.mxu0 %v8922_v43 }
 0x67f   : > { %5509 = vmatmul.mubr.bf16.gmra.mxu1 %v5187_v62  ;;  %5702 = vmatmul.mubr.bf16.gmra.mxu0 %v5187_v62 }
 0x680   : > { %5518 = vmatprep.mubr.bf16.mxu1 %v8922_v43  ;;  %5711 = vmatprep.mubr.bf16.mxu0 %v8922_v43 }
 0x687   : > { %5519 = vmatmul.mubr.bf16.gmra.mxu1 %v5188_v18  ;;  %5712 = vmatmul.mubr.bf16.gmra.mxu0 %v5188_v18 }
 0x688   : > { %5528 = vmatprep.mubr.bf16.mxu1 %v8922_v43  ;;  %5721 = vmatprep.mubr.bf16.mxu0 %v8922_v43 }
 0x68f   : > { %5529 = vmatmul.mubr.bf16.gmra.mxu1 %v5189_v5  ;;  %5722 = vmatmul.mubr.bf16.gmra.mxu0 %v5189_v5  ;;  %v8343_v5 = vld [vmem:[%s9223_s17 + $0x20] sm:$0xff] }
 0x690   : > { %5538 = vmatprep.mubr.bf16.mxu1 %v8922_v43  ;;  %5731 = vmatprep.mubr.bf16.mxu0 %v8922_v43 }
 0x697   : > { %5539 = vmatmul.mubr.bf16.gmra.mxu1 %v5190_v39  ;;  %5732 = vmatmul.mubr.bf16.gmra.mxu0 %v5190_v39 }
 0x698   : > { %5548 = vmatprep.mubr.bf16.mxu1 %v8922_v43  ;;  %5741 = vmatprep.mubr.bf16.mxu0 %v8922_v43 }
 0x69f   : > { %5549 = vmatmul.mubr.bf16.gmra.mxu1 %v5191_v55  ;;  %5742 = vmatmul.mubr.bf16.gmra.mxu0 %v5191_v55 }
 0x6a0   : > { %5558 = vmatprep.mubr.bf16.mxu1 %v8922_v43  ;;  %5751 = vmatprep.mubr.bf16.mxu0 %v8922_v43 }
 0x6a7   : > { %5559 = vmatmul.mubr.bf16.gmra.mxu1 %v5192_v41  ;;  %5752 = vmatmul.mubr.bf16.gmra.mxu0 %v5192_v41 }
 0x6a8   : > { %5568 = vmatprep.mubr.bf16.mxu1 %v8922_v43 }
 0x6af   : > { %5569 = vmatmul.mubr.bf16.gmra.mxu1 %v5193_v45 }
 0x6b0   : > { %5761 = vmatprep.mubr.bf16.mxu1 %v8922_v43  ;;  %v11231_v43 = vrot.slane %v5772_v34, %v5780_v25  ;;  %v8345_v34 = vld [vmem:[%s9223_s17 + $0x28] sm:$0xff] }
 0x6b7   : > { %5762 = vmatmul.mubr.bf16.vlgmr.msra.gmra.mxu1 %v5193_v45 }
 0x6f7   : > { %v5420_v53 = vpop.f32.mrf.mxu1  ;;  %v5613_v33 = vpop.f32.mrf.mxu0 }
 0x6f8   : > { %v5794_v10 = vmul.f32 %v11222_v29, %v5420_v53  ;;  %v5796_v20 = vmul.f32 %v11224_v9, %v5613_v33 }
 0x6f9   : > { %v5422_v3 = vpop.f32.mrf.mxu1  ;;  %v5615_v17 = vpop.f32.mrf.mxu0 }
 0x6fa   : > { %v5944_v59 = vadd.f32 %v11227_v63, %v5794_v10  ;;  %v5946_v47 = vadd.f32 %v11229_v12, %v5796_v20  ;;  %v5795_v13 = vmul.f32 %v11231_v43, %v5422_v3  ;;  %v5797_v4 = vmul.f32 %v11233_v40, %v5615_v17  ;;  %v8347_v10 = vld [vmem:[%s9223_s17 + $0x40] sm:$0xff]  ;;  %v8348_v3 = vld [vmem:[%s9223_s17 + $0x50] sm:$0xff] }
 0x6fb   : > { %v5424_v42 = vpop.f32.mrf.mxu1  ;;  %v5617_v57 = vpop.f32.mrf.mxu0 }
 0x6fc   : > { %v6072_v48 = vadd.f32 %v8339_v24, %v5944_v59  ;;  %v6074_v23 = vadd.f32 %v8340_v27, %v5946_v47  ;;  %v5945_v32 = vadd.f32 %v11237_v46, %v5795_v13  ;;  %v5947_v19 = vadd.f32 %v11239_v44, %v5797_v4 }
 0x6fd   : > { %v5798_v8 = vmul.f32 %v11222_v29, %v5424_v42  ;;  %v5800_v31 = vmul.f32 %v11224_v9, %v5617_v57  ;;  %v5426_v58 = vpop.f32.mrf.mxu1  ;;  %v5619_v54 = vpop.f32.mrf.mxu0 }
 0x6fe   : > { %v6200_v7 = vmax.f32 %v6072_v48, 0.0  ;;  %v6202_v26 = vmax.f32 %v6074_v23, 0.0  ;;  %v6073_v36 = vadd.f32 %v8341_v38, %v5945_v32  ;;  %v6075_v11 = vadd.f32 %v8342_v21, %v5947_v19  ;;  %v8349_v32 = vld [vmem:[%s9223_s17 + $0x48] sm:$0xff] }
 0x6ff   : > { %v5948_v0 = vadd.f32 %v11227_v63, %v5798_v8  ;;  %v5950_v16 = vadd.f32 %v11229_v12, %v5800_v31  ;;  %v5799_v6 = vmul.f32 %v11231_v43, %v5426_v58  ;;  %v5801_v51 = vmul.f32 %v11233_v40, %v5619_v54  ;;  %v5430_v62 = vpop.f32.mrf.mxu1  ;;  %v5623_v50 = vpop.f32.mrf.mxu0  ;;  %v8350_v8 = vld [vmem:[%s9223_s17 + $0x58] sm:$0xff] }
 0x700   : > { %6328 = vst [vmem:[%s11259_s20] sm:$0xff] %v6200_v7  ;;  %6330 = vst [vmem:[%s11259_s20 + $0x10] sm:$0xff] %v6202_v26  ;;  %v6201_v30 = vmax.f32 %v6073_v36, 0.0  ;;  %v6203_v18 = vmax.f32 %v6075_v11, 0.0  ;;  %v5802_v37 = vmul.f32 %v11222_v29, %v5430_v62  ;;  %v5804_v60 = vmul.f32 %v11224_v9, %v5623_v50  ;;  %v8352_v62 = vld [vmem:[%s9223_s17 + $0x70] sm:$0xff] }
 0x701   : > { %v6076_v61 = vadd.f32 %v8343_v5, %v5948_v0  ;;  %v6078_v39 = vadd.f32 %v8344_v28, %v5950_v16  ;;  %v5949_v56 = vadd.f32 %v11237_v46, %v5799_v6  ;;  %v5951_v14 = vadd.f32 %v11239_v44, %v5801_v51  ;;  %v5432_v55 = vpop.f32.mrf.mxu1  ;;  %v5625_v1 = vpop.f32.mrf.mxu0  ;;  %v8351_v6 = vld [vmem:[%s9223_s17 + $0x60] sm:$0xff] }
 0x702   : > { %6329 = vst [vmem:[%s11259_s20 + $0x8] sm:$0xff] %v6201_v30  ;;  %6331 = vst [vmem:[%s11259_s20 + $0x18] sm:$0xff] %v6203_v18  ;;  %v5952_v49 = vadd.f32 %v11227_v63, %v5802_v37  ;;  %v5954_v41 = vadd.f32 %v11229_v12, %v5804_v60  ;;  %v5803_v52 = vmul.f32 %v11231_v43, %v5432_v55  ;;  %v8353_v55 = vld [vmem:[%s9223_s17 + $0x68] sm:$0xff] }
 0x703   : > { %v5805_v15 = vmul.f32 %v11233_v40, %v5625_v1  ;;  %v6204_v45 = vmax.f32 %v6076_v61, 0.0  ;;  %v6206_v22 = vmax.f32 %v6078_v39, 0.0  ;;  %v6077_v25 = vadd.f32 %v8345_v34, %v5949_v56  ;;  %v5434_v53 = vpop.f32.mrf.mxu1  ;;  %v5627_v33 = vpop.f32.mrf.mxu0  ;;  %v8356_v34 = vld [vmem:[%s9223_s17 + $0x90] sm:$0xff] }
 0x704   : > { %v6079_v35 = vadd.f32 %v8346_v2, %v5951_v14  ;;  %v6080_v20 = vadd.f32 %v8347_v10, %v5952_v49  ;;  %v6082_v17 = vadd.f32 %v8348_v3, %v5954_v41  ;;  %v5953_v59 = vadd.f32 %v11237_v46, %v5803_v52  ;;  %v8354_v49 = vld [vmem:[%s9223_s17 + $0x78] sm:$0xff] }
 0x705   : > { %v5955_v47 = vadd.f32 %v11239_v44, %v5805_v15  ;;  %6332 = vst [vmem:[%s11259_s20 + $0x20] sm:$0xff] %v6204_v45  ;;  %6334 = vst [vmem:[%s11259_s20 + $0x30] sm:$0xff] %v6206_v22  ;;  %v6205_v13 = vmax.f32 %v6077_v25, 0.0  ;;  %v5806_v42 = vmul.f32 %v11222_v29, %v5434_v53  ;;  %v5808_v57 = vmul.f32 %v11224_v9, %v5627_v33  ;;  %v5436_v24 = vpop.f32.mrf.mxu1  ;;  %v5629_v48 = vpop.f32.mrf.mxu0  ;;  %v8355_v45 = vld [vmem:[%s9223_s17 + $0x80] sm:$0xff] }
 0x706   : > { %v6207_v4 = vmax.f32 %v6079_v35, 0.0  ;;  %v6208_v27 = vmax.f32 %v6080_v20, 0.0  ;;  %v6210_v23 = vmax.f32 %v6082_v17, 0.0  ;;  %v6081_v19 = vadd.f32 %v8349_v32, %v5953_v59 }
 0x707   : > { %v6083_v31 = vadd.f32 %v8350_v8, %v5955_v47  ;;  %6333 = vst [vmem:[%s11259_s20 + $0x28] sm:$0xff] %v6205_v13  ;;  %v5956_v58 = vadd.f32 %v11227_v63, %v5806_v42  ;;  %v5958_v54 = vadd.f32 %v11229_v12, %v5808_v57  ;;  %v5807_v7 = vmul.f32 %v11231_v43, %v5436_v24  ;;  %v5440_v38 = vpop.f32.mrf.mxu1  ;;  %v5633_v36 = vpop.f32.mrf.mxu0  ;;  %v8357_v13 = vld [vmem:[%s9223_s17 + $0x88] sm:$0xff]  ;;  %v8358_v42 = vld [vmem:[%s9223_s17 + $0x98] sm:$0xff] }
 0x708   : > { %6335 = vst [vmem:[%s11259_s20 + $0x38] sm:$0xff] %v6207_v4  ;;  %v5809_v26 = vmul.f32 %v11233_v40, %v5629_v48  ;;  %6336 = vst [vmem:[%s11259_s20 + $0x40] sm:$0xff] %v6208_v27  ;;  %v6209_v21 = vmax.f32 %v6081_v19, 0.0  ;;  %v5810_v0 = vmul.f32 %v11222_v29, %v5440_v38  ;;  %v5812_v16 = vmul.f32 %v11224_v9, %v5633_v36  ;;  %v8360_v38 = vld [vmem:[%s9223_s17 + $0xb0] sm:$0xff] }
 0x709   : > { %6338 = vst [vmem:[%s11259_s20 + $0x50] sm:$0xff] %v6210_v23  ;;  %v6211_v11 = vmax.f32 %v6083_v31, 0.0  ;;  %v6084_v51 = vadd.f32 %v8351_v6, %v5956_v58  ;;  %v6086_v50 = vadd.f32 %v8352_v62, %v5958_v54  ;;  %v5957_v30 = vadd.f32 %v11237_v46, %v5807_v7  ;;  %v5442_v37 = vpop.f32.mrf.mxu1  ;;  %v5635_v60 = vpop.f32.mrf.mxu0  ;;  %v8359_v7 = vld [vmem:[%s9223_s17 + $0xa0] sm:$0xff] }
 0x70a   : > { %v5959_v18 = vadd.f32 %v11239_v44, %v5809_v26  ;;  %6337 = vst [vmem:[%s11259_s20 + $0x48] sm:$0xff] %v6209_v21  ;;  %v5960_v5 = vadd.f32 %v11227_v63, %v5810_v0  ;;  %v5962_v61 = vadd.f32 %v11229_v12, %v5812_v16  ;;  %v5811_v28 = vmul.f32 %v11231_v43, %v5442_v37  ;;  %v8361_v37 = vld [vmem:[%s9223_s17 + $0xa8] sm:$0xff] }
 0x70b   : > { %6339 = vst [vmem:[%s11259_s20 + $0x58] sm:$0xff] %v6211_v11  ;;  %v5813_v39 = vmul.f32 %v11233_v40, %v5635_v60  ;;  %v6212_v56 = vmax.f32 %v6084_v51, 0.0  ;;  %v6214_v14 = vmax.f32 %v6086_v50, 0.0  ;;  %v6085_v1 = vadd.f32 %v8353_v55, %v5957_v30  ;;  %v5444_v52 = vpop.f32.mrf.mxu1  ;;  %v5637_v15 = vpop.f32.mrf.mxu0  ;;  %v8364_v55 = vld [vmem:[%s9223_s17 + $0xd0] sm:$0xff] }
 0x70c   : > { %v6087_v41 = vadd.f32 %v8354_v49, %v5959_v18  ;;  %v6088_v22 = vadd.f32 %v8355_v45, %v5960_v5  ;;  %v6090_v25 = vadd.f32 %v8356_v34, %v5962_v61  ;;  %v5961_v2 = vadd.f32 %v11237_v46, %v5811_v28  ;;  %v8362_v5 = vld [vmem:[%s9223_s17 + $0xb8] sm:$0xff] }
 0x70d   : > { %v5963_v35 = vadd.f32 %v11239_v44, %v5813_v39  ;;  %6340 = vst [vmem:[%s11259_s20 + $0x60] sm:$0xff] %v6212_v56  ;;  %6342 = vst [vmem:[%s11259_s20 + $0x70] sm:$0xff] %v6214_v14  ;;  %v6213_v53 = vmax.f32 %v6085_v1, 0.0  ;;  %v5814_v10 = vmul.f32 %v11222_v29, %v5444_v52  ;;  %v5816_v20 = vmul.f32 %v11224_v9, %v5637_v15  ;;  %v5446_v3 = vpop.f32.mrf.mxu1  ;;  %v5639_v17 = vpop.f32.mrf.mxu0  ;;  %v8363_v56 = vld [vmem:[%s9223_s17 + $0xc0] sm:$0xff] }
 0x70e   : > { %v6215_v33 = vmax.f32 %v6087_v41, 0.0  ;;  %v6216_v59 = vmax.f32 %v6088_v22, 0.0  ;;  %v6218_v47 = vmax.f32 %v6090_v25, 0.0  ;;  %v6089_v4 = vadd.f32 %v8357_v13, %v5961_v2 }
 0x70f   : > { %v6091_v57 = vadd.f32 %v8358_v42, %v5963_v35  ;;  %6341 = vst [vmem:[%s11259_s20 + $0x68] sm:$0xff] %v6213_v53  ;;  %v5964_v24 = vadd.f32 %v11227_v63, %v5814_v10  ;;  %v5966_v48 = vadd.f32 %v11229_v12, %v5816_v20  ;;  %v5815_v27 = vmul.f32 %v11231_v43, %v5446_v3  ;;  %v5450_v32 = vpop.f32.mrf.mxu1  ;;  %v5643_v19 = vpop.f32.mrf.mxu0  ;;  %v8365_v53 = vld [vmem:[%s9223_s17 + $0xc8] sm:$0xff]  ;;  %v8366_v10 = vld [vmem:[%s9223_s17 + $0xd8] sm:$0xff] }
 0x710   : > { %6343 = vst [vmem:[%s11259_s20 + $0x78] sm:$0xff] %v6215_v33  ;;  %v5817_v23 = vmul.f32 %v11233_v40, %v5639_v17  ;;  %6344 = vst [vmem:[%s11259_s20 + $0x80] sm:$0xff] %v6216_v59  ;;  %v6217_v8 = vmax.f32 %v6089_v4, 0.0  ;;  %v5818_v58 = vmul.f32 %v11222_v29, %v5450_v32  ;;  %v5820_v54 = vmul.f32 %v11224_v9, %v5643_v19  ;;  %v8368_v32 = vld [vmem:[%s9223_s17 + $0xf0] sm:$0xff] }
 0x711   : > { %6346 = vst [vmem:[%s11259_s20 + $0x90] sm:$0xff] %v6218_v47  ;;  %v6219_v31 = vmax.f32 %v6091_v57, 0.0  ;;  %v6092_v26 = vadd.f32 %v8359_v7, %v5964_v24  ;;  %v6094_v36 = vadd.f32 %v8360_v38, %v5966_v48  ;;  %v5965_v21 = vadd.f32 %v11237_v46, %v5815_v27  ;;  %v5452_v0 = vpop.f32.mrf.mxu1  ;;  %v5645_v16 = vpop.f32.mrf.mxu0  ;;  %v8367_v27 = vld [vmem:[%s9223_s17 + $0xe0] sm:$0xff] }
 0x712   : > { %v5967_v11 = vadd.f32 %v11239_v44, %v5817_v23  ;;  %6345 = vst [vmem:[%s11259_s20 + $0x88] sm:$0xff] %v6217_v8  ;;  %v5968_v6 = vadd.f32 %v11227_v63, %v5818_v58  ;;  %v5970_v51 = vadd.f32 %v11229_v12, %v5820_v54  ;;  %v5819_v62 = vmul.f32 %v11231_v43, %v5452_v0  ;;  %v8369_v0 = vld [vmem:[%s9223_s17 + $0xe8] sm:$0xff] }
 0x713   : > { %6347 = vst [vmem:[%s11259_s20 + $0x98] sm:$0xff] %v6219_v31  ;;  %v5821_v50 = vmul.f32 %v11233_v40, %v5645_v16  ;;  %v6220_v30 = vmax.f32 %v6092_v26, 0.0  ;;  %v6222_v18 = vmax.f32 %v6094_v36, 0.0  ;;  %v6093_v60 = vadd.f32 %v8361_v37, %v5965_v21  ;;  %v5454_v28 = vpop.f32.mrf.mxu1  ;;  %v5647_v39 = vpop.f32.mrf.mxu0  ;;  %v8372_v37 = vld [vmem:[%s9223_s17 + $0x110] sm:$0xff] }
 0x714   : > { %v6095_v61 = vadd.f32 %v8362_v5, %v5967_v11  ;;  %v6096_v14 = vadd.f32 %v8363_v56, %v5968_v6  ;;  %v6098_v1 = vadd.f32 %v8364_v55, %v5970_v51  ;;  %v5969_v49 = vadd.f32 %v11237_v46, %v5819_v62  ;;  %v8370_v6 = vld [vmem:[%s9223_s17 + $0xf8] sm:$0xff] }
 0x715   : > { %v5971_v41 = vadd.f32 %v11239_v44, %v5821_v50  ;;  %6348 = vst [vmem:[%s11259_s20 + $0xa0] sm:$0xff] %v6220_v30  ;;  %6350 = vst [vmem:[%s11259_s20 + $0xb0] sm:$0xff] %v6222_v18  ;;  %v6221_v52 = vmax.f32 %v6093_v60, 0.0  ;;  %v5822_v45 = vmul.f32 %v11222_v29, %v5454_v28  ;;  %v5824_v22 = vmul.f32 %v11224_v9, %v5647_v39  ;;  %v5456_v34 = vpop.f32.mrf.mxu1  ;;  %v5649_v25 = vpop.f32.mrf.mxu0  ;;  %v8371_v30 = vld [vmem:[%s9223_s17 + $0x100] sm:$0xff] }
 0x716   : > { %v6223_v15 = vmax.f32 %v6095_v61, 0.0  ;;  %v6224_v2 = vmax.f32 %v6096_v14, 0.0  ;;  %v6226_v35 = vmax.f32 %v6098_v1, 0.0  ;;  %v6097_v33 = vadd.f32 %v8365_v53, %v5969_v49 }
 0x717   : > { %v6099_v20 = vadd.f32 %v8366_v10, %v5971_v41  ;;  %6349 = vst [vmem:[%s11259_s20 + $0xa8] sm:$0xff] %v6221_v52  ;;  %v5972_v3 = vadd.f32 %v11227_v63, %v5822_v45  ;;  %v5974_v17 = vadd.f32 %v11229_v12, %v5824_v22  ;;  %v5823_v59 = vmul.f32 %v11231_v43, %v5456_v34  ;;  %v5460_v13 = vpop.f32.mrf.mxu1  ;;  %v5653_v4 = vpop.f32.mrf.mxu0  ;;  %v8373_v52 = vld [vmem:[%s9223_s17 + $0x108] sm:$0xff]  ;;  %v8374_v45 = vld [vmem:[%s9223_s17 + $0x118] sm:$0xff] }
 0x718   : > { %6351 = vst [vmem:[%s11259_s20 + $0xb8] sm:$0xff] %v6223_v15  ;;  %v5825_v47 = vmul.f32 %v11233_v40, %v5649_v25  ;;  %6352 = vst [vmem:[%s11259_s20 + $0xc0] sm:$0xff] %v6224_v2  ;;  %v6225_v42 = vmax.f32 %v6097_v33, 0.0  ;;  %v5826_v24 = vmul.f32 %v11222_v29, %v5460_v13  ;;  %v5828_v48 = vmul.f32 %v11224_v9, %v5653_v4  ;;  %v8376_v13 = vld [vmem:[%s9223_s17 + $0x130] sm:$0xff] }
 0x719   : > { %6354 = vst [vmem:[%s11259_s20 + $0xd0] sm:$0xff] %v6226_v35  ;;  %v6227_v57 = vmax.f32 %v6099_v20, 0.0  ;;  %v6100_v23 = vadd.f32 %v8367_v27, %v5972_v3  ;;  %v6102_v19 = vadd.f32 %v8368_v32, %v5974_v17  ;;  %v5973_v8 = vadd.f32 %v11237_v46, %v5823_v59  ;;  %v5462_v58 = vpop.f32.mrf.mxu1  ;;  %v5655_v54 = vpop.f32.mrf.mxu0  ;;  %v8375_v59 = vld [vmem:[%s9223_s17 + $0x120] sm:$0xff] }
 0x71a   : > { %v5975_v31 = vadd.f32 %v11239_v44, %v5825_v47  ;;  %6353 = vst [vmem:[%s11259_s20 + $0xc8] sm:$0xff] %v6225_v42  ;;  %v5976_v7 = vadd.f32 %v11227_v63, %v5826_v24  ;;  %v5978_v26 = vadd.f32 %v11229_v12, %v5828_v48  ;;  %v5827_v38 = vmul.f32 %v11231_v43, %v5462_v58  ;;  %v8377_v58 = vld [vmem:[%s9223_s17 + $0x128] sm:$0xff] }
 0x71b   : > { %6355 = vst [vmem:[%s11259_s20 + $0xd8] sm:$0xff] %v6227_v57  ;;  %v5829_v36 = vmul.f32 %v11233_v40, %v5655_v54  ;;  %v6228_v21 = vmax.f32 %v6100_v23, 0.0  ;;  %v6230_v11 = vmax.f32 %v6102_v19, 0.0  ;;  %v6101_v16 = vadd.f32 %v8369_v0, %v5973_v8  ;;  %v5464_v62 = vpop.f32.mrf.mxu1  ;;  %v5657_v50 = vpop.f32.mrf.mxu0  ;;  %v8380_v0 = vld [vmem:[%s9223_s17 + $0x150] sm:$0xff] }
 0x71c   : > { %v6103_v51 = vadd.f32 %v8370_v6, %v5975_v31  ;;  %v6104_v18 = vadd.f32 %v8371_v30, %v5976_v7  ;;  %v6106_v60 = vadd.f32 %v8372_v37, %v5978_v26  ;;  %v5977_v5 = vadd.f32 %v11237_v46, %v5827_v38  ;;  %v8378_v7 = vld [vmem:[%s9223_s17 + $0x138] sm:$0xff] }
 0x71d   : > { %v5979_v61 = vadd.f32 %v11239_v44, %v5829_v36  ;;  %6356 = vst [vmem:[%s11259_s20 + $0xe0] sm:$0xff] %v6228_v21  ;;  %6358 = vst [vmem:[%s11259_s20 + $0xf0] sm:$0xff] %v6230_v11  ;;  %v6229_v28 = vmax.f32 %v6101_v16, 0.0  ;;  %v5830_v56 = vmul.f32 %v11222_v29, %v5464_v62  ;;  %v5832_v14 = vmul.f32 %v11224_v9, %v5657_v50  ;;  %v5466_v55 = vpop.f32.mrf.mxu1  ;;  %v5659_v1 = vpop.f32.mrf.mxu0  ;;  %v8379_v21 = vld [vmem:[%s9223_s17 + $0x140] sm:$0xff] }
 0x71e   : > { %v6231_v39 = vmax.f32 %v6103_v51, 0.0  ;;  %v6232_v49 = vmax.f32 %v6104_v18, 0.0  ;;  %v6234_v41 = vmax.f32 %v6106_v60, 0.0  ;;  %v6105_v15 = vadd.f32 %v8373_v52, %v5977_v5 }
 0x71f   : > { %v6107_v22 = vadd.f32 %v8374_v45, %v5979_v61  ;;  %6357 = vst [vmem:[%s11259_s20 + $0xe8] sm:$0xff] %v6229_v28  ;;  %v5980_v34 = vadd.f32 %v11227_v63, %v5830_v56  ;;  %v5982_v25 = vadd.f32 %v11229_v12, %v5832_v14  ;;  %v5831_v2 = vmul.f32 %v11231_v43, %v5466_v55  ;;  %v5470_v53 = vpop.f32.mrf.mxu1  ;;  %v5663_v33 = vpop.f32.mrf.mxu0  ;;  %v8381_v28 = vld [vmem:[%s9223_s17 + $0x148] sm:$0xff]  ;;  %v8382_v56 = vld [vmem:[%s9223_s17 + $0x158] sm:$0xff] }
 0x720   : > { %6359 = vst [vmem:[%s11259_s20 + $0xf8] sm:$0xff] %v6231_v39  ;;  %v5833_v35 = vmul.f32 %v11233_v40, %v5659_v1  ;;  %6360 = vst [vmem:[%s11259_s20 + $0x100] sm:$0xff] %v6232_v49  ;;  %v6233_v10 = vmax.f32 %v6105_v15, 0.0  ;;  %v5834_v3 = vmul.f32 %v11222_v29, %v5470_v53  ;;  %v5836_v17 = vmul.f32 %v11224_v9, %v5663_v33  ;;  %v8384_v53 = vld [vmem:[%s9223_s17 + $0x170] sm:$0xff] }
 0x721   : > { %6362 = vst [vmem:[%s11259_s20 + $0x110] sm:$0xff] %v6234_v41  ;;  %v6235_v20 = vmax.f32 %v6107_v22, 0.0  ;;  %v6108_v47 = vadd.f32 %v8375_v59, %v5980_v34  ;;  %v6110_v4 = vadd.f32 %v8376_v13, %v5982_v25  ;;  %v5981_v42 = vadd.f32 %v11237_v46, %v5831_v2  ;;  %v5472_v24 = vpop.f32.mrf.mxu1  ;;  %v5665_v48 = vpop.f32.mrf.mxu0  ;;  %v8383_v2 = vld [vmem:[%s9223_s17 + $0x160] sm:$0xff] }
 0x722   : > { %v5983_v57 = vadd.f32 %v11239_v44, %v5833_v35  ;;  %6361 = vst [vmem:[%s11259_s20 + $0x108] sm:$0xff] %v6233_v10  ;;  %v5984_v27 = vadd.f32 %v11227_v63, %v5834_v3  ;;  %v5986_v23 = vadd.f32 %v11229_v12, %v5836_v17  ;;  %v5835_v32 = vmul.f32 %v11231_v43, %v5472_v24  ;;  %v8385_v24 = vld [vmem:[%s9223_s17 + $0x168] sm:$0xff] }
 0x723   : > { %6363 = vst [vmem:[%s11259_s20 + $0x118] sm:$0xff] %v6235_v20  ;;  %v5837_v19 = vmul.f32 %v11233_v40, %v5665_v48  ;;  %v6236_v8 = vmax.f32 %v6108_v47, 0.0  ;;  %v6238_v31 = vmax.f32 %v6110_v4, 0.0  ;;  %v6109_v54 = vadd.f32 %v8377_v58, %v5981_v42  ;;  %v5474_v38 = vpop.f32.mrf.mxu1  ;;  %v5667_v36 = vpop.f32.mrf.mxu0  ;;  %v8388_v58 = vld [vmem:[%s9223_s17 + $0x190] sm:$0xff] }
 0x724   : > { %v6111_v26 = vadd.f32 %v8378_v7, %v5983_v57  ;;  %v6112_v11 = vadd.f32 %v8379_v21, %v5984_v27  ;;  %v6114_v16 = vadd.f32 %v8380_v0, %v5986_v23  ;;  %v5985_v6 = vadd.f32 %v11237_v46, %v5835_v32  ;;  %v8386_v27 = vld [vmem:[%s9223_s17 + $0x178] sm:$0xff] }
 0x725   : > { %v5987_v51 = vadd.f32 %v11239_v44, %v5837_v19  ;;  %6364 = vst [vmem:[%s11259_s20 + $0x120] sm:$0xff] %v6236_v8  ;;  %6366 = vst [vmem:[%s11259_s20 + $0x130] sm:$0xff] %v6238_v31  ;;  %v6237_v62 = vmax.f32 %v6109_v54, 0.0  ;;  %v5838_v30 = vmul.f32 %v11222_v29, %v5474_v38  ;;  %v5840_v18 = vmul.f32 %v11224_v9, %v5667_v36  ;;  %v5476_v37 = vpop.f32.mrf.mxu1  ;;  %v5669_v60 = vpop.f32.mrf.mxu0  ;;  %v8387_v8 = vld [vmem:[%s9223_s17 + $0x180] sm:$0xff] }
 0x726   : > { %v6239_v50 = vmax.f32 %v6111_v26, 0.0  ;;  %v6240_v5 = vmax.f32 %v6112_v11, 0.0  ;;  %v6242_v61 = vmax.f32 %v6114_v16, 0.0  ;;  %v6113_v39 = vadd.f32 %v8381_v28, %v5985_v6 }
 0x727   : > { %v6115_v14 = vadd.f32 %v8382_v56, %v5987_v51  ;;  %6365 = vst [vmem:[%s11259_s20 + $0x128] sm:$0xff] %v6237_v62  ;;  %v5988_v55 = vadd.f32 %v11227_v63, %v5838_v30  ;;  %v5990_v1 = vadd.f32 %v11229_v12, %v5840_v18  ;;  %v5839_v49 = vmul.f32 %v11231_v43, %v5476_v37  ;;  %v5480_v52 = vpop.f32.mrf.mxu1  ;;  %v5673_v15 = vpop.f32.mrf.mxu0  ;;  %v8389_v62 = vld [vmem:[%s9223_s17 + $0x188] sm:$0xff]  ;;  %v8390_v30 = vld [vmem:[%s9223_s17 + $0x198] sm:$0xff] }
 0x728   : > { %6367 = vst [vmem:[%s11259_s20 + $0x138] sm:$0xff] %v6239_v50  ;;  %v5841_v41 = vmul.f32 %v11233_v40, %v5669_v60  ;;  %6368 = vst [vmem:[%s11259_s20 + $0x140] sm:$0xff] %v6240_v5  ;;  %v6241_v45 = vmax.f32 %v6113_v39, 0.0  ;;  %v5842_v34 = vmul.f32 %v11222_v29, %v5480_v52  ;;  %v5844_v25 = vmul.f32 %v11224_v9, %v5673_v15  ;;  %v8392_v52 = vld [vmem:[%s9223_s17 + $0x1b0] sm:$0xff] }
 0x729   : > { %6370 = vst [vmem:[%s11259_s20 + $0x150] sm:$0xff] %v6242_v61  ;;  %v6243_v22 = vmax.f32 %v6115_v14, 0.0  ;;  %v6116_v35 = vadd.f32 %v8383_v2, %v5988_v55  ;;  %v6118_v33 = vadd.f32 %v8384_v53, %v5990_v1  ;;  %v5989_v10 = vadd.f32 %v11237_v46, %v5839_v49  ;;  %v5482_v3 = vpop.f32.mrf.mxu1  ;;  %v5675_v17 = vpop.f32.mrf.mxu0  ;;  %v8391_v49 = vld [vmem:[%s9223_s17 + $0x1a0] sm:$0xff] }
 0x72a   : > { %v5991_v20 = vadd.f32 %v11239_v44, %v5841_v41  ;;  %6369 = vst [vmem:[%s11259_s20 + $0x148] sm:$0xff] %v6241_v45  ;;  %v5992_v59 = vadd.f32 %v11227_v63, %v5842_v34  ;;  %v5994_v47 = vadd.f32 %v11229_v12, %v5844_v25  ;;  %v5843_v13 = vmul.f32 %v11231_v43, %v5482_v3  ;;  %v8393_v3 = vld [vmem:[%s9223_s17 + $0x1a8] sm:$0xff] }
 0x72b   : > { %6371 = vst [vmem:[%s11259_s20 + $0x158] sm:$0xff] %v6243_v22  ;;  %v5845_v4 = vmul.f32 %v11233_v40, %v5675_v17  ;;  %v6244_v42 = vmax.f32 %v6116_v35, 0.0  ;;  %v6246_v57 = vmax.f32 %v6118_v33, 0.0  ;;  %v6117_v48 = vadd.f32 %v8385_v24, %v5989_v10  ;;  %v5484_v32 = vpop.f32.mrf.mxu1  ;;  %v5677_v19 = vpop.f32.mrf.mxu0  ;;  %v8396_v24 = vld [vmem:[%s9223_s17 + $0x1d0] sm:$0xff] }
 0x72c   : > { %v6119_v23 = vadd.f32 %v8386_v27, %v5991_v20  ;;  %v6120_v31 = vadd.f32 %v8387_v8, %v5992_v59  ;;  %v6122_v54 = vadd.f32 %v8388_v58, %v5994_v47  ;;  %v5993_v7 = vadd.f32 %v11237_v46, %v5843_v13  ;;  %v8394_v59 = vld [vmem:[%s9223_s17 + $0x1b8] sm:$0xff] }
 0x72d   : > { %v5995_v26 = vadd.f32 %v11239_v44, %v5845_v4  ;;  %6372 = vst [vmem:[%s11259_s20 + $0x160] sm:$0xff] %v6244_v42  ;;  %6374 = vst [vmem:[%s11259_s20 + $0x170] sm:$0xff] %v6246_v57  ;;  %v6245_v38 = vmax.f32 %v6117_v48, 0.0  ;;  %v5846_v21 = vmul.f32 %v11222_v29, %v5484_v32  ;;  %v5848_v11 = vmul.f32 %v11224_v9, %v5677_v19  ;;  %v5486_v0 = vpop.f32.mrf.mxu1  ;;  %v5679_v16 = vpop.f32.mrf.mxu0  ;;  %v8395_v42 = vld [vmem:[%s9223_s17 + $0x1c0] sm:$0xff] }
 0x72e   : > { %v6247_v36 = vmax.f32 %v6119_v23, 0.0  ;;  %v6248_v6 = vmax.f32 %v6120_v31, 0.0  ;;  %v6250_v51 = vmax.f32 %v6122_v54, 0.0  ;;  %v6121_v50 = vadd.f32 %v8389_v62, %v5993_v7 }
 0x72f   : > { %v6123_v18 = vadd.f32 %v8390_v30, %v5995_v26  ;;  %6373 = vst [vmem:[%s11259_s20 + $0x168] sm:$0xff] %v6245_v38  ;;  %v5996_v37 = vadd.f32 %v11227_v63, %v5846_v21  ;;  %v5998_v60 = vadd.f32 %v11229_v12, %v5848_v11  ;;  %v5847_v5 = vmul.f32 %v11231_v43, %v5486_v0  ;;  %v5490_v28 = vpop.f32.mrf.mxu1  ;;  %v5683_v39 = vpop.f32.mrf.mxu0  ;;  %v8397_v38 = vld [vmem:[%s9223_s17 + $0x1c8] sm:$0xff]  ;;  %v8398_v21 = vld [vmem:[%s9223_s17 + $0x1d8] sm:$0xff] }
 0x730   : > { %6375 = vst [vmem:[%s11259_s20 + $0x178] sm:$0xff] %v6247_v36  ;;  %v5849_v61 = vmul.f32 %v11233_v40, %v5679_v16  ;;  %6376 = vst [vmem:[%s11259_s20 + $0x180] sm:$0xff] %v6248_v6  ;;  %v6249_v56 = vmax.f32 %v6121_v50, 0.0  ;;  %v5850_v55 = vmul.f32 %v11222_v29, %v5490_v28  ;;  %v5852_v1 = vmul.f32 %v11224_v9, %v5683_v39  ;;  %v8400_v28 = vld [vmem:[%s9223_s17 + $0x1f0] sm:$0xff] }
 0x731   : > { %6378 = vst [vmem:[%s11259_s20 + $0x190] sm:$0xff] %v6250_v51  ;;  %v6251_v14 = vmax.f32 %v6123_v18, 0.0  ;;  %v6124_v41 = vadd.f32 %v8391_v49, %v5996_v37  ;;  %v6126_v15 = vadd.f32 %v8392_v52, %v5998_v60  ;;  %v5997_v45 = vadd.f32 %v11237_v46, %v5847_v5  ;;  %v5492_v34 = vpop.f32.mrf.mxu1  ;;  %v5685_v25 = vpop.f32.mrf.mxu0  ;;  %v8399_v5 = vld [vmem:[%s9223_s17 + $0x1e0] sm:$0xff] }
 0x732   : > { %v5999_v22 = vadd.f32 %v11239_v44, %v5849_v61  ;;  %6377 = vst [vmem:[%s11259_s20 + $0x188] sm:$0xff] %v6249_v56  ;;  %v6000_v2 = vadd.f32 %v11227_v63, %v5850_v55  ;;  %v6002_v35 = vadd.f32 %v11229_v12, %v5852_v1  ;;  %v5851_v53 = vmul.f32 %v11231_v43, %v5492_v34  ;;  %v8401_v34 = vld [vmem:[%s9223_s17 + $0x1e8] sm:$0xff] }
 0x733   : > { %6379 = vst [vmem:[%s11259_s20 + $0x198] sm:$0xff] %v6251_v14  ;;  %v5853_v33 = vmul.f32 %v11233_v40, %v5685_v25  ;;  %v6252_v10 = vmax.f32 %v6124_v41, 0.0  ;;  %v6254_v20 = vmax.f32 %v6126_v15, 0.0  ;;  %v6125_v17 = vadd.f32 %v8393_v3, %v5997_v45  ;;  %v5494_v13 = vpop.f32.mrf.mxu1  ;;  %v5687_v4 = vpop.f32.mrf.mxu0  ;;  %v8404_v3 = vld [vmem:[%s9223_s17 + $0x210] sm:$0xff] }
 0x734   : > { %v6127_v47 = vadd.f32 %v8394_v59, %v5999_v22  ;;  %v6128_v57 = vadd.f32 %v8395_v42, %v6000_v2  ;;  %v6130_v48 = vadd.f32 %v8396_v24, %v6002_v35  ;;  %v6001_v27 = vadd.f32 %v11237_v46, %v5851_v53  ;;  %v8402_v2 = vld [vmem:[%s9223_s17 + $0x1f8] sm:$0xff] }
 0x735   : > { %v6003_v23 = vadd.f32 %v11239_v44, %v5853_v33  ;;  %6380 = vst [vmem:[%s11259_s20 + $0x1a0] sm:$0xff] %v6252_v10  ;;  %6382 = vst [vmem:[%s11259_s20 + $0x1b0] sm:$0xff] %v6254_v20  ;;  %v6253_v32 = vmax.f32 %v6125_v17, 0.0  ;;  %v5854_v8 = vmul.f32 %v11222_v29, %v5494_v13  ;;  %v5856_v31 = vmul.f32 %v11224_v9, %v5687_v4  ;;  %v5496_v58 = vpop.f32.mrf.mxu1  ;;  %v5689_v54 = vpop.f32.mrf.mxu0  ;;  %v8403_v10 = vld [vmem:[%s9223_s17 + $0x200] sm:$0xff] }
 0x736   : > { %v6255_v19 = vmax.f32 %v6127_v47, 0.0  ;;  %v6256_v7 = vmax.f32 %v6128_v57, 0.0  ;;  %v6258_v26 = vmax.f32 %v6130_v48, 0.0  ;;  %v6129_v36 = vadd.f32 %v8397_v38, %v6001_v27 }
 0x737   : > { %v6131_v11 = vadd.f32 %v8398_v21, %v6003_v23  ;;  %6381 = vst [vmem:[%s11259_s20 + $0x1a8] sm:$0xff] %v6253_v32  ;;  %v6004_v0 = vadd.f32 %v11227_v63, %v5854_v8  ;;  %v6006_v16 = vadd.f32 %v11229_v12, %v5856_v31  ;;  %v5855_v6 = vmul.f32 %v11231_v43, %v5496_v58  ;;  %v5500_v62 = vpop.f32.mrf.mxu1  ;;  %v5693_v50 = vpop.f32.mrf.mxu0  ;;  %v8405_v32 = vld [vmem:[%s9223_s17 + $0x208] sm:$0xff]  ;;  %v8406_v8 = vld [vmem:[%s9223_s17 + $0x218] sm:$0xff] }
 0x738   : > { %6383 = vst [vmem:[%s11259_s20 + $0x1b8] sm:$0xff] %v6255_v19  ;;  %v5857_v51 = vmul.f32 %v11233_v40, %v5689_v54  ;;  %6384 = vst [vmem:[%s11259_s20 + $0x1c0] sm:$0xff] %v6256_v7  ;;  %v6257_v30 = vmax.f32 %v6129_v36, 0.0  ;;  %v5858_v37 = vmul.f32 %v11222_v29, %v5500_v62  ;;  %v5860_v60 = vmul.f32 %v11224_v9, %v5693_v50  ;;  %v8408_v62 = vld [vmem:[%s9223_s17 + $0x230] sm:$0xff] }
 0x739   : > { %6386 = vst [vmem:[%s11259_s20 + $0x1d0] sm:$0xff] %v6258_v26  ;;  %v6259_v18 = vmax.f32 %v6131_v11, 0.0  ;;  %v6132_v61 = vadd.f32 %v8399_v5, %v6004_v0  ;;  %v6134_v39 = vadd.f32 %v8400_v28, %v6006_v16  ;;  %v6005_v56 = vadd.f32 %v11237_v46, %v5855_v6  ;;  %v5502_v55 = vpop.f32.mrf.mxu1  ;;  %v5695_v1 = vpop.f32.mrf.mxu0  ;;  %v8407_v6 = vld [vmem:[%s9223_s17 + $0x220] sm:$0xff] }
 0x73a   : > { %v6007_v14 = vadd.f32 %v11239_v44, %v5857_v51  ;;  %6385 = vst [vmem:[%s11259_s20 + $0x1c8] sm:$0xff] %v6257_v30  ;;  %v6008_v49 = vadd.f32 %v11227_v63, %v5858_v37  ;;  %v6010_v41 = vadd.f32 %v11229_v12, %v5860_v60  ;;  %v5859_v52 = vmul.f32 %v11231_v43, %v5502_v55  ;;  %v8409_v55 = vld [vmem:[%s9223_s17 + $0x228] sm:$0xff] }
 0x73b   : > { %6387 = vst [vmem:[%s11259_s20 + $0x1d8] sm:$0xff] %v6259_v18  ;;  %v5861_v15 = vmul.f32 %v11233_v40, %v5695_v1  ;;  %v6260_v45 = vmax.f32 %v6132_v61, 0.0  ;;  %v6262_v22 = vmax.f32 %v6134_v39, 0.0  ;;  %v6133_v25 = vadd.f32 %v8401_v34, %v6005_v56  ;;  %v5504_v53 = vpop.f32.mrf.mxu1  ;;  %v5697_v33 = vpop.f32.mrf.mxu0  ;;  %v8412_v34 = vld [vmem:[%s9223_s17 + $0x250] sm:$0xff] }
 0x73c   : > { %v6135_v35 = vadd.f32 %v8402_v2, %v6007_v14  ;;  %v6136_v20 = vadd.f32 %v8403_v10, %v6008_v49  ;;  %v6138_v17 = vadd.f32 %v8404_v3, %v6010_v41  ;;  %v6009_v59 = vadd.f32 %v11237_v46, %v5859_v52  ;;  %v8410_v49 = vld [vmem:[%s9223_s17 + $0x238] sm:$0xff] }
 0x73d   : > { %v6011_v47 = vadd.f32 %v11239_v44, %v5861_v15  ;;  %6388 = vst [vmem:[%s11259_s20 + $0x1e0] sm:$0xff] %v6260_v45  ;;  %6390 = vst [vmem:[%s11259_s20 + $0x1f0] sm:$0xff] %v6262_v22  ;;  %v6261_v13 = vmax.f32 %v6133_v25, 0.0  ;;  %v5862_v42 = vmul.f32 %v11222_v29, %v5504_v53  ;;  %v5864_v57 = vmul.f32 %v11224_v9, %v5697_v33  ;;  %v5506_v24 = vpop.f32.mrf.mxu1  ;;  %v5699_v48 = vpop.f32.mrf.mxu0  ;;  %v8411_v45 = vld [vmem:[%s9223_s17 + $0x240] sm:$0xff] }
 0x73e   : > { %v6263_v4 = vmax.f32 %v6135_v35, 0.0  ;;  %v6264_v27 = vmax.f32 %v6136_v20, 0.0  ;;  %v6266_v23 = vmax.f32 %v6138_v17, 0.0  ;;  %v6137_v19 = vadd.f32 %v8405_v32, %v6009_v59 }
 0x73f   : > { %v6139_v31 = vadd.f32 %v8406_v8, %v6011_v47  ;;  %6389 = vst [vmem:[%s11259_s20 + $0x1e8] sm:$0xff] %v6261_v13  ;;  %v6012_v58 = vadd.f32 %v11227_v63, %v5862_v42  ;;  %v6014_v54 = vadd.f32 %v11229_v12, %v5864_v57  ;;  %v5863_v7 = vmul.f32 %v11231_v43, %v5506_v24  ;;  %v5510_v38 = vpop.f32.mrf.mxu1  ;;  %v5703_v36 = vpop.f32.mrf.mxu0  ;;  %v8413_v13 = vld [vmem:[%s9223_s17 + $0x248] sm:$0xff]  ;;  %v8414_v42 = vld [vmem:[%s9223_s17 + $0x258] sm:$0xff] }
 0x740   : > { %6391 = vst [vmem:[%s11259_s20 + $0x1f8] sm:$0xff] %v6263_v4  ;;  %v5865_v26 = vmul.f32 %v11233_v40, %v5699_v48  ;;  %6392 = vst [vmem:[%s11259_s20 + $0x200] sm:$0xff] %v6264_v27  ;;  %v6265_v21 = vmax.f32 %v6137_v19, 0.0  ;;  %v5866_v0 = vmul.f32 %v11222_v29, %v5510_v38  ;;  %v5868_v16 = vmul.f32 %v11224_v9, %v5703_v36  ;;  %v8416_v38 = vld [vmem:[%s9223_s17 + $0x270] sm:$0xff] }
 0x741   : > { %6394 = vst [vmem:[%s11259_s20 + $0x210] sm:$0xff] %v6266_v23  ;;  %v6267_v11 = vmax.f32 %v6139_v31, 0.0  ;;  %v6140_v51 = vadd.f32 %v8407_v6, %v6012_v58  ;;  %v6142_v50 = vadd.f32 %v8408_v62, %v6014_v54  ;;  %v6013_v30 = vadd.f32 %v11237_v46, %v5863_v7  ;;  %v5512_v37 = vpop.f32.mrf.mxu1  ;;  %v5705_v60 = vpop.f32.mrf.mxu0  ;;  %v8415_v7 = vld [vmem:[%s9223_s17 + $0x260] sm:$0xff] }
 0x742   : > { %v6015_v18 = vadd.f32 %v11239_v44, %v5865_v26  ;;  %6393 = vst [vmem:[%s11259_s20 + $0x208] sm:$0xff] %v6265_v21  ;;  %v6016_v5 = vadd.f32 %v11227_v63, %v5866_v0  ;;  %v6018_v61 = vadd.f32 %v11229_v12, %v5868_v16  ;;  %v5867_v28 = vmul.f32 %v11231_v43, %v5512_v37  ;;  %v8417_v37 = vld [vmem:[%s9223_s17 + $0x268] sm:$0xff] }
 0x743   : > { %6395 = vst [vmem:[%s11259_s20 + $0x218] sm:$0xff] %v6267_v11  ;;  %v5869_v39 = vmul.f32 %v11233_v40, %v5705_v60  ;;  %v6268_v56 = vmax.f32 %v6140_v51, 0.0  ;;  %v6270_v14 = vmax.f32 %v6142_v50, 0.0  ;;  %v6141_v1 = vadd.f32 %v8409_v55, %v6013_v30  ;;  %v5514_v52 = vpop.f32.mrf.mxu1  ;;  %v5707_v15 = vpop.f32.mrf.mxu0  ;;  %v8420_v55 = vld [vmem:[%s9223_s17 + $0x290] sm:$0xff] }
 0x744   : > { %v6143_v41 = vadd.f32 %v8410_v49, %v6015_v18  ;;  %v6144_v22 = vadd.f32 %v8411_v45, %v6016_v5  ;;  %v6146_v25 = vadd.f32 %v8412_v34, %v6018_v61  ;;  %v6017_v2 = vadd.f32 %v11237_v46, %v5867_v28  ;;  %v8418_v5 = vld [vmem:[%s9223_s17 + $0x278] sm:$0xff] }
 0x745   : > { %v6019_v35 = vadd.f32 %v11239_v44, %v5869_v39  ;;  %6396 = vst [vmem:[%s11259_s20 + $0x220] sm:$0xff] %v6268_v56  ;;  %6398 = vst [vmem:[%s11259_s20 + $0x230] sm:$0xff] %v6270_v14  ;;  %v6269_v53 = vmax.f32 %v6141_v1, 0.0  ;;  %v5870_v10 = vmul.f32 %v11222_v29, %v5514_v52  ;;  %v5872_v20 = vmul.f32 %v11224_v9, %v5707_v15  ;;  %v5516_v3 = vpop.f32.mrf.mxu1  ;;  %v5709_v17 = vpop.f32.mrf.mxu0  ;;  %v8419_v56 = vld [vmem:[%s9223_s17 + $0x280] sm:$0xff] }
 0x746   : > { %v6271_v33 = vmax.f32 %v6143_v41, 0.0  ;;  %v6272_v59 = vmax.f32 %v6144_v22, 0.0  ;;  %v6274_v47 = vmax.f32 %v6146_v25, 0.0  ;;  %v6145_v4 = vadd.f32 %v8413_v13, %v6017_v2 }
 0x747   : > { %v6147_v57 = vadd.f32 %v8414_v42, %v6019_v35  ;;  %6397 = vst [vmem:[%s11259_s20 + $0x228] sm:$0xff] %v6269_v53  ;;  %v6020_v24 = vadd.f32 %v11227_v63, %v5870_v10  ;;  %v6022_v48 = vadd.f32 %v11229_v12, %v5872_v20  ;;  %v5871_v27 = vmul.f32 %v11231_v43, %v5516_v3  ;;  %v5520_v32 = vpop.f32.mrf.mxu1  ;;  %v5713_v19 = vpop.f32.mrf.mxu0  ;;  %v8421_v53 = vld [vmem:[%s9223_s17 + $0x288] sm:$0xff]  ;;  %v8422_v10 = vld [vmem:[%s9223_s17 + $0x298] sm:$0xff] }
 0x748   : > { %6399 = vst [vmem:[%s11259_s20 + $0x238] sm:$0xff] %v6271_v33  ;;  %v5873_v23 = vmul.f32 %v11233_v40, %v5709_v17  ;;  %6400 = vst [vmem:[%s11259_s20 + $0x240] sm:$0xff] %v6272_v59  ;;  %v6273_v8 = vmax.f32 %v6145_v4, 0.0  ;;  %v5874_v58 = vmul.f32 %v11222_v29, %v5520_v32  ;;  %v5876_v54 = vmul.f32 %v11224_v9, %v5713_v19  ;;  %v8424_v32 = vld [vmem:[%s9223_s17 + $0x2b0] sm:$0xff] }
 0x749   : > { %6402 = vst [vmem:[%s11259_s20 + $0x250] sm:$0xff] %v6274_v47  ;;  %v6275_v31 = vmax.f32 %v6147_v57, 0.0  ;;  %v6148_v26 = vadd.f32 %v8415_v7, %v6020_v24  ;;  %v6150_v36 = vadd.f32 %v8416_v38, %v6022_v48  ;;  %v6021_v21 = vadd.f32 %v11237_v46, %v5871_v27  ;;  %v5522_v0 = vpop.f32.mrf.mxu1  ;;  %v5715_v16 = vpop.f32.mrf.mxu0  ;;  %v8423_v27 = vld [vmem:[%s9223_s17 + $0x2a0] sm:$0xff] }
 0x74a   : > { %v6023_v11 = vadd.f32 %v11239_v44, %v5873_v23  ;;  %6401 = vst [vmem:[%s11259_s20 + $0x248] sm:$0xff] %v6273_v8  ;;  %v6024_v6 = vadd.f32 %v11227_v63, %v5874_v58  ;;  %v6026_v51 = vadd.f32 %v11229_v12, %v5876_v54  ;;  %v5875_v62 = vmul.f32 %v11231_v43, %v5522_v0  ;;  %v8425_v0 = vld [vmem:[%s9223_s17 + $0x2a8] sm:$0xff] }
 0x74b   : > { %6403 = vst [vmem:[%s11259_s20 + $0x258] sm:$0xff] %v6275_v31  ;;  %v5877_v50 = vmul.f32 %v11233_v40, %v5715_v16  ;;  %v6276_v30 = vmax.f32 %v6148_v26, 0.0  ;;  %v6278_v18 = vmax.f32 %v6150_v36, 0.0  ;;  %v6149_v60 = vadd.f32 %v8417_v37, %v6021_v21  ;;  %v5524_v28 = vpop.f32.mrf.mxu1  ;;  %v5717_v39 = vpop.f32.mrf.mxu0  ;;  %v8428_v37 = vld [vmem:[%s9223_s17 + $0x2d0] sm:$0xff] }
 0x74c   : > { %v6151_v61 = vadd.f32 %v8418_v5, %v6023_v11  ;;  %v6152_v14 = vadd.f32 %v8419_v56, %v6024_v6  ;;  %v6154_v1 = vadd.f32 %v8420_v55, %v6026_v51  ;;  %v6025_v49 = vadd.f32 %v11237_v46, %v5875_v62  ;;  %v8426_v6 = vld [vmem:[%s9223_s17 + $0x2b8] sm:$0xff] }
 0x74d   : > { %v6027_v41 = vadd.f32 %v11239_v44, %v5877_v50  ;;  %6404 = vst [vmem:[%s11259_s20 + $0x260] sm:$0xff] %v6276_v30  ;;  %6406 = vst [vmem:[%s11259_s20 + $0x270] sm:$0xff] %v6278_v18  ;;  %v6277_v52 = vmax.f32 %v6149_v60, 0.0  ;;  %v5878_v45 = vmul.f32 %v11222_v29, %v5524_v28  ;;  %v5880_v22 = vmul.f32 %v11224_v9, %v5717_v39  ;;  %v5526_v34 = vpop.f32.mrf.mxu1  ;;  %v5719_v25 = vpop.f32.mrf.mxu0  ;;  %v8427_v30 = vld [vmem:[%s9223_s17 + $0x2c0] sm:$0xff] }
 0x74e   : > { %v6279_v15 = vmax.f32 %v6151_v61, 0.0  ;;  %v6280_v2 = vmax.f32 %v6152_v14, 0.0  ;;  %v6282_v35 = vmax.f32 %v6154_v1, 0.0  ;;  %v6153_v33 = vadd.f32 %v8421_v53, %v6025_v49 }
 0x74f   : > { %v6155_v20 = vadd.f32 %v8422_v10, %v6027_v41  ;;  %6405 = vst [vmem:[%s11259_s20 + $0x268] sm:$0xff] %v6277_v52  ;;  %v6028_v3 = vadd.f32 %v11227_v63, %v5878_v45  ;;  %v6030_v17 = vadd.f32 %v11229_v12, %v5880_v22  ;;  %v5879_v59 = vmul.f32 %v11231_v43, %v5526_v34  ;;  %v5530_v13 = vpop.f32.mrf.mxu1  ;;  %v5723_v4 = vpop.f32.mrf.mxu0  ;;  %v8429_v52 = vld [vmem:[%s9223_s17 + $0x2c8] sm:$0xff]  ;;  %v8430_v45 = vld [vmem:[%s9223_s17 + $0x2d8] sm:$0xff] }
 0x750   : > { %6407 = vst [vmem:[%s11259_s20 + $0x278] sm:$0xff] %v6279_v15  ;;  %v5881_v47 = vmul.f32 %v11233_v40, %v5719_v25  ;;  %6408 = vst [vmem:[%s11259_s20 + $0x280] sm:$0xff] %v6280_v2  ;;  %v6281_v42 = vmax.f32 %v6153_v33, 0.0  ;;  %v5882_v24 = vmul.f32 %v11222_v29, %v5530_v13  ;;  %v5884_v48 = vmul.f32 %v11224_v9, %v5723_v4  ;;  %v8432_v13 = vld [vmem:[%s9223_s17 + $0x2f0] sm:$0xff] }
 0x751   : > { %6410 = vst [vmem:[%s11259_s20 + $0x290] sm:$0xff] %v6282_v35  ;;  %v6283_v57 = vmax.f32 %v6155_v20, 0.0  ;;  %v6156_v23 = vadd.f32 %v8423_v27, %v6028_v3  ;;  %v6158_v19 = vadd.f32 %v8424_v32, %v6030_v17  ;;  %v6029_v8 = vadd.f32 %v11237_v46, %v5879_v59  ;;  %v5532_v58 = vpop.f32.mrf.mxu1  ;;  %v5725_v54 = vpop.f32.mrf.mxu0  ;;  %v8431_v59 = vld [vmem:[%s9223_s17 + $0x2e0] sm:$0xff] }
 0x752   : > { %v6031_v31 = vadd.f32 %v11239_v44, %v5881_v47  ;;  %6409 = vst [vmem:[%s11259_s20 + $0x288] sm:$0xff] %v6281_v42  ;;  %v6032_v7 = vadd.f32 %v11227_v63, %v5882_v24  ;;  %v6034_v26 = vadd.f32 %v11229_v12, %v5884_v48  ;;  %v5883_v38 = vmul.f32 %v11231_v43, %v5532_v58  ;;  %v8433_v58 = vld [vmem:[%s9223_s17 + $0x2e8] sm:$0xff] }
 0x753   : > { %6411 = vst [vmem:[%s11259_s20 + $0x298] sm:$0xff] %v6283_v57  ;;  %v5885_v36 = vmul.f32 %v11233_v40, %v5725_v54  ;;  %v6284_v21 = vmax.f32 %v6156_v23, 0.0  ;;  %v6286_v11 = vmax.f32 %v6158_v19, 0.0  ;;  %v6157_v16 = vadd.f32 %v8425_v0, %v6029_v8  ;;  %v5534_v62 = vpop.f32.mrf.mxu1  ;;  %v5727_v50 = vpop.f32.mrf.mxu0  ;;  %v8436_v0 = vld [vmem:[%s9223_s17 + $0x310] sm:$0xff] }
 0x754   : > { %v6159_v51 = vadd.f32 %v8426_v6, %v6031_v31  ;;  %v6160_v18 = vadd.f32 %v8427_v30, %v6032_v7  ;;  %v6162_v60 = vadd.f32 %v8428_v37, %v6034_v26  ;;  %v6033_v5 = vadd.f32 %v11237_v46, %v5883_v38  ;;  %v8434_v7 = vld [vmem:[%s9223_s17 + $0x2f8] sm:$0xff] }
 0x755   : > { %v6035_v61 = vadd.f32 %v11239_v44, %v5885_v36  ;;  %6412 = vst [vmem:[%s11259_s20 + $0x2a0] sm:$0xff] %v6284_v21  ;;  %6414 = vst [vmem:[%s11259_s20 + $0x2b0] sm:$0xff] %v6286_v11  ;;  %v6285_v28 = vmax.f32 %v6157_v16, 0.0  ;;  %v5886_v56 = vmul.f32 %v11222_v29, %v5534_v62  ;;  %v5888_v14 = vmul.f32 %v11224_v9, %v5727_v50  ;;  %v5536_v55 = vpop.f32.mrf.mxu1  ;;  %v5729_v1 = vpop.f32.mrf.mxu0  ;;  %v8435_v21 = vld [vmem:[%s9223_s17 + $0x300] sm:$0xff] }
 0x756   : > { %v6287_v39 = vmax.f32 %v6159_v51, 0.0  ;;  %v6288_v49 = vmax.f32 %v6160_v18, 0.0  ;;  %v6290_v41 = vmax.f32 %v6162_v60, 0.0  ;;  %v6161_v15 = vadd.f32 %v8429_v52, %v6033_v5 }
 0x757   : > { %v6163_v22 = vadd.f32 %v8430_v45, %v6035_v61  ;;  %6413 = vst [vmem:[%s11259_s20 + $0x2a8] sm:$0xff] %v6285_v28  ;;  %v6036_v34 = vadd.f32 %v11227_v63, %v5886_v56  ;;  %v6038_v25 = vadd.f32 %v11229_v12, %v5888_v14  ;;  %v5887_v2 = vmul.f32 %v11231_v43, %v5536_v55  ;;  %v5540_v53 = vpop.f32.mrf.mxu1  ;;  %v5733_v33 = vpop.f32.mrf.mxu0  ;;  %v8437_v28 = vld [vmem:[%s9223_s17 + $0x308] sm:$0xff]  ;;  %v8438_v56 = vld [vmem:[%s9223_s17 + $0x318] sm:$0xff] }
 0x758   : > { %6415 = vst [vmem:[%s11259_s20 + $0x2b8] sm:$0xff] %v6287_v39  ;;  %v5889_v35 = vmul.f32 %v11233_v40, %v5729_v1  ;;  %6416 = vst [vmem:[%s11259_s20 + $0x2c0] sm:$0xff] %v6288_v49  ;;  %v6289_v10 = vmax.f32 %v6161_v15, 0.0  ;;  %v5890_v3 = vmul.f32 %v11222_v29, %v5540_v53  ;;  %v5892_v17 = vmul.f32 %v11224_v9, %v5733_v33  ;;  %v8440_v53 = vld [vmem:[%s9223_s17 + $0x330] sm:$0xff] }
 0x759   : > { %6418 = vst [vmem:[%s11259_s20 + $0x2d0] sm:$0xff] %v6290_v41  ;;  %v6291_v20 = vmax.f32 %v6163_v22, 0.0  ;;  %v6164_v47 = vadd.f32 %v8431_v59, %v6036_v34  ;;  %v6166_v4 = vadd.f32 %v8432_v13, %v6038_v25  ;;  %v6037_v42 = vadd.f32 %v11237_v46, %v5887_v2  ;;  %v5542_v24 = vpop.f32.mrf.mxu1  ;;  %v5735_v48 = vpop.f32.mrf.mxu0  ;;  %v8439_v2 = vld [vmem:[%s9223_s17 + $0x320] sm:$0xff] }
 0x75a   : > { %v6039_v57 = vadd.f32 %v11239_v44, %v5889_v35  ;;  %6417 = vst [vmem:[%s11259_s20 + $0x2c8] sm:$0xff] %v6289_v10  ;;  %v6040_v27 = vadd.f32 %v11227_v63, %v5890_v3  ;;  %v6042_v23 = vadd.f32 %v11229_v12, %v5892_v17  ;;  %v5891_v32 = vmul.f32 %v11231_v43, %v5542_v24  ;;  %v8441_v24 = vld [vmem:[%s9223_s17 + $0x328] sm:$0xff] }
 0x75b   : > { %6419 = vst [vmem:[%s11259_s20 + $0x2d8] sm:$0xff] %v6291_v20  ;;  %v5893_v19 = vmul.f32 %v11233_v40, %v5735_v48  ;;  %v6292_v8 = vmax.f32 %v6164_v47, 0.0  ;;  %v6294_v31 = vmax.f32 %v6166_v4, 0.0  ;;  %v6165_v54 = vadd.f32 %v8433_v58, %v6037_v42  ;;  %v5544_v38 = vpop.f32.mrf.mxu1  ;;  %v5737_v36 = vpop.f32.mrf.mxu0  ;;  %v8444_v58 = vld [vmem:[%s9223_s17 + $0x350] sm:$0xff] }
 0x75c   : > { %v6167_v26 = vadd.f32 %v8434_v7, %v6039_v57  ;;  %v6168_v11 = vadd.f32 %v8435_v21, %v6040_v27  ;;  %v6170_v16 = vadd.f32 %v8436_v0, %v6042_v23  ;;  %v6041_v6 = vadd.f32 %v11237_v46, %v5891_v32  ;;  %v8442_v27 = vld [vmem:[%s9223_s17 + $0x338] sm:$0xff] }
 0x75d   : > { %v6043_v51 = vadd.f32 %v11239_v44, %v5893_v19  ;;  %6420 = vst [vmem:[%s11259_s20 + $0x2e0] sm:$0xff] %v6292_v8  ;;  %6422 = vst [vmem:[%s11259_s20 + $0x2f0] sm:$0xff] %v6294_v31  ;;  %v6293_v62 = vmax.f32 %v6165_v54, 0.0  ;;  %v5894_v30 = vmul.f32 %v11222_v29, %v5544_v38  ;;  %v5896_v18 = vmul.f32 %v11224_v9, %v5737_v36  ;;  %v5546_v37 = vpop.f32.mrf.mxu1  ;;  %v5739_v60 = vpop.f32.mrf.mxu0  ;;  %v8443_v8 = vld [vmem:[%s9223_s17 + $0x340] sm:$0xff] }
 0x75e   : > { %v6295_v50 = vmax.f32 %v6167_v26, 0.0  ;;  %v6296_v5 = vmax.f32 %v6168_v11, 0.0  ;;  %v6298_v61 = vmax.f32 %v6170_v16, 0.0  ;;  %v6169_v39 = vadd.f32 %v8437_v28, %v6041_v6 }
 0x75f   : > { %v6171_v14 = vadd.f32 %v8438_v56, %v6043_v51  ;;  %6421 = vst [vmem:[%s11259_s20 + $0x2e8] sm:$0xff] %v6293_v62  ;;  %v6044_v55 = vadd.f32 %v11227_v63, %v5894_v30  ;;  %v6046_v1 = vadd.f32 %v11229_v12, %v5896_v18  ;;  %v5895_v49 = vmul.f32 %v11231_v43, %v5546_v37  ;;  %v5550_v52 = vpop.f32.mrf.mxu1  ;;  %v5743_v15 = vpop.f32.mrf.mxu0  ;;  %v8445_v62 = vld [vmem:[%s9223_s17 + $0x348] sm:$0xff]  ;;  %v8446_v30 = vld [vmem:[%s9223_s17 + $0x358] sm:$0xff] }
 0x760   : > { %6423 = vst [vmem:[%s11259_s20 + $0x2f8] sm:$0xff] %v6295_v50  ;;  %v5897_v41 = vmul.f32 %v11233_v40, %v5739_v60  ;;  %6424 = vst [vmem:[%s11259_s20 + $0x300] sm:$0xff] %v6296_v5  ;;  %v6297_v45 = vmax.f32 %v6169_v39, 0.0  ;;  %v5898_v34 = vmul.f32 %v11222_v29, %v5550_v52  ;;  %v5900_v25 = vmul.f32 %v11224_v9, %v5743_v15  ;;  %v8448_v52 = vld [vmem:[%s9223_s17 + $0x370] sm:$0xff] }
 0x761   : > { %6426 = vst [vmem:[%s11259_s20 + $0x310] sm:$0xff] %v6298_v61  ;;  %v6299_v22 = vmax.f32 %v6171_v14, 0.0  ;;  %v6172_v35 = vadd.f32 %v8439_v2, %v6044_v55  ;;  %v6174_v33 = vadd.f32 %v8440_v53, %v6046_v1  ;;  %v6045_v10 = vadd.f32 %v11237_v46, %v5895_v49  ;;  %v5552_v3 = vpop.f32.mrf.mxu1  ;;  %v5745_v17 = vpop.f32.mrf.mxu0  ;;  %v8447_v49 = vld [vmem:[%s9223_s17 + $0x360] sm:$0xff] }
 0x762   : > { %v6047_v20 = vadd.f32 %v11239_v44, %v5897_v41  ;;  %6425 = vst [vmem:[%s11259_s20 + $0x308] sm:$0xff] %v6297_v45  ;;  %v6048_v59 = vadd.f32 %v11227_v63, %v5898_v34  ;;  %v6050_v47 = vadd.f32 %v11229_v12, %v5900_v25  ;;  %v5899_v13 = vmul.f32 %v11231_v43, %v5552_v3  ;;  %v8449_v3 = vld [vmem:[%s9223_s17 + $0x368] sm:$0xff] }
 0x763   : > { %6427 = vst [vmem:[%s11259_s20 + $0x318] sm:$0xff] %v6299_v22  ;;  %v5901_v4 = vmul.f32 %v11233_v40, %v5745_v17  ;;  %v6300_v42 = vmax.f32 %v6172_v35, 0.0  ;;  %v6302_v57 = vmax.f32 %v6174_v33, 0.0  ;;  %v6173_v48 = vadd.f32 %v8441_v24, %v6045_v10  ;;  %v5554_v32 = vpop.f32.mrf.mxu1  ;;  %v5747_v19 = vpop.f32.mrf.mxu0  ;;  %v8452_v24 = vld [vmem:[%s9223_s17 + $0x390] sm:$0xff] }
 0x764   : > { %v6175_v23 = vadd.f32 %v8442_v27, %v6047_v20  ;;  %v6176_v31 = vadd.f32 %v8443_v8, %v6048_v59  ;;  %v6178_v54 = vadd.f32 %v8444_v58, %v6050_v47  ;;  %v6049_v7 = vadd.f32 %v11237_v46, %v5899_v13  ;;  %v8450_v59 = vld [vmem:[%s9223_s17 + $0x378] sm:$0xff] }
 0x765   : > { %v6051_v26 = vadd.f32 %v11239_v44, %v5901_v4  ;;  %6428 = vst [vmem:[%s11259_s20 + $0x320] sm:$0xff] %v6300_v42  ;;  %6430 = vst [vmem:[%s11259_s20 + $0x330] sm:$0xff] %v6302_v57  ;;  %v6301_v38 = vmax.f32 %v6173_v48, 0.0  ;;  %v5902_v21 = vmul.f32 %v11222_v29, %v5554_v32  ;;  %v5904_v11 = vmul.f32 %v11224_v9, %v5747_v19  ;;  %v5556_v0 = vpop.f32.mrf.mxu1  ;;  %v5749_v16 = vpop.f32.mrf.mxu0  ;;  %v8451_v42 = vld [vmem:[%s9223_s17 + $0x380] sm:$0xff] }
 0x766   : > { %v6303_v36 = vmax.f32 %v6175_v23, 0.0  ;;  %v6304_v6 = vmax.f32 %v6176_v31, 0.0  ;;  %v6306_v51 = vmax.f32 %v6178_v54, 0.0  ;;  %v6177_v50 = vadd.f32 %v8445_v62, %v6049_v7 }
 0x767   : > { %v6179_v18 = vadd.f32 %v8446_v30, %v6051_v26  ;;  %6429 = vst [vmem:[%s11259_s20 + $0x328] sm:$0xff] %v6301_v38  ;;  %v6052_v37 = vadd.f32 %v11227_v63, %v5902_v21  ;;  %v6054_v60 = vadd.f32 %v11229_v12, %v5904_v11  ;;  %v5903_v5 = vmul.f32 %v11231_v43, %v5556_v0  ;;  %v5560_v28 = vpop.f32.mrf.mxu1  ;;  %v5753_v39 = vpop.f32.mrf.mxu0  ;;  %v8453_v38 = vld [vmem:[%s9223_s17 + $0x388] sm:$0xff]  ;;  %v8454_v21 = vld [vmem:[%s9223_s17 + $0x398] sm:$0xff] }
 0x768   : > { %6431 = vst [vmem:[%s11259_s20 + $0x338] sm:$0xff] %v6303_v36  ;;  %v5905_v61 = vmul.f32 %v11233_v40, %v5749_v16  ;;  %6432 = vst [vmem:[%s11259_s20 + $0x340] sm:$0xff] %v6304_v6  ;;  %v6305_v56 = vmax.f32 %v6177_v50, 0.0  ;;  %v5906_v55 = vmul.f32 %v11222_v29, %v5560_v28  ;;  %v5908_v1 = vmul.f32 %v11224_v9, %v5753_v39 }
 0x769   : > { %6434 = vst [vmem:[%s11259_s20 + $0x350] sm:$0xff] %v6306_v51  ;;  %v6307_v14 = vmax.f32 %v6179_v18, 0.0  ;;  %v6180_v41 = vadd.f32 %v8447_v49, %v6052_v37  ;;  %v6182_v15 = vadd.f32 %v8448_v52, %v6054_v60  ;;  %v6053_v45 = vadd.f32 %v11237_v46, %v5903_v5  ;;  %v5562_v34 = vpop.f32.mrf.mxu1  ;;  %v5755_v25 = vpop.f32.mrf.mxu0  ;;  %v8455_v37 = vld [vmem:[%s9223_s17 + $0x3a0] sm:$0xff]  ;;  %v8456_v5 = vld [vmem:[%s9223_s17 + $0x3b0] sm:$0xff] }
 0x76a   : > { %v6055_v22 = vadd.f32 %v11239_v44, %v5905_v61  ;;  %6433 = vst [vmem:[%s11259_s20 + $0x348] sm:$0xff] %v6305_v56  ;;  %v6056_v2 = vadd.f32 %v11227_v63, %v5906_v55  ;;  %v6058_v35 = vadd.f32 %v11229_v12, %v5908_v1  ;;  %v5907_v53 = vmul.f32 %v11231_v43, %v5562_v34  ;;  %v8459_v34 = vld [vmem:[%s9223_s17 + $0x3c0] sm:$0xff] }
 0x76b   : > { %6435 = vst [vmem:[%s11259_s20 + $0x358] sm:$0xff] %v6307_v14  ;;  %v5909_v33 = vmul.f32 %v11233_v40, %v5755_v25  ;;  %v6308_v10 = vmax.f32 %v6180_v41, 0.0  ;;  %v6310_v20 = vmax.f32 %v6182_v15, 0.0  ;;  %v6181_v17 = vadd.f32 %v8449_v3, %v6053_v45  ;;  %v5564_v13 = vpop.f32.mrf.mxu1  ;;  %v5757_v4 = vpop.f32.mrf.mxu0  ;;  %v8457_v41 = vld [vmem:[%s9223_s17 + $0x3a8] sm:$0xff]  ;;  %v8458_v15 = vld [vmem:[%s9223_s17 + $0x3b8] sm:$0xff] }
 0x76c   : > { %v6183_v47 = vadd.f32 %v8450_v59, %v6055_v22  ;;  %v6184_v57 = vadd.f32 %v8451_v42, %v6056_v2  ;;  %v6186_v48 = vadd.f32 %v8452_v24, %v6058_v35  ;;  %v6057_v27 = vadd.f32 %v11237_v46, %v5907_v53  ;;  %v8460_v3 = vld [vmem:[%s9223_s17 + $0x3c8] sm:$0xff] }
 0x76d   : > { %v6059_v23 = vadd.f32 %v11239_v44, %v5909_v33  ;;  %6436 = vst [vmem:[%s11259_s20 + $0x360] sm:$0xff] %v6308_v10  ;;  %6438 = vst [vmem:[%s11259_s20 + $0x370] sm:$0xff] %v6310_v20  ;;  %v6309_v32 = vmax.f32 %v6181_v17, 0.0  ;;  %v5910_v8 = vmul.f32 %v11222_v29, %v5564_v13  ;;  %v5912_v31 = vmul.f32 %v11224_v9, %v5757_v4  ;;  %v5566_v58 = vpop.f32.mrf.mxu1  ;;  %v5759_v54 = vpop.f32.mrf.mxu0  ;;  %v8461_v4 = vld [vmem:[%s9223_s17 + $0x3e0] sm:$0xff] }
 0x76e   : > { %v6311_v19 = vmax.f32 %v6183_v47, 0.0  ;;  %v6312_v7 = vmax.f32 %v6184_v57, 0.0  ;;  %v6314_v26 = vmax.f32 %v6186_v48, 0.0  ;;  %v6185_v36 = vadd.f32 %v8453_v38, %v6057_v27  ;;  %v8462_v27 = vld [vmem:[%s9223_s17 + $0x3e8] sm:$0xff]  ;;  %v8464_v38 = vld [vmem:[%s9223_s17 + $0x3d8] sm:$0xff] }
 0x76f   : > { %v6187_v11 = vadd.f32 %v8454_v21, %v6059_v23  ;;  %6437 = vst [vmem:[%s11259_s20 + $0x368] sm:$0xff] %v6309_v32  ;;  %v6060_v0 = vadd.f32 %v11227_v63, %v5910_v8  ;;  %v6062_v16 = vadd.f32 %v11229_v12, %v5912_v31  ;;  %v5911_v6 = vmul.f32 %v11231_v43, %v5566_v58  ;;  %v5570_v62 = vpop.f32.mrf.mxu1  ;;  %v8463_v31 = vld [vmem:[%s9223_s17 + $0x3d0] sm:$0xff] }
 0x770   : > { %6439 = vst [vmem:[%s11259_s20 + $0x378] sm:$0xff] %v6311_v19  ;;  %v5913_v51 = vmul.f32 %v11233_v40, %v5759_v54  ;;  %6440 = vst [vmem:[%s11259_s20 + $0x380] sm:$0xff] %v6312_v7  ;;  %v6313_v50 = vmax.f32 %v6185_v36, 0.0  ;;  %v5914_v18 = vmul.f32 %v11222_v29, %v5570_v62  ;;  %v8466_v62 = vld [vmem:[%s9223_s17 + $0x3f8] sm:$0xff] }
 0x771   : > { %6442 = vst [vmem:[%s11259_s20 + $0x390] sm:$0xff] %v6314_v26  ;;  %v6315_v30 = vmax.f32 %v6187_v11, 0.0  ;;  %v6188_v60 = vadd.f32 %v8455_v37, %v6060_v0  ;;  %v6190_v61 = vadd.f32 %v8456_v5, %v6062_v16  ;;  %v6061_v28 = vadd.f32 %v11237_v46, %v5911_v6  ;;  %v5572_v56 = vpop.f32.mrf.mxu1  ;;  %v8465_v16 = vld [vmem:[%s9223_s17 + $0x3f0] sm:$0xff]  ;;  %s8923_s17 = smov [#allocation23]  }
 0x772   : > { %v6063_v39 = vadd.f32 %v11239_v44, %v5913_v51  ;;  %6441 = vst [vmem:[%s11259_s20 + $0x388] sm:$0xff] %v6313_v50  ;;  %v6064_v14 = vadd.f32 %v11227_v63, %v5914_v18  ;;  %v5915_v55 = vmul.f32 %v11231_v43, %v5572_v56  ;;  %s8811_s26 = sshll.u32 %s8923_s17, 4  ;;  %s8812_s26 = int_to_ptr.vmem [resolvable:$false] %s8811_s26 }
 0x773   : > { %6443 = vst [vmem:[%s11259_s20 + $0x398] sm:$0xff] %v6315_v30  ;;  %v6316_v1 = vmax.f32 %v6188_v60, 0.0  ;;  %v6318_v49 = vmax.f32 %v6190_v61, 0.0  ;;  %v6189_v52 = vadd.f32 %v8457_v41, %v6061_v28  ;;  %v5574_v22 = vpop.f32.mrf.mxu1  ;;  %s8813_s1 = scalar_lea.vmem %s8812_s26, 32768  ;;  %p8814_p13 = scmp.lt.s32.totalorder %s11760_s24, %s8812_s26 }
 0x774   : > { %v6191_v45 = vadd.f32 %v8458_v15, %v6063_v39  ;;  %v6192_v25 = vadd.f32 %v8459_v34, %v6064_v14  ;;  %v6065_v2 = vadd.f32 %v11237_v46, %v5915_v55  ;;  %v5918_v35 = vmul.f32 %v11222_v29, %v5574_v22  ;;  %p8815_p1 = scmp.lt.s32.totalorder %s8813_s1, %s8807_s19 }
 0x775   : > { %6444 = vst [vmem:[%s11259_s20 + $0x3a0] sm:$0xff] %v6316_v1  ;;  %6446 = vst [vmem:[%s11259_s20 + $0x3b0] sm:$0xff] %v6318_v49  ;;  %v6317_v53 = vmax.f32 %v6189_v52, 0.0  ;;  %v5576_v10 = vpop.f32.mrf.mxu1 }
 0x776   : > { %v6319_v33 = vmax.f32 %v6191_v45, 0.0  ;;  %v6320_v20 = vmax.f32 %v6192_v25, 0.0  ;;  %v6193_v17 = vadd.f32 %v8460_v3, %v6065_v2  ;;  %v6068_v59 = vadd.f32 %v11227_v63, %v5918_v35  ;;  %p8816_p7 = por %p8815_p1, %p8814_p13 }
 0x777   : > { %v5919_v47 = vmul.f32 %v11231_v43, %v5576_v10  ;;  %6445 = vst [vmem:[%s11259_s20 + $0x3a8] sm:$0xff] %v6317_v53  ;;  %v5763_v13 = vpop.f32.mrf.mxu1 }
 0x778   : > { %6447 = vst [vmem:[%s11259_s20 + $0x3b8] sm:$0xff] %v6319_v33  ;;  %6448 = vst [vmem:[%s11259_s20 + $0x3c0] sm:$0xff] %v6320_v20  ;;  %v6321_v29 = vmax.f32 %v6193_v17, 0.0  ;;  %v6196_v42 = vadd.f32 %v8461_v4, %v6068_v59  ;;  %v5916_v24 = vmul.f32 %v11224_v9, %v5763_v13  ;;  %p8817_p8 = pnand %p8816_p7, %p8810_p0 }
 0x779   : > { %v6069_v57 = vadd.f32 %v11237_v46, %v5919_v47  ;;  %v5765_v48 = vpop.f32.mrf.mxu1 }
 0x77a   : > { %6449 = vst [vmem:[%s11259_s20 + $0x3c8] sm:$0xff] %v6321_v29  ;;  %v6324_v63 = vmax.f32 %v6196_v42, 0.0  ;;  %v6066_v23 = vadd.f32 %v11229_v12, %v5916_v24  ;;  %v5917_v32 = vmul.f32 %v11233_v40, %v5765_v48 }
 0x77b   : > { %v6197_v43 = vadd.f32 %v8462_v27, %v6069_v57  ;;  %v5767_v19 = vpop.f32.mrf.mxu1 }
 0x77c   : > { %6452 = vst [vmem:[%s11259_s20 + $0x3e0] sm:$0xff] %v6324_v63  ;;  %v6194_v46 = vadd.f32 %v8463_v31, %v6066_v23  ;;  %v6067_v58 = vadd.f32 %v11239_v44, %v5917_v32  ;;  %v5920_v54 = vmul.f32 %v11224_v9, %v5767_v19 }
 0x77d   : > { %v6325_v8 = vmax.f32 %v6197_v43, 0.0  ;;  %v5769_v7 = vpop.f32.mrf.mxu1 }
 0x77e   : > { %v6322_v26 = vmax.f32 %v6194_v46, 0.0  ;;  %v6195_v36 = vadd.f32 %v8464_v38, %v6067_v58  ;;  %v6070_v21 = vadd.f32 %v11229_v12, %v5920_v54  ;;  %v5921_v11 = vmul.f32 %v11233_v40, %v5769_v7 }
 0x77f   : > { %6453 = vst [vmem:[%s11259_s20 + $0x3e8] sm:$0xff] %v6325_v8 }
 0x780   : > { %6450 = vst [vmem:[%s11259_s20 + $0x3d0] sm:$0xff] %v6322_v26  ;;  %v6323_v0 = vmax.f32 %v6195_v36, 0.0  ;;  %v6198_v6 = vadd.f32 %v8465_v16, %v6070_v21  ;;  %v6071_v9 = vadd.f32 %v11239_v44, %v5921_v11 }
 0x782   : > { %6451 = vst [vmem:[%s11259_s20 + $0x3d8] sm:$0xff] %v6323_v0  ;;  %v6326_v51 = vmax.f32 %v6198_v6, 0.0  ;;  %v6199_v50 = vadd.f32 %v8466_v62, %v6071_v9 }
 0x784   : > { %6454 = vst [vmem:[%s11259_s20 + $0x3f0] sm:$0xff] %v6326_v51  ;;  %v6327_v12 = vmax.f32 %v6199_v50, 0.0 }
 0x786   : > { %6455 = vst [vmem:[%s11259_s20 + $0x3f8] sm:$0xff] %v6327_v12 }
 0x787   : > { %8820 = shalt.err (!%p8817_p8)
}
 0x788   : > { %s8821_s2 = scalar_lea.hbm %s11758_s22, 16384  ;;  %s8825_s18 = scalar_lea.hbm %s12277_s4, 65536 }
 0x789   : > { %p8822_p9 = scmp.ne.s32.totalorder %s11758_s22, %s8821_s2  ;;  %p8826_p12 = scmp.lt.s32.totalorder %s11758_s22, %s12277_s4 }
 0x78a   : > { %p8827_p6 = scmp.lt.s32.totalorder %s8825_s18, %s8821_s2 }
 0x78b   : > { %p8823_p11 = pnand %p8822_p9, %p12278_p3 }
 0x78c   : > { %p8828_p4 = por %p8827_p6, %p8826_p12 }
 0x78d   : > { %p8824_p10 = pneg %p8823_p11 }
 0x78f   : > { %p8829_p2 = pnand %p8828_p4, %p8824_p10 }
 0x791   : > { %8832 = shalt.err (!%p8829_p2)
}
 0x792   : > { %s8924_s19 = smov 512   ;;  %s8925_s26 = smov 32  }
 0x793   : > { %8048 = dma.vmem_to_hbm [thread:$0]  (%p12278_p3), %s11760_s24, 16384, %s11758_s22, %s6457_s28, %s8924_s19, %s8924_s19, %s8925_s26  }
 0x794 PF: > { %p8120_p5 = scmp.ge.s32.totalorder %s8895_s16, 2  ;;  %s6485_s1 = sand.u32 1, %s8883_s29  }
 0x795   : > { %p12279_p0 = scmp.ne.s32.totalorder %s11960_s14, 0  ;;  %s6486_s2 = scalar_lea.sflag [#allocation4], %s6485_s1 }
 0x797   : > { %p8092_p13 = pnand %p8120_p5, %p12279_p0 }
 0x799   : > { %p8093_p1 = pneg %p8092_p13 }
 0x79b   : > { %8878 = dma.done.wait (%p8093_p1), %s6486_s2, 16384  }
 0x79c   : > { %8880 = vsyncadd (%p8093_p1), %s6486_s2, 4294950912  ;;  %p33_p7 = scmp.ge.s32.totalorder %s9145_s23, 6   ;;  %s12280_s29 = smov %s8887_s30 }
 0x79d   : > { %s12281_s30 = smov %s8891_s15  ;;  %s12282_s15 = smov %s9156_s25 }
 0x79e   : > { %s12283_s16 = smov %s9145_s23  ;;  %35 = sbr.rel (!%p33_p7) target bundleno = 19 (0x13), region = 171 }
 0x7a3   :  { %6491 = vsyncpa [#allocation3], 1 }
 0x7a4   :  { %6493 = vsyncpa [#allocation3 + $0x1], 1 }
 0x7a5   :  { %6494 = vsyncpa [#allocation6], 1 }
 0x7a6   :  { %6495 = vsyncpa [#allocation9], 1 }
 0x7a7   :  { %6496 = vsyncpa [#allocation12], 1 }
 0x7a8   :  { %6497 = vsyncpa [#allocation15], 1 }
 0x7a9   :  { %6498 = vsyncpa [#allocation18], 1 }
 0x7aa   :  { %6499 = vsyncpa [#allocation21], 1 }
 0x7ab   :  { %6500 = vsyncpa [#allocation4], 1 }
 0x7ac   :  { %6502 = vsyncpa [#allocation4 + $0x1], 1 }

</bundles_post_ra>
